<compile_context>
chip_gen: v5e
topology: v5e:2x2
jax: 0.10.0
libtpu: 0.0.40
codegen_flags: <defaults>
</compile_context>

<pallas_src>
import functools

import jax
import jax.numpy as jnp
from jax import lax
from jax.experimental import pallas as pl
from jax.experimental.pallas import tpu as pltpu

K1, C1_IN, C1_OUT = 9, 3, 64     # conv1: 3 -> 64, 9x9, valid
K2, C2_OUT = 1, 32               # conv2: 64 -> 32, 1x1
K3, C3_OUT = 5, 3                # conv3: 32 -> 3, 5x5, valid

KPATCH = K1 * K1 * C1_IN         # 243 im2col features for conv1
KP1 = 256                        # 243 padded to 2x128 (v5e) / 1x256 (v6e/v7x)


def _round_up(x, m):
    return (x + m - 1) // m * m


def _pick_tile(p):
    for t in (1024, 512, 256, 128):
        if p % t == 0:
            return t
    return 128


def _srcnn_kernel(p1_ref, w1_ref, b1_ref, w2_ref, b2_ref, w3_ref, b3_ref,
                  o_ref, h2_scr, *, W1, P3, TILE_P):
    """Grid = (image, pixel_tile).  p1_ref: (1, 256, TILE_P) bf16 patches."""
    t = pl.program_id(1)

    # ---- conv1 (im2col, K=256) + ReLU, conv2 (1x1, K=64) + ReLU ------------
    x = p1_ref[0]                                            # (256, TILE_P) bf16
    h1 = jnp.dot(w1_ref[...], x, preferred_element_type=jnp.float32)
    h1 = jnp.maximum(h1 + b1_ref[...], 0.0)                  # (64, TILE_P) f32
    h2 = jnp.dot(w2_ref[...], h1.astype(jnp.bfloat16),
                 preferred_element_type=jnp.float32)
    h2 = jnp.maximum(h2 + b2_ref[...], 0.0)                  # (32, TILE_P) f32

    lane0 = pl.multiple_of(t * TILE_P, TILE_P)
    h2_scr[:, pl.ds(lane0, TILE_P)] = h2.astype(jnp.bfloat16)

    # ---- conv3 (5x5): once per image, after the full h2 slab is in scratch --
    @pl.when(t == pl.num_programs(1) - 1)
    def _():
        parts = []
        for kh in range(K3):                 # 5 independent partial accumulators
            acc = None
            for kw in range(K3):
                off = kh * W1 + kw           # static lane offset of this tap
                d = jnp.dot(w3_ref[kh * K3 + kw],            # (3, 32) bf16
                            h2_scr[:, off:off + P3],         # (32, P3) bf16
                            preferred_element_type=jnp.float32)
                acc = d if acc is None else acc + d
            parts.append(acc)
        acc3 = (parts[0] + parts[1]) + (parts[2] + parts[3]) + parts[4]
        o_ref[0] = acc3 + b3_ref[...]                        # (3, P3) f32, lane-dense


def srcnn_forward(x_nchw, params):
    """Pallas forward.  x_nchw: (N, 3, H, W) f32 -> (N, 3, H-12, W-12) f32."""
    w1, b1, w2, b2, w3, b3 = params
    N, C, H, W = x_nchw.shape
    assert C == C1_IN and H >= K1 + K3 - 1 and W >= K1 + K3 - 1
    H1, W1 = H - K1 + 1, W - K1 + 1
    H3, W3 = H1 - K3 + 1, W1 - K3 + 1
    P1 = H1 * W1                      # conv1/conv2 pixels (no wrap garbage)
    P3 = H3 * W1                      # conv3 flat span incl. K3-1 wrap cols/row
    P1L = _round_up(P1 + (K3 - 1), 128)   # lane-padded so all tap reads fit
    TILE_P = _pick_tile(P1L)

    # Invariants: the furthest lane any conv3 output reads stays inside the
    # padded slab, and valid outputs (w < W3) never read a wrapped lane.
    assert (P3 - 1) + (K3 - 1) * (W1 + 1) == P1 + K3 - 2 < P1L
    assert W3 + (K3 - 1) == W1 and P1L % TILE_P == 0
    # Whole-image conv3 needs the h2 slab resident in VMEM.
    assert C2_OUT * P1L * 2 <= 16 * 1024 * 1024, \
        "image too large for single-pass conv3; add row-block (halo) tiling"

    # ---- conv1 im2col, channel-major, (kh, kw, cin) feature order ----------
    taps = [x_nchw[:, :, kh:kh + H1, kw:kw + W1]
            for kh in range(K1) for kw in range(K1)]
    p1 = jnp.concatenate(taps, axis=1).reshape(N, KPATCH, P1)
    p1 = jnp.pad(p1, ((0, 0), (0, KP1 - KPATCH), (0, P1L - P1)))
    p1 = p1.astype(jnp.bfloat16)

    # ---- weights: pre-reshaped lane-aligned slabs, bf16 for the MXU --------
    w1t = jnp.pad(w1.reshape(KPATCH, C1_OUT).T,
                  ((0, 0), (0, KP1 - KPATCH))).astype(jnp.bfloat16)   # (64,256)
    w2t = w2.T.astype(jnp.bfloat16)                                    # (32,64)
    w3t = jnp.transpose(w3.reshape(K3 * K3, C2_OUT, C3_OUT),
                        (0, 2, 1)).astype(jnp.bfloat16)                # (25,3,32)
    b1c = b1.reshape(C1_OUT, 1).astype(jnp.float32)
    b2c = b2.reshape(C2_OUT, 1).astype(jnp.float32)
    b3c = b3.reshape(C3_OUT, 1).astype(jnp.float32)

    kernel = functools.partial(_srcnn_kernel, W1=W1, P3=P3, TILE_P=TILE_P)
    out_flat = pl.pallas_call(
        kernel,
        out_shape=jax.ShapeDtypeStruct((N, C3_OUT, P3), jnp.float32),
        grid_spec=pltpu.PrefetchScalarGridSpec(
            num_scalar_prefetch=0,
            grid=(N, P1L // TILE_P),
            in_specs=[
                pl.BlockSpec((1, KP1, TILE_P), lambda n, t: (n, 0, t)),
                pl.BlockSpec((C1_OUT, KP1), lambda n, t: (0, 0)),
                pl.BlockSpec((C1_OUT, 1), lambda n, t: (0, 0)),
                pl.BlockSpec((C2_OUT, C1_OUT), lambda n, t: (0, 0)),
                pl.BlockSpec((C2_OUT, 1), lambda n, t: (0, 0)),
                pl.BlockSpec((K3 * K3, C3_OUT, C2_OUT), lambda n, t: (0, 0, 0)),
                pl.BlockSpec((C3_OUT, 1), lambda n, t: (0, 0)),
            ],
            out_specs=pl.BlockSpec((1, C3_OUT, P3), lambda n, t: (n, 0, 0)),
            scratch_shapes=[pltpu.VMEM((C2_OUT, P1L), jnp.bfloat16)],
        ),
        compiler_params=pltpu.CompilerParams(
            dimension_semantics=("parallel", "arbitrary"),
            vmem_limit_bytes=32 * 1024 * 1024),
    )(p1, w1t, b1c, w2t, b2c, w3t, b3c)

    # channel-major flat -> NCHW: free reshape + trim the K3-1 wrap columns.
    return out_flat.reshape(N, C3_OUT, H3, W1)[:, :, :, :W3]


def init_params(key):
    """Deterministic synthetic params (PyTorch-default-style uniform init)."""
    ks = jax.random.split(key, 6)

    def u(k, shape, fan_in):
        bound = 1.0 / float(fan_in) ** 0.5
        return jax.random.uniform(k, shape, jnp.float32, -bound, bound)

    w1 = u(ks[0], (K1, K1, C1_IN, C1_OUT), K1 * K1 * C1_IN)
    b1 = u(ks[1], (C1_OUT,), K1 * K1 * C1_IN)
    w2 = u(ks[2], (C1_OUT, C2_OUT), C1_OUT)
    b2 = u(ks[3], (C2_OUT,), C1_OUT)
    w3 = u(ks[4], (K3, K3, C2_OUT, C3_OUT), K3 * K3 * C2_OUT)
    b3 = u(ks[5], (C3_OUT,), K3 * K3 * C2_OUT)
    return w1, b1, w2, b2, w3, b3


def srcnn_ref(x_nchw, params):
    """Pure-JAX f32 reference (NHWC convs) matching the PyTorch forward."""
    w1, b1, w2, b2, w3, b3 = params
    dn = ('NHWC', 'HWIO', 'NHWC')

    def conv(x, w, b):
        y = lax.conv_general_dilated(x, w, (1, 1), 'VALID',
                                     dimension_numbers=dn)
        return y + b.reshape(1, 1, 1, -1)

    x = jnp.transpose(x_nchw, (0, 2, 3, 1))
    h = jax.nn.relu(conv(x, w1, b1))
    h = jax.nn.relu(conv(h, w2.reshape(1, 1, C1_OUT, C2_OUT), b2))
    y = conv(h, w3, b3)
    return jnp.transpose(y, (0, 3, 1, 2))


if __name__ == "__main__":
    key = jax.random.PRNGKey(0)
    kx, kp = jax.random.split(key)
    x = jax.random.normal(kx, (2, 3, 32, 32), jnp.float32)   # NCHW, like PyTorch
    params = init_params(kp)

    out = jax.jit(srcnn_forward)(x, params)
    out = jax.block_until_ready(out)

    ref = srcnn_ref(x, params)
    assert out.shape == ref.shape == (2, 3, 20, 20), (out.shape, ref.shape)
    max_err = float(jnp.max(jnp.abs(out - ref)))
    assert max_err < 5e-2, f"max abs err too large: {max_err}"
    print("KERNEL_OK")
</pallas_src>

<mosaic_0001>
module attributes {stable_mosaic.version = 11 : i64} {
  func.func @_srcnn_kernel(%arg0: i32, %arg1: i32, %arg2: memref<1x256x128xbf16, #tpu.memory_space<vmem>>, %arg3: memref<64x256xbf16, #tpu.memory_space<vmem>>, %arg4: memref<64x1xf32, #tpu.memory_space<vmem>>, %arg5: memref<32x64xbf16, #tpu.memory_space<vmem>>, %arg6: memref<32x1xf32, #tpu.memory_space<vmem>>, %arg7: memref<25x3x32xbf16, #tpu.memory_space<vmem>>, %arg8: memref<3x1xf32, #tpu.memory_space<vmem>>, %arg9: memref<1x3x480xf32, #tpu.memory_space<vmem>>, %arg10: memref<32x640xbf16, #tpu.memory_space<vmem>>) attributes {dimension_semantics = [#tpu.dimension_semantics<parallel>, #tpu.dimension_semantics<arbitrary>], iteration_bounds = array<i64: 2, 5>, scalar_prefetch = 0 : i64, scratch_operands = 1 : i64, tpu.core_type = #tpu.core_type<tc>, window_params = [{transform_indices = @transform_0, window_bounds = array<i64: 1, 256, 128>}, {pipeline_mode = #tpu.pipeline_mode<synchronous>, transform_indices = @transform_1, window_bounds = array<i64: 64, 256>}, {pipeline_mode = #tpu.pipeline_mode<synchronous>, transform_indices = @transform_2, window_bounds = array<i64: 64, 1>}, {pipeline_mode = #tpu.pipeline_mode<synchronous>, transform_indices = @transform_3, window_bounds = array<i64: 32, 64>}, {pipeline_mode = #tpu.pipeline_mode<synchronous>, transform_indices = @transform_4, window_bounds = array<i64: 32, 1>}, {pipeline_mode = #tpu.pipeline_mode<synchronous>, transform_indices = @transform_5, window_bounds = array<i64: 25, 3, 32>}, {pipeline_mode = #tpu.pipeline_mode<synchronous>, transform_indices = @transform_6, window_bounds = array<i64: 3, 1>}, {transform_indices = @transform_7, window_bounds = array<i64: 1, 3, 480>}]} {
    %c0 = arith.constant 0 : index
    %c0_0 = arith.constant 0 : index
    %c0_1 = arith.constant 0 : index
    %0 = vector.load %arg2[%c0, %c0_0, %c0_1] : memref<1x256x128xbf16, #tpu.memory_space<vmem>>, vector<1x256x128xbf16>
    %1 = vector.shape_cast %0 : vector<1x256x128xbf16> to vector<256x128xbf16>
    %c0_2 = arith.constant 0 : index
    %c0_3 = arith.constant 0 : index
    %2 = vector.load %arg3[%c0_2, %c0_3] : memref<64x256xbf16, #tpu.memory_space<vmem>>, vector<64x256xbf16>
    %cst = arith.constant dense<0.000000e+00> : vector<64x128xf32>
    %3 = tpu.matmul %2, %1, %cst {dimension_numbers = #tpu.dot_dimension_numbers<[1], [0], [0], [1], [0, 0, 1, 1], [], []>} : vector<64x256xbf16>, vector<256x128xbf16>, vector<64x128xf32> -> vector<64x128xf32>
    %c0_4 = arith.constant 0 : index
    %c0_5 = arith.constant 0 : index
    %4 = vector.load %arg4[%c0_4, %c0_5] : memref<64x1xf32, #tpu.memory_space<vmem>>, vector<64x1xf32>
    %5 = vector.broadcast %4 : vector<64x1xf32> to vector<64x128xf32>
    %6 = arith.addf %3, %5 : vector<64x128xf32>
    %cst_6 = arith.constant 0.000000e+00 : f32
    %7 = vector.broadcast %cst_6 : f32 to vector<64x128xf32>
    %8 = arith.maximumf %6, %7 : vector<64x128xf32>
    %c0_7 = arith.constant 0 : index
    %c0_8 = arith.constant 0 : index
    %9 = vector.load %arg5[%c0_7, %c0_8] : memref<32x64xbf16, #tpu.memory_space<vmem>>, vector<32x64xbf16>
    %10 = arith.truncf %8 : vector<64x128xf32> to vector<64x128xbf16>
    %cst_9 = arith.constant dense<0.000000e+00> : vector<32x128xf32>
    %11 = tpu.matmul %9, %10, %cst_9 {dimension_numbers = #tpu.dot_dimension_numbers<[1], [0], [0], [1], [0, 0, 1, 1], [], []>} : vector<32x64xbf16>, vector<64x128xbf16>, vector<32x128xf32> -> vector<32x128xf32>
    %c0_10 = arith.constant 0 : index
    %c0_11 = arith.constant 0 : index
    %12 = vector.load %arg6[%c0_10, %c0_11] : memref<32x1xf32, #tpu.memory_space<vmem>>, vector<32x1xf32>
    %13 = vector.broadcast %12 : vector<32x1xf32> to vector<32x128xf32>
    %14 = arith.addf %11, %13 : vector<32x128xf32>
    %cst_12 = arith.constant 0.000000e+00 : f32
    %15 = vector.broadcast %cst_12 : f32 to vector<32x128xf32>
    %16 = arith.maximumf %14, %15 : vector<32x128xf32>
    %c128_i32 = arith.constant 128 : i32
    %17 = arith.muli %arg1, %c128_i32 : i32
    %18 = tpu.assume_multiple %17, 128 : i32
    %19 = arith.truncf %16 : vector<32x128xf32> to vector<32x128xbf16>
    %c0_13 = arith.constant 0 : index
    %20 = arith.index_cast %18 : i32 to index
    %21 = vector.load %arg10[%c0_13, %20] : memref<32x640xbf16, #tpu.memory_space<vmem>>, vector<32x128xbf16>
    tpu.vector_store %arg10[%c0_13, %20], %19 {strides = array<i32>} : memref<32x640xbf16, #tpu.memory_space<vmem>>, vector<32x128xbf16>,
    %c4_i32 = arith.constant 4 : i32
    %22 = arith.cmpi eq, %arg1, %c4_i32 : i32
    %23 = arith.extui %22 : i1 to i32
    %c0_i32 = arith.constant 0 : i32
    %24 = arith.cmpi ne, %23, %c0_i32 : i32
    scf.if %24 {
      %c0_14 = arith.constant 0 : index
      %c0_15 = arith.constant 0 : index
      %c0_16 = arith.constant 0 : index
      %25 = vector.load %arg7[%c0_14, %c0_15, %c0_16] : memref<25x3x32xbf16, #tpu.memory_space<vmem>>, vector<1x3x32xbf16>
      %26 = vector.shape_cast %25 : vector<1x3x32xbf16> to vector<3x32xbf16>
      %c0_17 = arith.constant 0 : index
      %c0_18 = arith.constant 0 : index
      %27 = vector.load %arg10[%c0_17, %c0_18] : memref<32x640xbf16, #tpu.memory_space<vmem>>, vector<32x480xbf16>
      %cst_19 = arith.constant dense<0.000000e+00> : vector<3x480xf32>
      %28 = tpu.matmul %26, %27, %cst_19 {dimension_numbers = #tpu.dot_dimension_numbers<[1], [0], [0], [1], [0, 0, 1, 1], [], []>} : vector<3x32xbf16>, vector<32x480xbf16>, vector<3x480xf32> -> vector<3x480xf32>
      %c1 = arith.constant 1 : index
      %c0_20 = arith.constant 0 : index
      %c0_21 = arith.constant 0 : index
      %29 = vector.load %arg7[%c1, %c0_20, %c0_21] : memref<25x3x32xbf16, #tpu.memory_space<vmem>>, vector<1x3x32xbf16>
      %30 = vector.shape_cast %29 : vector<1x3x32xbf16> to vector<3x32xbf16>
      %c0_22 = arith.constant 0 : index
      %c1_23 = arith.constant 1 : index
      %31 = vector.load %arg10[%c0_22, %c1_23] : memref<32x640xbf16, #tpu.memory_space<vmem>>, vector<32x480xbf16>
      %cst_24 = arith.constant dense<0.000000e+00> : vector<3x480xf32>
      %32 = tpu.matmul %30, %31, %cst_24 {dimension_numbers = #tpu.dot_dimension_numbers<[1], [0], [0], [1], [0, 0, 1, 1], [], []>} : vector<3x32xbf16>, vector<32x480xbf16>, vector<3x480xf32> -> vector<3x480xf32>
      %33 = arith.addf %28, %32 : vector<3x480xf32>
      %c2 = arith.constant 2 : index
      %c0_25 = arith.constant 0 : index
      %c0_26 = arith.constant 0 : index
      %34 = vector.load %arg7[%c2, %c0_25, %c0_26] : memref<25x3x32xbf16, #tpu.memory_space<vmem>>, vector<1x3x32xbf16>
      %35 = vector.shape_cast %34 : vector<1x3x32xbf16> to vector<3x32xbf16>
      %c0_27 = arith.constant 0 : index
      %c2_28 = arith.constant 2 : index
      %36 = vector.load %arg10[%c0_27, %c2_28] : memref<32x640xbf16, #tpu.memory_space<vmem>>, vector<32x480xbf16>
      %cst_29 = arith.constant dense<0.000000e+00> : vector<3x480xf32>
      %37 = tpu.matmul %35, %36, %cst_29 {dimension_numbers = #tpu.dot_dimension_numbers<[1], [0], [0], [1], [0, 0, 1, 1], [], []>} : vector<3x32xbf16>, vector<32x480xbf16>, vector<3x480xf32> -> vector<3x480xf32>
      %38 = arith.addf %33, %37 : vector<3x480xf32>
      %c3 = arith.constant 3 : index
      %c0_30 = arith.constant 0 : index
      %c0_31 = arith.constant 0 : index
      %39 = vector.load %arg7[%c3, %c0_30, %c0_31] : memref<25x3x32xbf16, #tpu.memory_space<vmem>>, vector<1x3x32xbf16>
      %40 = vector.shape_cast %39 : vector<1x3x32xbf16> to vector<3x32xbf16>
      %c0_32 = arith.constant 0 : index
      %c3_33 = arith.constant 3 : index
      %41 = vector.load %arg10[%c0_32, %c3_33] : memref<32x640xbf16, #tpu.memory_space<vmem>>, vector<32x480xbf16>
      %cst_34 = arith.constant dense<0.000000e+00> : vector<3x480xf32>
      %42 = tpu.matmul %40, %41, %cst_34 {dimension_numbers = #tpu.dot_dimension_numbers<[1], [0], [0], [1], [0, 0, 1, 1], [], []>} : vector<3x32xbf16>, vector<32x480xbf16>, vector<3x480xf32> -> vector<3x480xf32>
      %43 = arith.addf %38, %42 : vector<3x480xf32>
      %c4 = arith.constant 4 : index
      %c0_35 = arith.constant 0 : index
      %c0_36 = arith.constant 0 : index
      %44 = vector.load %arg7[%c4, %c0_35, %c0_36] : memref<25x3x32xbf16, #tpu.memory_space<vmem>>, vector<1x3x32xbf16>
      %45 = vector.shape_cast %44 : vector<1x3x32xbf16> to vector<3x32xbf16>
      %c0_37 = arith.constant 0 : index
      %c4_38 = arith.constant 4 : index
      %46 = vector.load %arg10[%c0_37, %c4_38] : memref<32x640xbf16, #tpu.memory_space<vmem>>, vector<32x480xbf16>
      %cst_39 = arith.constant dense<0.000000e+00> : vector<3x480xf32>
      %47 = tpu.matmul %45, %46, %cst_39 {dimension_numbers = #tpu.dot_dimension_numbers<[1], [0], [0], [1], [0, 0, 1, 1], [], []>} : vector<3x32xbf16>, vector<32x480xbf16>, vector<3x480xf32> -> vector<3x480xf32>
      %48 = arith.addf %43, %47 : vector<3x480xf32>
      %c5 = arith.constant 5 : index
      %c0_40 = arith.constant 0 : index
      %c0_41 = arith.constant 0 : index
      %49 = vector.load %arg7[%c5, %c0_40, %c0_41] : memref<25x3x32xbf16, #tpu.memory_space<vmem>>, vector<1x3x32xbf16>
      %50 = vector.shape_cast %49 : vector<1x3x32xbf16> to vector<3x32xbf16>
      %c0_42 = arith.constant 0 : index
      %c24 = arith.constant 24 : index
      %51 = vector.load %arg10[%c0_42, %c24] : memref<32x640xbf16, #tpu.memory_space<vmem>>, vector<32x480xbf16>
      %cst_43 = arith.constant dense<0.000000e+00> : vector<3x480xf32>
      %52 = tpu.matmul %50, %51, %cst_43 {dimension_numbers = #tpu.dot_dimension_numbers<[1], [0], [0], [1], [0, 0, 1, 1], [], []>} : vector<3x32xbf16>, vector<32x480xbf16>, vector<3x480xf32> -> vector<3x480xf32>
      %c6 = arith.constant 6 : index
      %c0_44 = arith.constant 0 : index
      %c0_45 = arith.constant 0 : index
      %53 = vector.load %arg7[%c6, %c0_44, %c0_45] : memref<25x3x32xbf16, #tpu.memory_space<vmem>>, vector<1x3x32xbf16>
      %54 = vector.shape_cast %53 : vector<1x3x32xbf16> to vector<3x32xbf16>
      %c0_46 = arith.constant 0 : index
      %c25 = arith.constant 25 : index
      %55 = vector.load %arg10[%c0_46, %c25] : memref<32x640xbf16, #tpu.memory_space<vmem>>, vector<32x480xbf16>
      %cst_47 = arith.constant dense<0.000000e+00> : vector<3x480xf32>
      %56 = tpu.matmul %54, %55, %cst_47 {dimension_numbers = #tpu.dot_dimension_numbers<[1], [0], [0], [1], [0, 0, 1, 1], [], []>} : vector<3x32xbf16>, vector<32x480xbf16>, vector<3x480xf32> -> vector<3x480xf32>
      %57 = arith.addf %52, %56 : vector<3x480xf32>
      %c7 = arith.constant 7 : index
      %c0_48 = arith.constant 0 : index
      %c0_49 = arith.constant 0 : index
      %58 = vector.load %arg7[%c7, %c0_48, %c0_49] : memref<25x3x32xbf16, #tpu.memory_space<vmem>>, vector<1x3x32xbf16>
      %59 = vector.shape_cast %58 : vector<1x3x32xbf16> to vector<3x32xbf16>
      %c0_50 = arith.constant 0 : index
      %c26 = arith.constant 26 : index
      %60 = vector.load %arg10[%c0_50, %c26] : memref<32x640xbf16, #tpu.memory_space<vmem>>, vector<32x480xbf16>
      %cst_51 = arith.constant dense<0.000000e+00> : vector<3x480xf32>
      %61 = tpu.matmul %59, %60, %cst_51 {dimension_numbers = #tpu.dot_dimension_numbers<[1], [0], [0], [1], [0, 0, 1, 1], [], []>} : vector<3x32xbf16>, vector<32x480xbf16>, vector<3x480xf32> -> vector<3x480xf32>
      %62 = arith.addf %57, %61 : vector<3x480xf32>
      %c8 = arith.constant 8 : index
      %c0_52 = arith.constant 0 : index
      %c0_53 = arith.constant 0 : index
      %63 = vector.load %arg7[%c8, %c0_52, %c0_53] : memref<25x3x32xbf16, #tpu.memory_space<vmem>>, vector<1x3x32xbf16>
      %64 = vector.shape_cast %63 : vector<1x3x32xbf16> to vector<3x32xbf16>
      %c0_54 = arith.constant 0 : index
      %c27 = arith.constant 27 : index
      %65 = vector.load %arg10[%c0_54, %c27] : memref<32x640xbf16, #tpu.memory_space<vmem>>, vector<32x480xbf16>
      %cst_55 = arith.constant dense<0.000000e+00> : vector<3x480xf32>
      %66 = tpu.matmul %64, %65, %cst_55 {dimension_numbers = #tpu.dot_dimension_numbers<[1], [0], [0], [1], [0, 0, 1, 1], [], []>} : vector<3x32xbf16>, vector<32x480xbf16>, vector<3x480xf32> -> vector<3x480xf32>
      %67 = arith.addf %62, %66 : vector<3x480xf32>
      %c9 = arith.constant 9 : index
      %c0_56 = arith.constant 0 : index
      %c0_57 = arith.constant 0 : index
      %68 = vector.load %arg7[%c9, %c0_56, %c0_57] : memref<25x3x32xbf16, #tpu.memory_space<vmem>>, vector<1x3x32xbf16>
      %69 = vector.shape_cast %68 : vector<1x3x32xbf16> to vector<3x32xbf16>
      %c0_58 = arith.constant 0 : index
      %c28 = arith.constant 28 : index
      %70 = vector.load %arg10[%c0_58, %c28] : memref<32x640xbf16, #tpu.memory_space<vmem>>, vector<32x480xbf16>
      %cst_59 = arith.constant dense<0.000000e+00> : vector<3x480xf32>
      %71 = tpu.matmul %69, %70, %cst_59 {dimension_numbers = #tpu.dot_dimension_numbers<[1], [0], [0], [1], [0, 0, 1, 1], [], []>} : vector<3x32xbf16>, vector<32x480xbf16>, vector<3x480xf32> -> vector<3x480xf32>
      %72 = arith.addf %67, %71 : vector<3x480xf32>
      %c10 = arith.constant 10 : index
      %c0_60 = arith.constant 0 : index
      %c0_61 = arith.constant 0 : index
      %73 = vector.load %arg7[%c10, %c0_60, %c0_61] : memref<25x3x32xbf16, #tpu.memory_space<vmem>>, vector<1x3x32xbf16>
      %74 = vector.shape_cast %73 : vector<1x3x32xbf16> to vector<3x32xbf16>
      %c0_62 = arith.constant 0 : index
      %c48 = arith.constant 48 : index
      %75 = vector.load %arg10[%c0_62, %c48] : memref<32x640xbf16, #tpu.memory_space<vmem>>, vector<32x480xbf16>
      %cst_63 = arith.constant dense<0.000000e+00> : vector<3x480xf32>
      %76 = tpu.matmul %74, %75, %cst_63 {dimension_numbers = #tpu.dot_dimension_numbers<[1], [0], [0], [1], [0, 0, 1, 1], [], []>} : vector<3x32xbf16>, vector<32x480xbf16>, vector<3x480xf32> -> vector<3x480xf32>
      %c11 = arith.constant 11 : index
      %c0_64 = arith.constant 0 : index
      %c0_65 = arith.constant 0 : index
      %77 = vector.load %arg7[%c11, %c0_64, %c0_65] : memref<25x3x32xbf16, #tpu.memory_space<vmem>>, vector<1x3x32xbf16>
      %78 = vector.shape_cast %77 : vector<1x3x32xbf16> to vector<3x32xbf16>
      %c0_66 = arith.constant 0 : index
      %c49 = arith.constant 49 : index
      %79 = vector.load %arg10[%c0_66, %c49] : memref<32x640xbf16, #tpu.memory_space<vmem>>, vector<32x480xbf16>
      %cst_67 = arith.constant dense<0.000000e+00> : vector<3x480xf32>
      %80 = tpu.matmul %78, %79, %cst_67 {dimension_numbers = #tpu.dot_dimension_numbers<[1], [0], [0], [1], [0, 0, 1, 1], [], []>} : vector<3x32xbf16>, vector<32x480xbf16>, vector<3x480xf32> -> vector<3x480xf32>
      %81 = arith.addf %76, %80 : vector<3x480xf32>
      %c12 = arith.constant 12 : index
      %c0_68 = arith.constant 0 : index
      %c0_69 = arith.constant 0 : index
      %82 = vector.load %arg7[%c12, %c0_68, %c0_69] : memref<25x3x32xbf16, #tpu.memory_space<vmem>>, vector<1x3x32xbf16>
      %83 = vector.shape_cast %82 : vector<1x3x32xbf16> to vector<3x32xbf16>
      %c0_70 = arith.constant 0 : index
      %c50 = arith.constant 50 : index
      %84 = vector.load %arg10[%c0_70, %c50] : memref<32x640xbf16, #tpu.memory_space<vmem>>, vector<32x480xbf16>
      %cst_71 = arith.constant dense<0.000000e+00> : vector<3x480xf32>
      %85 = tpu.matmul %83, %84, %cst_71 {dimension_numbers = #tpu.dot_dimension_numbers<[1], [0], [0], [1], [0, 0, 1, 1], [], []>} : vector<3x32xbf16>, vector<32x480xbf16>, vector<3x480xf32> -> vector<3x480xf32>
      %86 = arith.addf %81, %85 : vector<3x480xf32>
      %c13 = arith.constant 13 : index
      %c0_72 = arith.constant 0 : index
      %c0_73 = arith.constant 0 : index
      %87 = vector.load %arg7[%c13, %c0_72, %c0_73] : memref<25x3x32xbf16, #tpu.memory_space<vmem>>, vector<1x3x32xbf16>
      %88 = vector.shape_cast %87 : vector<1x3x32xbf16> to vector<3x32xbf16>
      %c0_74 = arith.constant 0 : index
      %c51 = arith.constant 51 : index
      %89 = vector.load %arg10[%c0_74, %c51] : memref<32x640xbf16, #tpu.memory_space<vmem>>, vector<32x480xbf16>
      %cst_75 = arith.constant dense<0.000000e+00> : vector<3x480xf32>
      %90 = tpu.matmul %88, %89, %cst_75 {dimension_numbers = #tpu.dot_dimension_numbers<[1], [0], [0], [1], [0, 0, 1, 1], [], []>} : vector<3x32xbf16>, vector<32x480xbf16>, vector<3x480xf32> -> vector<3x480xf32>
      %91 = arith.addf %86, %90 : vector<3x480xf32>
      %c14 = arith.constant 14 : index
      %c0_76 = arith.constant 0 : index
      %c0_77 = arith.constant 0 : index
      %92 = vector.load %arg7[%c14, %c0_76, %c0_77] : memref<25x3x32xbf16, #tpu.memory_space<vmem>>, vector<1x3x32xbf16>
      %93 = vector.shape_cast %92 : vector<1x3x32xbf16> to vector<3x32xbf16>
      %c0_78 = arith.constant 0 : index
      %c52 = arith.constant 52 : index
      %94 = vector.load %arg10[%c0_78, %c52] : memref<32x640xbf16, #tpu.memory_space<vmem>>, vector<32x480xbf16>
      %cst_79 = arith.constant dense<0.000000e+00> : vector<3x480xf32>
      %95 = tpu.matmul %93, %94, %cst_79 {dimension_numbers = #tpu.dot_dimension_numbers<[1], [0], [0], [1], [0, 0, 1, 1], [], []>} : vector<3x32xbf16>, vector<32x480xbf16>, vector<3x480xf32> -> vector<3x480xf32>
      %96 = arith.addf %91, %95 : vector<3x480xf32>
      %c15 = arith.constant 15 : index
      %c0_80 = arith.constant 0 : index
      %c0_81 = arith.constant 0 : index
      %97 = vector.load %arg7[%c15, %c0_80, %c0_81] : memref<25x3x32xbf16, #tpu.memory_space<vmem>>, vector<1x3x32xbf16>
      %98 = vector.shape_cast %97 : vector<1x3x32xbf16> to vector<3x32xbf16>
      %c0_82 = arith.constant 0 : index
      %c72 = arith.constant 72 : index
      %99 = vector.load %arg10[%c0_82, %c72] : memref<32x640xbf16, #tpu.memory_space<vmem>>, vector<32x480xbf16>
      %cst_83 = arith.constant dense<0.000000e+00> : vector<3x480xf32>
      %100 = tpu.matmul %98, %99, %cst_83 {dimension_numbers = #tpu.dot_dimension_numbers<[1], [0], [0], [1], [0, 0, 1, 1], [], []>} : vector<3x32xbf16>, vector<32x480xbf16>, vector<3x480xf32> -> vector<3x480xf32>
      %c16 = arith.constant 16 : index
      %c0_84 = arith.constant 0 : index
      %c0_85 = arith.constant 0 : index
      %101 = vector.load %arg7[%c16, %c0_84, %c0_85] : memref<25x3x32xbf16, #tpu.memory_space<vmem>>, vector<1x3x32xbf16>
      %102 = vector.shape_cast %101 : vector<1x3x32xbf16> to vector<3x32xbf16>
      %c0_86 = arith.constant 0 : index
      %c73 = arith.constant 73 : index
      %103 = vector.load %arg10[%c0_86, %c73] : memref<32x640xbf16, #tpu.memory_space<vmem>>, vector<32x480xbf16>
      %cst_87 = arith.constant dense<0.000000e+00> : vector<3x480xf32>
      %104 = tpu.matmul %102, %103, %cst_87 {dimension_numbers = #tpu.dot_dimension_numbers<[1], [0], [0], [1], [0, 0, 1, 1], [], []>} : vector<3x32xbf16>, vector<32x480xbf16>, vector<3x480xf32> -> vector<3x480xf32>
      %105 = arith.addf %100, %104 : vector<3x480xf32>
      %c17 = arith.constant 17 : index
      %c0_88 = arith.constant 0 : index
      %c0_89 = arith.constant 0 : index
      %106 = vector.load %arg7[%c17, %c0_88, %c0_89] : memref<25x3x32xbf16, #tpu.memory_space<vmem>>, vector<1x3x32xbf16>
      %107 = vector.shape_cast %106 : vector<1x3x32xbf16> to vector<3x32xbf16>
      %c0_90 = arith.constant 0 : index
      %c74 = arith.constant 74 : index
      %108 = vector.load %arg10[%c0_90, %c74] : memref<32x640xbf16, #tpu.memory_space<vmem>>, vector<32x480xbf16>
      %cst_91 = arith.constant dense<0.000000e+00> : vector<3x480xf32>
      %109 = tpu.matmul %107, %108, %cst_91 {dimension_numbers = #tpu.dot_dimension_numbers<[1], [0], [0], [1], [0, 0, 1, 1], [], []>} : vector<3x32xbf16>, vector<32x480xbf16>, vector<3x480xf32> -> vector<3x480xf32>
      %110 = arith.addf %105, %109 : vector<3x480xf32>
      %c18 = arith.constant 18 : index
      %c0_92 = arith.constant 0 : index
      %c0_93 = arith.constant 0 : index
      %111 = vector.load %arg7[%c18, %c0_92, %c0_93] : memref<25x3x32xbf16, #tpu.memory_space<vmem>>, vector<1x3x32xbf16>
      %112 = vector.shape_cast %111 : vector<1x3x32xbf16> to vector<3x32xbf16>
      %c0_94 = arith.constant 0 : index
      %c75 = arith.constant 75 : index
      %113 = vector.load %arg10[%c0_94, %c75] : memref<32x640xbf16, #tpu.memory_space<vmem>>, vector<32x480xbf16>
      %cst_95 = arith.constant dense<0.000000e+00> : vector<3x480xf32>
      %114 = tpu.matmul %112, %113, %cst_95 {dimension_numbers = #tpu.dot_dimension_numbers<[1], [0], [0], [1], [0, 0, 1, 1], [], []>} : vector<3x32xbf16>, vector<32x480xbf16>, vector<3x480xf32> -> vector<3x480xf32>
      %115 = arith.addf %110, %114 : vector<3x480xf32>
      %c19 = arith.constant 19 : index
      %c0_96 = arith.constant 0 : index
      %c0_97 = arith.constant 0 : index
      %116 = vector.load %arg7[%c19, %c0_96, %c0_97] : memref<25x3x32xbf16, #tpu.memory_space<vmem>>, vector<1x3x32xbf16>
      %117 = vector.shape_cast %116 : vector<1x3x32xbf16> to vector<3x32xbf16>
      %c0_98 = arith.constant 0 : index
      %c76 = arith.constant 76 : index
      %118 = vector.load %arg10[%c0_98, %c76] : memref<32x640xbf16, #tpu.memory_space<vmem>>, vector<32x480xbf16>
      %cst_99 = arith.constant dense<0.000000e+00> : vector<3x480xf32>
      %119 = tpu.matmul %117, %118, %cst_99 {dimension_numbers = #tpu.dot_dimension_numbers<[1], [0], [0], [1], [0, 0, 1, 1], [], []>} : vector<3x32xbf16>, vector<32x480xbf16>, vector<3x480xf32> -> vector<3x480xf32>
      %120 = arith.addf %115, %119 : vector<3x480xf32>
      %c20 = arith.constant 20 : index
      %c0_100 = arith.constant 0 : index
      %c0_101 = arith.constant 0 : index
      %121 = vector.load %arg7[%c20, %c0_100, %c0_101] : memref<25x3x32xbf16, #tpu.memory_space<vmem>>, vector<1x3x32xbf16>
      %122 = vector.shape_cast %121 : vector<1x3x32xbf16> to vector<3x32xbf16>
      %c0_102 = arith.constant 0 : index
      %c96 = arith.constant 96 : index
      %123 = vector.load %arg10[%c0_102, %c96] : memref<32x640xbf16, #tpu.memory_space<vmem>>, vector<32x480xbf16>
      %cst_103 = arith.constant dense<0.000000e+00> : vector<3x480xf32>
      %124 = tpu.matmul %122, %123, %cst_103 {dimension_numbers = #tpu.dot_dimension_numbers<[1], [0], [0], [1], [0, 0, 1, 1], [], []>} : vector<3x32xbf16>, vector<32x480xbf16>, vector<3x480xf32> -> vector<3x480xf32>
      %c21 = arith.constant 21 : index
      %c0_104 = arith.constant 0 : index
      %c0_105 = arith.constant 0 : index
      %125 = vector.load %arg7[%c21, %c0_104, %c0_105] : memref<25x3x32xbf16, #tpu.memory_space<vmem>>, vector<1x3x32xbf16>
      %126 = vector.shape_cast %125 : vector<1x3x32xbf16> to vector<3x32xbf16>
      %c0_106 = arith.constant 0 : index
      %c97 = arith.constant 97 : index
      %127 = vector.load %arg10[%c0_106, %c97] : memref<32x640xbf16, #tpu.memory_space<vmem>>, vector<32x480xbf16>
      %cst_107 = arith.constant dense<0.000000e+00> : vector<3x480xf32>
      %128 = tpu.matmul %126, %127, %cst_107 {dimension_numbers = #tpu.dot_dimension_numbers<[1], [0], [0], [1], [0, 0, 1, 1], [], []>} : vector<3x32xbf16>, vector<32x480xbf16>, vector<3x480xf32> -> vector<3x480xf32>
      %129 = arith.addf %124, %128 : vector<3x480xf32>
      %c22 = arith.constant 22 : index
      %c0_108 = arith.constant 0 : index
      %c0_109 = arith.constant 0 : index
      %130 = vector.load %arg7[%c22, %c0_108, %c0_109] : memref<25x3x32xbf16, #tpu.memory_space<vmem>>, vector<1x3x32xbf16>
      %131 = vector.shape_cast %130 : vector<1x3x32xbf16> to vector<3x32xbf16>
      %c0_110 = arith.constant 0 : index
      %c98 = arith.constant 98 : index
      %132 = vector.load %arg10[%c0_110, %c98] : memref<32x640xbf16, #tpu.memory_space<vmem>>, vector<32x480xbf16>
      %cst_111 = arith.constant dense<0.000000e+00> : vector<3x480xf32>
      %133 = tpu.matmul %131, %132, %cst_111 {dimension_numbers = #tpu.dot_dimension_numbers<[1], [0], [0], [1], [0, 0, 1, 1], [], []>} : vector<3x32xbf16>, vector<32x480xbf16>, vector<3x480xf32> -> vector<3x480xf32>
      %134 = arith.addf %129, %133 : vector<3x480xf32>
      %c23 = arith.constant 23 : index
      %c0_112 = arith.constant 0 : index
      %c0_113 = arith.constant 0 : index
      %135 = vector.load %arg7[%c23, %c0_112, %c0_113] : memref<25x3x32xbf16, #tpu.memory_space<vmem>>, vector<1x3x32xbf16>
      %136 = vector.shape_cast %135 : vector<1x3x32xbf16> to vector<3x32xbf16>
      %c0_114 = arith.constant 0 : index
      %c99 = arith.constant 99 : index
      %137 = vector.load %arg10[%c0_114, %c99] : memref<32x640xbf16, #tpu.memory_space<vmem>>, vector<32x480xbf16>
      %cst_115 = arith.constant dense<0.000000e+00> : vector<3x480xf32>
      %138 = tpu.matmul %136, %137, %cst_115 {dimension_numbers = #tpu.dot_dimension_numbers<[1], [0], [0], [1], [0, 0, 1, 1], [], []>} : vector<3x32xbf16>, vector<32x480xbf16>, vector<3x480xf32> -> vector<3x480xf32>
      %139 = arith.addf %134, %138 : vector<3x480xf32>
      %c24_116 = arith.constant 24 : index
      %c0_117 = arith.constant 0 : index
      %c0_118 = arith.constant 0 : index
      %140 = vector.load %arg7[%c24_116, %c0_117, %c0_118] : memref<25x3x32xbf16, #tpu.memory_space<vmem>>, vector<1x3x32xbf16>
      %141 = vector.shape_cast %140 : vector<1x3x32xbf16> to vector<3x32xbf16>
      %c0_119 = arith.constant 0 : index
      %c100 = arith.constant 100 : index
      %142 = vector.load %arg10[%c0_119, %c100] : memref<32x640xbf16, #tpu.memory_space<vmem>>, vector<32x480xbf16>
      %cst_120 = arith.constant dense<0.000000e+00> : vector<3x480xf32>
      %143 = tpu.matmul %141, %142, %cst_120 {dimension_numbers = #tpu.dot_dimension_numbers<[1], [0], [0], [1], [0, 0, 1, 1], [], []>} : vector<3x32xbf16>, vector<32x480xbf16>, vector<3x480xf32> -> vector<3x480xf32>
      %144 = arith.addf %139, %143 : vector<3x480xf32>
      %145 = arith.addf %48, %72 : vector<3x480xf32>
      %146 = arith.addf %96, %120 : vector<3x480xf32>
      %147 = arith.addf %145, %146 : vector<3x480xf32>
      %148 = arith.addf %147, %144 : vector<3x480xf32>
      %c0_121 = arith.constant 0 : index
      %c0_122 = arith.constant 0 : index
      %149 = vector.load %arg8[%c0_121, %c0_122] : memref<3x1xf32, #tpu.memory_space<vmem>>, vector<3x1xf32>
      %150 = vector.broadcast %149 : vector<3x1xf32> to vector<3x480xf32>
      %151 = arith.addf %148, %150 : vector<3x480xf32>
      %c0_123 = arith.constant 0 : index
      %c0_124 = arith.constant 0 : index
      %c0_125 = arith.constant 0 : index
      %152 = vector.load %arg9[%c0_123, %c0_124, %c0_125] : memref<1x3x480xf32, #tpu.memory_space<vmem>>, vector<1x3x480xf32>
      %153 = vector.shape_cast %152 : vector<1x3x480xf32> to vector<3x480xf32>
      %154 = vector.shape_cast %151 : vector<3x480xf32> to vector<1x3x480xf32>
      tpu.vector_store %arg9[%c0_123, %c0_124, %c0_125], %154 {strides = array<i32>} : memref<1x3x480xf32, #tpu.memory_space<vmem>>, vector<1x3x480xf32>,
    } else {
    }
    return
  }
  func.func @transform_0(%arg0: i32, %arg1: i32) -> (i32, i32, i32) {
    %c0_i32 = arith.constant 0 : i32
    %c0_i32_0 = arith.constant 0 : i32
    return %arg0, %c0_i32, %arg1 : i32, i32, i32
  }
  func.func @transform_1(%arg0: i32, %arg1: i32) -> (i32, i32) {
    %c0_i32 = arith.constant 0 : i32
    %c0_i32_0 = arith.constant 0 : i32
    %c0_i32_1 = arith.constant 0 : i32
    return %c0_i32, %c0_i32_0 : i32, i32
  }
  func.func @transform_2(%arg0: i32, %arg1: i32) -> (i32, i32) {
    %c0_i32 = arith.constant 0 : i32
    %c0_i32_0 = arith.constant 0 : i32
    %c0_i32_1 = arith.constant 0 : i32
    return %c0_i32, %c0_i32_0 : i32, i32
  }
  func.func @transform_3(%arg0: i32, %arg1: i32) -> (i32, i32) {
    %c0_i32 = arith.constant 0 : i32
    %c0_i32_0 = arith.constant 0 : i32
    %c0_i32_1 = arith.constant 0 : i32
    return %c0_i32, %c0_i32_0 : i32, i32
  }
  func.func @transform_4(%arg0: i32, %arg1: i32) -> (i32, i32) {
    %c0_i32 = arith.constant 0 : i32
    %c0_i32_0 = arith.constant 0 : i32
    %c0_i32_1 = arith.constant 0 : i32
    return %c0_i32, %c0_i32_0 : i32, i32
  }
  func.func @transform_5(%arg0: i32, %arg1: i32) -> (i32, i32, i32) {
    %c0_i32 = arith.constant 0 : i32
    %c0_i32_0 = arith.constant 0 : i32
    %c0_i32_1 = arith.constant 0 : i32
    %c0_i32_2 = arith.constant 0 : i32
    return %c0_i32, %c0_i32_0, %c0_i32_1 : i32, i32, i32
  }
  func.func @transform_6(%arg0: i32, %arg1: i32) -> (i32, i32) {
    %c0_i32 = arith.constant 0 : i32
    %c0_i32_0 = arith.constant 0 : i32
    %c0_i32_1 = arith.constant 0 : i32
    return %c0_i32, %c0_i32_0 : i32, i32
  }
  func.func @transform_7(%arg0: i32, %arg1: i32) -> (i32, i32, i32) {
    %c0_i32 = arith.constant 0 : i32
    %c0_i32_0 = arith.constant 0 : i32
    %c0_i32_1 = arith.constant 0 : i32
    return %arg0, %c0_i32, %c0_i32_0 : i32, i32, i32
  }
}

</mosaic_0001>

<bundles_post_ra>
// kernel: srcnn_forward.1
= control target key start
LH: loop header
LB: loop body
LE: loop exit
PB: predicated region body
PF: predicated region fallthrough
CT: control target
= control target key end

     0   :  { %s3968_s24 = smov 0   ;;  %s3970_s25 = smov 0   ;;  %s5193_s0 = inlined_call_operand.vmem [shape: bf16[2,256,640], index: 0, kind: input, shape index: {}]   ;;  %s5194_s1 = inlined_call_operand.vmem [shape: bf16[64,256], index: 1, kind: input, shape index: {}]   ;;  %s5195_s2 = inlined_call_operand.vmem [shape: f32[64,1], index: 2, kind: input, shape index: {}]   ;;  %s5196_s3 = inlined_call_operand.vmem [shape: bf16[32,64], index: 3, kind: input, shape index: {}]   ;;  %s5197_s4 = inlined_call_operand.vmem [shape: f32[32,1], index: 4, kind: input, shape index: {}]   ;;  %s5198_s5 = inlined_call_operand.vmem [shape: bf16[25,3,32], index: 5, kind: input, shape index: {}]   ;;  %s5199_s6 = inlined_call_operand.vmem [shape: f32[3,1], index: 6, kind: input, shape index: {}]   ;;  %s5200_s7 = inlined_call_operand.vmem [shape: f32[2,3,480], index: 7, kind: output, shape index: {}]  }
   0x1   :  { %s3972_s26 = smov 0   ;;  %s3974_s27 = smov 0  }
   0x2   :  { %s3976_s28 = smov 0   ;;  %s3978_s29 = smov 0  }
   0x3   :  { %s3980_s30 = smov 0  }
   0x4 LB: > { %s26_s8 = sadd.s32 1, %s3892_s28  ;;  %s29_s9 = sadd.s32 1, %s3896_s29  ;;  %s3900_s30 = sphi %s3980_s30, %s17_s30   ;;  %s3896_s29 = sphi %s3978_s29, %s5206_s29   ;;  %s3892_s28 = sphi %s3976_s28, %s5205_s28   ;;  %s3888_s27 = sphi %s3974_s27, %s5204_s27   ;;  %s3884_s26 = sphi %s3972_s26, %s5203_s26   ;;  %s3880_s25 = sphi %s3970_s25, %s5202_s25   ;;  %s3876_s24 = sphi %s3968_s24, %s5201_s24  }
   0x5   : > { %p27_p0 = scmp.ge.s32.totalorder %s26_s8, 5  ;;  %p45_p1 = scmp.ne.s32.totalorder %s3880_s25, %s3876_s24 }
   0x6   : > { %p46_p2 = scmp.eq.s32.totalorder %s3900_s30, 0  ;;  %s38_s13 = sadd.s32 1, %s3880_s25 }
   0x7   : > { %s5208_s8 = smov (%p27_p0, %s26_s8), 0  ;;  %s5210_s9 = smov (!%p27_p0, %s29_s9), %s3896_s29 }
   0x8   : > { %p47_p3 = por %p46_p2, %p45_p1  ;;  %p31_p4 = scmp.ge.s32.totalorder %s5210_s9, 2 }
   0x9   : > { %s34_s10 = ssub.s32 %s3892_s28, %s5208_s8  ;;  %p3384_p6 = scmp.ge.s32.totalorder %s3900_s30, 10 }
   0xa   : > { %s5212_s9 = smov (%p31_p4, %s5210_s9), 0 }
   0xb   : > { %s33_s11 = ssub.s32 %s3896_s29, %s5212_s9  ;;  %241 = sbr.rel (%p3384_p6) target bundleno = 55 (0x37), region = 40 }
   0xc   : > { %s35_s12 = sor.u32 %s34_s10, %s33_s11 }
   0xd   : > { %p36_p5 = scmp.eq.s32.totalorder %s35_s12, 0 }
   0xf   : > { %s4019_s14 = scalar_select %p36_p5, %s3880_s25, %s38_s13  }
  0x10   : > { %244 = sbr.rel (!%p47_p3) target bundleno = 55 (0x37), region = 44  ;;  %s246_s15 = sand.u32 (%p47_p3), 1, %s3880_s25  }
  0x11   : > { %s3759_s16 = smul.u32 (%p47_p3), 160, %s3896_s29  ;;  %s3385_s17 = sshll.u32 (%p47_p3), %s246_s15, 7 }
  0x12   : > { %s4033_s23 = scalar_lea.vmem (%p47_p3), [#allocation3], %s3385_s17 }
  0x13   : > { %s250_s18 = sadd.s32 (%p47_p3), %s3892_s28, %s3759_s16 }
  0x14   : > { %s3386_s19 = sshll.u32 (%p47_p3), %s250_s18, 2 }
  0x15   : > { %s4028_s22 = scalar_lea.vmem %s5193_s0, %s3386_s19 }
  0x16   : > { %v269_v0 = vld [vmem:[%s4028_s22] sm:$0xf]  ;;  %v271_v1 = vld [vmem:[%s4028_s22 + $0x14] sm:$0xf]  ;;  %v273_v2 = vld [vmem:[%s4028_s22 + $0x28] sm:$0xf] }
  0x17   : > { %270 = vst [vmem:[%s4033_s23] sm:$0xf] %v269_v0  ;;  %v275_v3 = vld [vmem:[%s4028_s22 + $0x3c] sm:$0xf]  ;;  %v277_v4 = vld [vmem:[%s4028_s22 + $0x50] sm:$0xf] }
  0x18   : > { %272 = vst [vmem:[%s4033_s23 + $0x4] sm:$0xf] %v271_v1  ;;  %v279_v5 = vld [vmem:[%s4028_s22 + $0x64] sm:$0xf]  ;;  %v281_v6 = vld [vmem:[%s4028_s22 + $0x78] sm:$0xf] }
  0x19   : > { %274 = vst [vmem:[%s4033_s23 + $0x8] sm:$0xf] %v273_v2  ;;  %v283_v7 = vld [vmem:[%s4028_s22 + $0x8c] sm:$0xf]  ;;  %v285_v8 = vld [vmem:[%s4028_s22 + $0xa0] sm:$0xf] }
  0x1a   : > { %276 = vst [vmem:[%s4033_s23 + $0xc] sm:$0xf] %v275_v3  ;;  %v287_v9 = vld [vmem:[%s4028_s22 + $0xb4] sm:$0xf]  ;;  %v289_v10 = vld [vmem:[%s4028_s22 + $0xc8] sm:$0xf] }
  0x1b   : > { %278 = vst [vmem:[%s4033_s23 + $0x10] sm:$0xf] %v277_v4  ;;  %v291_v11 = vld [vmem:[%s4028_s22 + $0xdc] sm:$0xf]  ;;  %v293_v12 = vld [vmem:[%s4028_s22 + $0xf0] sm:$0xf] }
  0x1c   : > { %280 = vst [vmem:[%s4033_s23 + $0x14] sm:$0xf] %v279_v5  ;;  %v295_v13 = vld [vmem:[%s4028_s22 + $0x104] sm:$0xf]  ;;  %v297_v14 = vld [vmem:[%s4028_s22 + $0x118] sm:$0xf] }
  0x1d   : > { %282 = vst [vmem:[%s4033_s23 + $0x18] sm:$0xf] %v281_v6  ;;  %v299_v15 = vld [vmem:[%s4028_s22 + $0x12c] sm:$0xf]  ;;  %v301_v16 = vld [vmem:[%s4028_s22 + $0x140] sm:$0xf] }
  0x1e   : > { %284 = vst [vmem:[%s4033_s23 + $0x1c] sm:$0xf] %v283_v7  ;;  %v303_v17 = vld [vmem:[%s4028_s22 + $0x154] sm:$0xf]  ;;  %v305_v18 = vld [vmem:[%s4028_s22 + $0x168] sm:$0xf] }
  0x1f   : > { %286 = vst [vmem:[%s4033_s23 + $0x20] sm:$0xf] %v285_v8  ;;  %v307_v19 = vld [vmem:[%s4028_s22 + $0x17c] sm:$0xf]  ;;  %v309_v20 = vld [vmem:[%s4028_s22 + $0x190] sm:$0xf] }
  0x20   : > { %288 = vst [vmem:[%s4033_s23 + $0x24] sm:$0xf] %v287_v9  ;;  %v311_v21 = vld [vmem:[%s4028_s22 + $0x1a4] sm:$0xf]  ;;  %v313_v22 = vld [vmem:[%s4028_s22 + $0x1b8] sm:$0xf] }
  0x21   : > { %290 = vst [vmem:[%s4033_s23 + $0x28] sm:$0xf] %v289_v10  ;;  %v315_v23 = vld [vmem:[%s4028_s22 + $0x1cc] sm:$0xf]  ;;  %v317_v24 = vld [vmem:[%s4028_s22 + $0x1e0] sm:$0xf] }
  0x22   : > { %292 = vst [vmem:[%s4033_s23 + $0x2c] sm:$0xf] %v291_v11  ;;  %v319_v25 = vld [vmem:[%s4028_s22 + $0x1f4] sm:$0xf]  ;;  %v321_v26 = vld [vmem:[%s4028_s22 + $0x208] sm:$0xf] }
  0x23   : > { %294 = vst [vmem:[%s4033_s23 + $0x30] sm:$0xf] %v293_v12  ;;  %v323_v27 = vld [vmem:[%s4028_s22 + $0x21c] sm:$0xf]  ;;  %v325_v28 = vld [vmem:[%s4028_s22 + $0x230] sm:$0xf] }
  0x24   : > { %296 = vst [vmem:[%s4033_s23 + $0x34] sm:$0xf] %v295_v13  ;;  %v327_v29 = vld [vmem:[%s4028_s22 + $0x244] sm:$0xf]  ;;  %v329_v30 = vld [vmem:[%s4028_s22 + $0x258] sm:$0xf] }
  0x25   : > { %298 = vst [vmem:[%s4033_s23 + $0x38] sm:$0xf] %v297_v14  ;;  %v331_v31 = vld [vmem:[%s4028_s22 + $0x26c] sm:$0xf] }
  0x26   : > { %300 = vst [vmem:[%s4033_s23 + $0x3c] sm:$0xf] %v299_v15 }
  0x27   : > { %302 = vst [vmem:[%s4033_s23 + $0x40] sm:$0xf] %v301_v16 }
  0x28   : > { %304 = vst [vmem:[%s4033_s23 + $0x44] sm:$0xf] %v303_v17 }
  0x29   : > { %306 = vst [vmem:[%s4033_s23 + $0x48] sm:$0xf] %v305_v18 }
  0x2a   : > { %308 = vst [vmem:[%s4033_s23 + $0x4c] sm:$0xf] %v307_v19 }
  0x2b   : > { %310 = vst [vmem:[%s4033_s23 + $0x50] sm:$0xf] %v309_v20 }
  0x2c   : > { %312 = vst [vmem:[%s4033_s23 + $0x54] sm:$0xf] %v311_v21 }
  0x2d   : > { %314 = vst [vmem:[%s4033_s23 + $0x58] sm:$0xf] %v313_v22 }
  0x2e   : > { %316 = vst [vmem:[%s4033_s23 + $0x5c] sm:$0xf] %v315_v23 }
  0x2f   : > { %318 = vst [vmem:[%s4033_s23 + $0x60] sm:$0xf] %v317_v24 }
  0x30   : > { %320 = vst [vmem:[%s4033_s23 + $0x64] sm:$0xf] %v319_v25 }
  0x31   : > { %322 = vst [vmem:[%s4033_s23 + $0x68] sm:$0xf] %v321_v26 }
  0x32   : > { %324 = vst [vmem:[%s4033_s23 + $0x6c] sm:$0xf] %v323_v27 }
  0x33   : > { %326 = vst [vmem:[%s4033_s23 + $0x70] sm:$0xf] %v325_v28 }
  0x34   : > { %328 = vst [vmem:[%s4033_s23 + $0x74] sm:$0xf] %v327_v29 }
  0x35   : > { %330 = vst [vmem:[%s4033_s23 + $0x78] sm:$0xf] %v329_v30 }
  0x36   : > { %332 = vst [vmem:[%s4033_s23 + $0x7c] sm:$0xf] %v331_v31 }
  0x37 PF: > { %p3387_p7 = scmp.ge.s32.totalorder %s3900_s30, 1  ;;  %p419_p8 = scmp.lt.s32.totalorder %s3900_s30, 11 }
  0x39   : > { %p420_p9 = pnand %p3387_p7, %p419_p8 }
  0x3a   : > { %s426_s10 = sand.u32 (!%p420_p9), 1, %s3876_s24   ;;  %p457_p10 = scmp.lt.s32.totalorder (!%p420_p9), %s3888_s27, 1 }
  0x3b   : > { %423 = sbr.rel (%p420_p9) target bundleno = 1305 (0x519), region = 85  ;;  %s3388_s11 = sshll.u32 (!%p420_p9), %s426_s10, 7 }
  0x3c   : > { %s4100_s12 = scalar_lea.vmem (!%p420_p9), [#allocation3], %s3388_s11  ;;  %s3497_s20 = sshll.u32 (!%p420_p9), %s3884_s26, 7 }
  0x3d   : > { %s830_s21 = sshra.s32 (!%p420_p9), %s3497_s20, 7  ;;  %p3499_p11 = scmp.ne.s32.totalorder (!%p420_p9), %s3884_s26, 4 }
  0x3e   : > { %s3498_s22 = sshll.u32 (!%p420_p9), %s830_s21, 2 }
  0x3f   : > { %s833_s23 = scalar_lea.vmem (!%p420_p9), [#allocation2], %s3498_s22 }
  0x40   : > { %v3706_v32 = vld [vmem:[%s4100_s12 + $0x38] sm:$0xff]  ;;  %s5214_s27 = smov (!%p457_p10, %s3888_s27), 1  ;;  %v3705_v34 = vld [vmem:[%s4100_s12 + $0x30] sm:$0xff]  ;;  %v3704_v36 = vld [vmem:[%s4100_s12 + $0x28] sm:$0xff]  ;;  %v3902_v50 = vmov 0   ;;  %vm795_vm0 = vcmask 523264  }
  0x41   : > { %v3714_v33 = vld [vmem:[%s4100_s12 + $0x78] sm:$0xff]  ;;  %3743 = vmatpush.bf16.msra.mxu3 %v3706_v32  ;;  %s3698_s13 = sshll.u32 %s5214_s27, 4  ;;  %v3713_v35 = vld [vmem:[%s4100_s12 + $0x70] sm:$0xff]  ;;  %687 = vmatpush.bf16.msra.mxu0 %v3706_v32  ;;  %v3712_v37 = vld [vmem:[%s4100_s12 + $0x68] sm:$0xff]  ;;  %s3903_s10 = smov (!%p3499_p11), 127  }
  0x42   : > { %3751 = vmatpush.bf16.msra.mxu1 %v3714_v33  ;;  %s4110_s16 = scalar_lea.vmem %s5200_s7, %s3698_s13  ;;  %v3703_v38 = vld [vmem:[%s4100_s12 + $0x20] sm:$0xff]  ;;  %v3702_v40 = vld [vmem:[%s4100_s12 + $0x18] sm:$0xff]  ;;  %v3701_v42 = vld [vmem:[%s4100_s12 + $0x10] sm:$0xff]  ;;  %3842 = vset.pattern.permute.xlu0 %v3902_v50  ;;  %s3904_s26 = smov (!%p3499_p11), 126  }
  0x43   : > { %v3711_v39 = vld [vmem:[%s4100_s12 + $0x60] sm:$0xff]  ;;  %v3710_v41 = vld [vmem:[%s4100_s12 + $0x58] sm:$0xff]  ;;  %v4120_v43 = vld [vmem:[%s4100_s12 + $0x50] sm:$0xff]  ;;  %3843 = vset.pattern.permute.xlu1 %v3902_v50  ;;  %3844 = vset.pattern.permute.xlu2 %v3902_v50  ;;  %s3905_s11 = smov (!%p3499_p11), 125   ;;  %s3906_s13 = smov (!%p3499_p11), 124  }
  0x44   : > { %v3700_v44 = vld [vmem:[%s4100_s12 + $0x8] sm:$0xff]  ;;  %v509_v46 = vld [vmem:[%s5195_s2 + $0x30] sm:$0xff]  ;;  %v3393_v54 = vld [vmem:[%s5194_s1] sm:$0xf]  ;;  %s3907_s24 = smov (!%p3499_p11), 103   ;;  %s3908_s15 = smov (!%p3499_p11), 104  }
  0x45   : > { %3744 = vmatpush.bf16.msra.mxu3 %v3705_v34  ;;  %688 = vmatpush.bf16.msra.mxu0 %v3705_v34  ;;  %v3708_v45 = vld [vmem:[%s4100_s12 + $0x48] sm:$0xff]  ;;  %v3401_v47 = vld [vmem:[%s5194_s1 + $0x10] sm:$0xf]  ;;  %v3717_v49 = vld [vmem:[%s5194_s1 + $0x14] sm:$0xf]  ;;  %s3909_s18 = smov (!%p3499_p11), 102  }
  0x46   : > { %3752 = vmatpush.bf16.msra.mxu1 %v3713_v35  ;;  %v3718_v48 = vld [vmem:[%s5194_s1 + $0x14] sm:$0xf0]  ;;  %v3699_v51 = vld [vmem:[%s4100_s12] sm:$0xff]  ;;  %v3403_v53 = vld [vmem:[%s5194_s1 + $0x18] sm:$0xf0]  ;;  %543 = vperm.xlu0 %3842, %v509_v46   ;;  %s3910_s20 = smov (!%p3499_p11), 101  }
  0x47   : > { %v3707_v52 = vld [vmem:[%s4100_s12 + $0x40] sm:$0xff]  ;;  %v3716_v55 = vld [vmem:[%s5194_s1 + $0x4] sm:$0xf0]  ;;  %v507_v56 = vld [vmem:[%s5195_s2 + $0x20] sm:$0xff]  ;;  %v3402_v57 = vor.u32 %v3718_v48, %v3401_v47  ;;  %v3406_v58 = vor.u32 %v3717_v49, %v3403_v53  ;;  %s3914_s19 = smov (!%p3499_p11), 78   ;;  %s3915_s22 = smov (!%p3499_p11), 77  }
  0x48   : > { %533 = vperm.xlu1 %3843, %v507_v56   ;;  %v3394_v59 = vor.u32 %v3716_v55, %v3393_v54  ;;  %v510_v60 = vld [vmem:[%s5195_s2 + $0x38] sm:$0xff]  ;;  %v505_v61 = vld [vmem:[%s5195_s2 + $0x10] sm:$0xff]  ;;  %v508_v62 = vld [vmem:[%s5195_s2 + $0x28] sm:$0xff]  ;;  %s3918_s17 = smov (!%p3499_p11), 56   ;;  %s3923_s12 = smov (!%p3499_p11), 32  }
  0x49   : > { %3745 = vmatpush.bf16.msra.mxu3 %v3704_v36  ;;  %689 = vmatpush.bf16.msra.mxu0 %v3704_v36  ;;  %v506_v63 = vld [vmem:[%s5195_s2 + $0x18] sm:$0xff]  ;;  %v503_v0 = vld [vmem:[%s5195_s2] sm:$0xff]  ;;  %v3720_v2 = vld [vmem:[%s5194_s1 + $0x24] sm:$0xf0]  ;;  %s3924_s21 = smov (!%p3499_p11), 30  }
  0x4a   : > { %3753 = vmatpush.bf16.msra.mxu1 %v3712_v37  ;;  %523 = vperm.xlu2 %3844, %v505_v61   ;;  %v3409_v1 = vld [vmem:[%s5194_s1 + $0x20] sm:$0xf]  ;;  %v3719_v3 = vld [vmem:[%s5194_s1 + $0x24] sm:$0xf]  ;;  %v3411_v4 = vld [vmem:[%s5194_s1 + $0x28] sm:$0xf0] }
  0x4b   : > { %v504_v5 = vld [vmem:[%s5195_s2 + $0x8] sm:$0xff]  ;;  %v3410_v6 = vor.u32 %v3720_v2, %v3409_v1  ;;  %v3414_v7 = vor.u32 %v3719_v3, %v3411_v4  ;;  %v761_v8 = vld [vmem:[%s5197_s4] sm:$0xff]  ;;  %v763_v10 = vld [vmem:[%s5197_s4 + $0x10] sm:$0xff] }
  0x4c   : > { %v762_v9 = vld [vmem:[%s5197_s4 + $0x8] sm:$0xff]  ;;  %v764_v11 = vld [vmem:[%s5197_s4 + $0x18] sm:$0xff]  ;;  %v3715_v12 = vld [vmem:[%s5194_s1 + $0x4] sm:$0xf] }
  0x4d   : > { %3746 = vmatpush.bf16.msra.mxu3 %v3703_v38  ;;  %690 = vmatpush.bf16.msra.mxu0 %v3703_v38  ;;  %v3395_v13 = vld [vmem:[%s5194_s1 + $0x8] sm:$0xf0]  ;;  %v3417_v14 = vld [vmem:[%s5194_s1 + $0x30] sm:$0xf]  ;;  %v3722_v15 = vld [vmem:[%s5194_s1 + $0x34] sm:$0xf0] }
  0x4e   : > { %3754 = vmatpush.bf16.msra.mxu1 %v3711_v39  ;;  %548 = vperm.xlu0 %3842, %v510_v60   ;;  %v3721_v16 = vld [vmem:[%s5194_s1 + $0x34] sm:$0xf]  ;;  %v3419_v17 = vld [vmem:[%s5194_s1 + $0x38] sm:$0xf0]  ;;  %v3398_v18 = vor.u32 %v3715_v12, %v3395_v13  ;;  %v3418_v19 = vor.u32 %v3722_v15, %v3417_v14 }
  0x4f   : > { %v3422_v20 = vor.u32 %v3721_v16, %v3419_v17 }
  0x50   : > { %538 = vperm.xlu1 %3843, %v508_v62  }
  0x51   : > { %3747 = vmatpush.bf16.msra.mxu3 %v3702_v40  ;;  %691 = vmatpush.bf16.msra.mxu0 %v3702_v40 }
  0x52   : > { %3755 = vmatpush.bf16.msra.mxu1 %v3710_v41  ;;  %528 = vperm.xlu2 %3844, %v506_v63  }
  0x55   : > { %3748 = vmatpush.bf16.msra.mxu3 %v3701_v42  ;;  %692 = vmatpush.bf16.msra.mxu0 %v3701_v42 }
  0x56   : > { %3756 = vmatpush.bf16.msra.mxu1 %v4120_v43  ;;  %513 = vperm.xlu0 %3842, %v503_v0  }
  0x58   : > { %518 = vperm.xlu1 %3843, %v504_v5  }
  0x59   : > { %3749 = vmatpush.bf16.msra.mxu3 %v3700_v44  ;;  %693 = vmatpush.bf16.msra.mxu0 %v3700_v44 }
  0x5a   : > { %3757 = vmatpush.bf16.msra.mxu1 %v3708_v45  ;;  %767 = vperm.xlu2 %3844, %v761_v8  }
  0x5d   : > { %3750 = vmatpush.bf16.msra.mxu3 %v3699_v51  ;;  %694 = vmatpush.bf16.msra.mxu0 %v3699_v51 }
  0x5e   : > { %3758 = vmatpush.bf16.msra.mxu1 %v3707_v52  ;;  %772 = vperm.xlu0 %3842, %v762_v9   ;;  %v3723_v9 = vld [vmem:[%s5196_s3] sm:$0xff] }
  0x60   : > { %700 = vmatmul.bf16.vlgmr.msra.gmra.mxu3 %v3402_v57  ;;  %695 = vmatmul.bf16.vlgmr.msra.gmra.mxu0 %v3394_v59 }
  0x61   : > { %716 = vmatpush.bf16.msrb.mxu0 %v3714_v33  ;;  %729 = vmatmul.bf16.vlgmr.msra.gmra.mxu1 %v3406_v58 }
  0x62   : > { %777 = vperm.xlu1 %3843, %v763_v10   ;;  %782 = vperm.xlu2 %3844, %v764_v11   ;;  %v3724_v10 = vld [vmem:[%s5196_s3 + $0x8] sm:$0xff] }
  0x65   : > { %717 = vmatpush.bf16.msrb.mxu0 %v3713_v35 }
  0x69   : > { %718 = vmatpush.bf16.msrb.mxu0 %v3712_v37 }
  0x6d   : > { %719 = vmatpush.bf16.msrb.mxu0 %v3711_v39 }
  0x70   : > { %705 = vmatmul.bf16.gmra.mxu3 %v3410_v6 }
  0x71   : > { %720 = vmatpush.bf16.msrb.mxu0 %v3710_v41  ;;  %734 = vmatmul.bf16.gmra.mxu1 %v3414_v7 }
  0x75   : > { %721 = vmatpush.bf16.msrb.mxu0 %v4120_v43 }
  0x79   : > { %722 = vmatpush.bf16.msrb.mxu0 %v3708_v45 }
  0x7d   : > { %723 = vmatpush.bf16.msrb.mxu0 %v3707_v52 }
  0x80   : > { %724 = vmatmul.bf16.vlgmr.msrb.gmra.mxu0 %v3398_v18  ;;  %710 = vmatmul.bf16.gmra.mxu3 %v3418_v19 }
  0x81   : > { %739 = vmatmul.bf16.gmra.mxu1 %v3422_v20 }
  0xa4   : > { %v524_v33 = vpop.permute.xlu2 %523 }
  0xac   : > { %v529_v41 = vpop.permute.xlu2 %528 }
  0xb4   : > { %v768_v11 = vpop.permute.xlu2 %767 }
  0xb8   : > { %v544_v30 = vpop.permute.xlu0 %543 }
  0xba   : > { %v534_v31 = vpop.permute.xlu1 %533 }
  0xc0   : > { %v549_v36 = vpop.permute.xlu0 %548 }
  0xc2   : > { %v539_v37 = vpop.permute.xlu1 %538 }
  0xc8   : > { %v514_v52 = vpop.permute.xlu0 %513 }
  0xca   : > { %v519_v56 = vpop.permute.xlu1 %518 }
  0xd0   : > { %v773_v16 = vpop.permute.xlu0 %772 }
  0xdd   : > { %v696_v27 = vpop.f32.mrf.mxu0 }
  0xde   : > { %v730_v21 = vpop.f32.mrf.mxu1  ;;  %v697_v55 = vadd.f32 %v696_v27, %v514_v52 }
  0xe3   : > { %v701_v22 = vpop.f32.mrf.mxu3 }
  0xe4   : > { %v702_v50 = vadd.f32 %v701_v22, %v524_v33 }
  0xe5   : > { %v698_v32 = vpop.f32.mrf.mxu0 }
  0xe6   : > { %v732_v23 = vpop.f32.mrf.mxu1  ;;  %v699_v59 = vadd.f32 %v698_v32, %v519_v56  ;;  %v731_v62 = vadd.f32 %v730_v21, %v702_v50  ;;  %v778_v21 = vpop.permute.xlu1 %777 }
  0xe8   : > { %v747_v4 = vmax.f32 %v731_v62, 0.0 }
  0xeb   : > { %v703_v24 = vpop.f32.mrf.mxu3 }
  0xec   : > { %v704_v47 = vadd.f32 %v703_v24, %v529_v41 }
  0xee   : > { %v735_v25 = vpop.f32.mrf.mxu1  ;;  %v733_v57 = vadd.f32 %v732_v23, %v704_v47 }
  0xf0   : > { %v748_v0 = vmax.f32 %v733_v57, 0.0 }
  0xf2   : > { %v758_v7 = vpack.c.bf16 %v748_v0, %v747_v4 }
  0xf3   : > { %v706_v26 = vpop.f32.mrf.mxu3 }
  0xf4   : > { %v707_v43 = vadd.f32 %v706_v26, %v534_v31  ;;  %v783_v26 = vpop.permute.xlu2 %782 }
  0xf6   : > { %v737_v28 = vpop.f32.mrf.mxu1  ;;  %v736_v51 = vadd.f32 %v735_v25, %v707_v43 }
  0xf8   : > { %v749_v63 = vmax.f32 %v736_v51, 0.0 }
  0xfb   : > { %v708_v29 = vpop.f32.mrf.mxu3 }
  0xfc   : > { %v709_v40 = vadd.f32 %v708_v29, %v539_v37 }
  0xfd   : > { %v725_v39 = vpop.f32.mrf.mxu0 }
  0xfe   : > { %v740_v34 = vpop.f32.mrf.mxu1  ;;  %v738_v48 = vadd.f32 %v737_v28, %v709_v40  ;;  %v726_v1 = vadd.f32 %v725_v39, %v697_v55 }
 0x100   : > { %v750_v58 = vmax.f32 %v738_v48, 0.0  ;;  %v745_v5 = vmax.f32 %v726_v1, 0.0 }
 0x102   : > { %v759_v3 = vpack.c.bf16 %v750_v58, %v749_v63 }
 0x103   : > { %v711_v35 = vpop.f32.mrf.mxu3 }
 0x104   : > { %v712_v38 = vadd.f32 %v711_v35, %v544_v30 }
 0x105   : > { %v727_v61 = vpop.f32.mrf.mxu0 }
 0x106   : > { %v741_v45 = vadd.f32 %v740_v34, %v712_v38  ;;  %v742_v46 = vpop.f32.mrf.mxu1  ;;  %v728_v2 = vadd.f32 %v727_v61, %v699_v59 }
 0x108   : > { %v751_v53 = vmax.f32 %v741_v45, 0.0  ;;  %v746_v6 = vmax.f32 %v728_v2, 0.0 }
 0x10a   : > { %v757_v8 = vpack.c.bf16 %v746_v6, %v745_v5 }
 0x10b   : > { %v713_v42 = vpop.f32.mrf.mxu3 }
 0x10c   : > { %v714_v44 = vadd.f32 %v713_v42, %v549_v36 }
 0x10e   : > { %v743_v49 = vadd.f32 %v742_v46, %v714_v44 }
 0x110   : > { %v752_v54 = vmax.f32 %v743_v49, 0.0 }
 0x112   : > { %v760_v60 = vpack.c.bf16 %v752_v54, %v751_v53 }
 0x114   : > { %806 = vmatpush.bf16.msra.mxu2 %v760_v60 }
 0x118   : > { %807 = vmatpush.bf16.msra.mxu2 %v759_v3 }
 0x11c   : > { %808 = vmatpush.bf16.msra.mxu2 %v758_v7 }
 0x120   : > { %809 = vmatpush.bf16.msra.mxu2 %v757_v8 }
 0x123   : > { %3495 = vmatmul.msk.bf16.vlgmr.msra.gmra.mxu2 %vm795_vm0, %v3723_v9 }
 0x133   : > { %3496 = vmatmul.msk.bf16.gmra.mxu2 %vm795_vm0, %v3724_v10 }
 0x1a6   : > { %v811_v12 = vpop.f32.mrf.mxu2 }
 0x1a7   : > { %v812_v13 = vadd.f32 %v811_v12, %v768_v11 }
 0x1a9   : > { %v821_v14 = vmax.f32 %v812_v13, 0.0 }
 0x1ab   : > { %v826_v15 = vpack.c.bf16 %v821_v14, %v821_v14 }
 0x1ad   : > { %834 = vst [vmem:[%s833_s23] sm:$0xf] %v826_v15 }
 0x1ae   : > { %v813_v17 = vpop.f32.mrf.mxu2 }
 0x1af   : > { %v814_v18 = vadd.f32 %v813_v17, %v773_v16 }
 0x1b1   : > { %v822_v19 = vmax.f32 %v814_v18, 0.0 }
 0x1b3   : > { %v827_v20 = vpack.c.bf16 %v822_v19, %v822_v19 }
 0x1b5   : > { %835 = vst [vmem:[%s833_s23 + $0x14] sm:$0xf] %v827_v20 }
 0x1b6   : > { %v816_v22 = vpop.f32.mrf.mxu2 }
 0x1b7   : > { %v817_v23 = vadd.f32 %v816_v22, %v778_v21 }
 0x1b9   : > { %v823_v24 = vmax.f32 %v817_v23, 0.0 }
 0x1bb   : > { %v828_v25 = vpack.c.bf16 %v823_v24, %v823_v24 }
 0x1bd   : > { %836 = vst [vmem:[%s833_s23 + $0x28] sm:$0xf] %v828_v25 }
 0x1be   : > { %v818_v27 = vpop.f32.mrf.mxu2 }
 0x1bf   : > { %v819_v28 = vadd.f32 %v818_v27, %v783_v26 }
 0x1c1   : > { %v824_v29 = vmax.f32 %v819_v28, 0.0  ;;  %841 = sbr.rel (%p3499_p11) target bundleno = 1305 (0x519), region = 93 }
 0x1c3   : > { %v829_v30 = vpack.c.bf16 %v824_v29, %v824_v29 }
 0x1c5   : > { %837 = vst [vmem:[%s833_s23 + $0x3c] sm:$0xf] %v829_v30  ;;  %s3911_s23 = smov (!%p3499_p11), 100  }
 0x1c6   : > { %vm901_vm1 = vcmask 1039360   ;;  %v3500_v2 = vld [vmem:[%s5198_s5 + $0x2] sm:$0x3]  ;;  %vm916_vm2 = vcmask 261120   ;;  %v842_v13 = vld [vmem:[%s5198_s5] sm:$0x3] }
 0x1c7   : > { %vm1053_vm3 = vcmask 1031168   ;;  %v3541_v25 = vld [vmem:[%s5198_s5 + $0x4] sm:$0x3]  ;;  %vm1145_vm4 = vcmask 1022976   ;;  %vm1237_vm5 = vcmask 1014784   ;;  %vm1331_vm6 = vcmask 842752  }
 0x1c8   : > { %vm1417_vm7 = vcmask 850944   ;;  %vm1505_vm8 = vcmask 834560   ;;  %vm1597_vm9 = vcmask 826368   ;;  %vm1689_vm10 = vcmask 818176  }
 0x1c9   : > { %vm1841_vm11 = vcmask 646144   ;;  %vm1933_vm12 = vcmask 654336   ;;  %vm2027_vm13 = vcmask 637952   ;;  %vm2125_vm14 = vcmask 629760  }
 0x1ca   : > { %vm2223_vm15 = vcmask 621568   ;;  %vm2323_vm0 = vcmask 449536  }
 0x1cc   : > { %v3511_v31 = vld [vmem:[#allocation2 + $0x8] sm:$0xf]  ;;  %v3728_v32 = vld [vmem:[#allocation2 + $0x18] sm:$0xf0]  ;;  %v3503_v34 = vld [vmem:[#allocation2] sm:$0xf] }
 0x1cd   : > { %v4220_v33 = vor.u32 %v3728_v32, %v3511_v31  ;;  %v3727_v35 = vld [vmem:[#allocation2 + $0x10] sm:$0xf0]  ;;  %v3519_v37 = vld [vmem:[#allocation2 + $0x28] sm:$0xf]  ;;  %v3731_v38 = vld [vmem:[#allocation2 + $0x38] sm:$0xf0] }
 0x1ce   : > { %v4222_v36 = vor.u32 %v3727_v35, %v3503_v34  ;;  %v3726_v39 = vld [vmem:[#allocation2 + $0xc] sm:$0xf]  ;;  %v3513_v40 = vld [vmem:[#allocation2 + $0x1c] sm:$0xf0]  ;;  %v4226_v41 = vor.u32 %v3731_v38, %v3519_v37  ;;  %v3725_v42 = vld [vmem:[#allocation2 + $0x4] sm:$0xf] }
 0x1cf   : > { %889 = vrot.lane.b32.xlu1 %v4220_v33, %s3903_s10  ;;  %v3505_v43 = vld [vmem:[#allocation2 + $0x14] sm:$0xf0]  ;;  %v4229_v44 = vor.u32 %v3726_v39, %v3513_v40  ;;  %v3729_v45 = vld [vmem:[#allocation2 + $0x2c] sm:$0xf]  ;;  %v3521_v46 = vld [vmem:[#allocation2 + $0x3c] sm:$0xf0] }
 0x1d0   : > { %885 = vrot.lane.b32.xlu0 %v4222_v36, %s3903_s10  ;;  %893 = vrot.lane.b32.xlu2 %v4226_v41, %s3903_s10  ;;  %v4231_v47 = vor.u32 %v3725_v42, %v3505_v43  ;;  %v4233_v48 = vor.u32 %v3729_v45, %v3521_v46  ;;  %v3730_v49 = vld [vmem:[#allocation2 + $0x34] sm:$0xf]  ;;  %v3529_v50 = vld [vmem:[#allocation2 + $0x44] sm:$0xf0]  ;;  %v3527_v51 = vld [vmem:[#allocation2 + $0x30] sm:$0xf] }
 0x1d1   : > { %v3732_v52 = vld [vmem:[#allocation2 + $0x40] sm:$0xf0]  ;;  %v4238_v53 = vor.u32 %v3730_v49, %v3529_v50  ;;  %v3587_v45 = vld [vmem:[#allocation2 + $0x14] sm:$0xf0]  ;;  %v3735_v49 = vld [vmem:[#allocation2 + $0x10] sm:$0xf0] }
 0x1d2   : > { %v4240_v54 = vor.u32 %v3732_v52, %v3527_v51  ;;  %v3546_v43 = vld [vmem:[%s5198_s5 + $0x6] sm:$0x3] }
 0x1d7   : > { %891 = vrot.lane.b32.xlu1 %v4229_v44, %s3903_s10 }
 0x1d8   : > { %887 = vrot.lane.b32.xlu0 %v4231_v47, %s3903_s10  ;;  %895 = vrot.lane.b32.xlu2 %v4233_v48, %s3903_s10 }
 0x1df   : > { %899 = vrot.lane.b32.xlu1 %v4238_v53, %s3903_s10 }
 0x1e0   : > { %897 = vrot.lane.b32.xlu0 %v4240_v54, %s3903_s10  ;;  %1037 = vrot.lane.b32.xlu2 %v4222_v36, %s3904_s26  ;;  %s3925_s10 = smov 29  }
 0x1e7   : > { %1041 = vrot.lane.b32.xlu1 %v4220_v33, %s3904_s26 }
 0x1e8   : > { %1039 = vrot.lane.b32.xlu0 %v4231_v47, %s3904_s26  ;;  %1043 = vrot.lane.b32.xlu2 %v4229_v44, %s3904_s26 }
 0x1ef   : > { %1047 = vrot.lane.b32.xlu1 %v4233_v48, %s3904_s26 }
 0x1f0   : > { %1045 = vrot.lane.b32.xlu0 %v4226_v41, %s3904_s26  ;;  %1049 = vrot.lane.b32.xlu2 %v4240_v54, %s3904_s26 }
 0x1f7   : > { %1129 = vrot.lane.b32.xlu1 %v4222_v36, %s3905_s11 }
 0x1f8   : > { %1051 = vrot.lane.b32.xlu0 %v4238_v53, %s3904_s26  ;;  %1131 = vrot.lane.b32.xlu2 %v4231_v47, %s3905_s11  ;;  %s3916_s26 = smov 76  }
 0x1ff   : > { %1135 = vrot.lane.b32.xlu1 %v4229_v44, %s3905_s11 }
 0x200   : > { %1133 = vrot.lane.b32.xlu0 %v4220_v33, %s3905_s11  ;;  %1137 = vrot.lane.b32.xlu2 %v4226_v41, %s3905_s11 }
 0x207   : > { %1141 = vrot.lane.b32.xlu1 %v4240_v54, %s3905_s11 }
 0x208   : > { %1139 = vrot.lane.b32.xlu0 %v4233_v48, %s3905_s11  ;;  %1143 = vrot.lane.b32.xlu2 %v4238_v53, %s3905_s11  ;;  %s3912_s11 = smov 79  }
 0x20f   : > { %1223 = vrot.lane.b32.xlu1 %v4231_v47, %s3906_s13 }
 0x210   : > { %1221 = vrot.lane.b32.xlu0 %v4222_v36, %s3906_s13  ;;  %1225 = vrot.lane.b32.xlu2 %v4220_v33, %s3906_s13 }
 0x217   : > { %1229 = vrot.lane.b32.xlu1 %v4226_v41, %s3906_s13 }
 0x218   : > { %1227 = vrot.lane.b32.xlu0 %v4229_v44, %s3906_s13  ;;  %1231 = vrot.lane.b32.xlu2 %v4233_v48, %s3906_s13 }
 0x21f   : > { %1235 = vrot.lane.b32.xlu1 %v4238_v53, %s3906_s13 }
 0x220   : > { %1233 = vrot.lane.b32.xlu0 %v4240_v54, %s3906_s13  ;;  %1315 = vrot.lane.b32.xlu2 %v4222_v36, %s3907_s24  ;;  %s3926_s13 = smov 28  }
 0x227   : > { %1319 = vrot.lane.b32.xlu1 %v4220_v33, %s3907_s24 }
 0x228   : > { %1317 = vrot.lane.b32.xlu0 %v4231_v47, %s3907_s24  ;;  %1321 = vrot.lane.b32.xlu2 %v4229_v44, %s3907_s24 }
 0x22a   : > { %v894_v55 = vpop.permute.xlu2 %893 }
 0x22f   : > { %1325 = vrot.lane.b32.xlu1 %v4233_v48, %s3907_s24 }
 0x230   : > { %1323 = vrot.lane.b32.xlu0 %v4226_v41, %s3907_s24  ;;  %1327 = vrot.lane.b32.xlu2 %v4240_v54, %s3907_s24 }
 0x232   : > { %v896_v56 = vpop.permute.xlu2 %895 }
 0x233   : > { %v905_v57 = vsel %vm901_vm1, %v894_v55, %v896_v56  ;;  %v3736_v55 = vld [vmem:[#allocation2 + $0x18] sm:$0xf0] }
 0x234   : > { %926 = vmatpush.bf16.msra.mxu0 %v905_v57 }
 0x237   : > { %1401 = vrot.lane.b32.xlu1 %v4222_v36, %s3908_s15 }
 0x238   : > { %1329 = vrot.lane.b32.xlu0 %v4238_v53, %s3907_s24  ;;  %1403 = vrot.lane.b32.xlu2 %v4231_v47, %s3908_s15  ;;  %s3917_s24 = smov 55  }
 0x23a   : > { %v4279_v58 = vpop.permute.xlu2 %1037 }
 0x23f   : > { %1407 = vrot.lane.b32.xlu1 %v4229_v44, %s3908_s15 }
 0x240   : > { %1405 = vrot.lane.b32.xlu0 %v4220_v33, %s3908_s15  ;;  %1409 = vrot.lane.b32.xlu2 %v4226_v41, %s3908_s15 }
 0x241   : > { %v890_v59 = vpop.permute.xlu1 %889 }
 0x242   : > { %v886_v60 = vpop.permute.xlu0 %885  ;;  %v4284_v61 = vpop.permute.xlu2 %1043 }
 0x247   : > { %1413 = vrot.lane.b32.xlu1 %v4240_v54, %s3908_s15 }
 0x248   : > { %1411 = vrot.lane.b32.xlu0 %v4233_v48, %s3908_s15  ;;  %1415 = vrot.lane.b32.xlu2 %v4238_v53, %s3908_s15  ;;  %s3913_s15 = smov 80  }
 0x249   : > { %v892_v62 = vpop.permute.xlu1 %891 }
 0x24a   : > { %v888_v63 = vpop.permute.xlu0 %887  ;;  %v4290_v1 = vpop.permute.xlu2 %1049  ;;  %v904_v9 = vsel %vm901_vm1, %v890_v59, %v892_v62 }
 0x24b   : > { %v902_v0 = vsel %vm901_vm1, %v886_v60, %v888_v63  ;;  %v903_v8 = vsel %vm901_vm1, %v888_v63, %v890_v59  ;;  %v3734_v60 = vld [vmem:[#allocation2 + $0xc] sm:$0xf]  ;;  %v3551_v63 = vld [vmem:[%s5198_s5 + $0x8] sm:$0x3] }
 0x24c   : > { %927 = vmatpush.bf16.msra.mxu0 %v902_v0 }
 0x24f   : > { %1491 = vrot.lane.b32.xlu1 %v4231_v47, %s3909_s18  ;;  %3533 = vmatmul.msk.bf16.vlgmr.msra.gmra.mxu0 %vm916_vm2, %v3500_v2 }
 0x250   : > { %989 = vmatpush.bf16.msrb.mxu0 %v4226_v41  ;;  %1489 = vrot.lane.b32.xlu0 %v4222_v36, %s3909_s18 }
 0x251   : > { %v900_v3 = vpop.permute.xlu1 %899  ;;  %1493 = vrot.lane.b32.xlu2 %v4220_v33, %s3909_s18 }
 0x252   : > { %v898_v4 = vpop.permute.xlu0 %897  ;;  %965 = vmatpush.bf16.msra.mxu3 %v900_v3  ;;  %v4306_v7 = vpop.permute.xlu2 %1131 }
 0x253   : > { %v906_v5 = vsel %vm901_vm1, %v896_v56, %v898_v4  ;;  %v907_v6 = vsel %vm901_vm1, %v898_v4, %v900_v3  ;;  %vm2415_vm1 = vcmask 457728  }
 0x254   : > { %990 = vmatpush.bf16.msrb.mxu0 %v4222_v36  ;;  %939 = vmatpush.bf16.msra.mxu1 %v906_v5  ;;  %v3605_v5 = vld [vmem:[#allocation2 + $0x28] sm:$0xf] }
 0x255   : > { %952 = vmatpush.bf16.msra.mxu2 %v907_v6  ;;  %v3740_v6 = vld [vmem:[#allocation2 + $0x38] sm:$0xf0] }
 0x256   : > { %966 = vmatpush.bf16.msra.mxu3 %v892_v62 }
 0x257   : > { %1497 = vrot.lane.b32.xlu1 %v4226_v41, %s3909_s18 }
 0x258   : > { %1495 = vrot.lane.b32.xlu0 %v4229_v44, %s3909_s18  ;;  %940 = vmatpush.bf16.msra.mxu1 %v903_v8  ;;  %v4443_v8 = vor.u32 %v3740_v6, %v3605_v5 }
 0x259   : > { %953 = vmatpush.bf16.msra.mxu2 %v904_v9  ;;  %v1042_v10 = vpop.permute.xlu1 %1041  ;;  %3536 = vmatmul.msk.bf16.vlgmr.msra.gmra.mxu3 %vm916_vm2, %v3500_v2 }
 0x25a   : > { %1028 = vmatpush.bf16.msrb.mxu3 %v4238_v53  ;;  %v1040_v11 = vpop.permute.xlu0 %1039  ;;  %1499 = vrot.lane.b32.xlu2 %v4233_v48, %s3909_s18  ;;  %v1138_v12 = vpop.permute.xlu2 %1137  ;;  %v1056_v26 = vsel %vm1053_vm3, %v1042_v10, %v4284_v61 }
 0x25b   : > { %3534 = vmatmul.msk.bf16.vlgmr.msra.gmra.mxu1 %vm916_vm2, %v3500_v2  ;;  %v1055_v19 = vsel %vm1053_vm3, %v1040_v11, %v1042_v10  ;;  %v1054_v20 = vsel %vm1053_vm3, %v4279_v58, %v1040_v11  ;;  %v3737_v58 = vld [vmem:[#allocation2 + $0x20] sm:$0xf0]  ;;  %v3613_v10 = vld [vmem:[#allocation2 + $0x30] sm:$0xf] }
 0x25c   : > { %1002 = vmatpush.bf16.msrb.mxu1 %v4233_v48  ;;  %3535 = vmatmul.msk.bf16.vlgmr.msra.gmra.mxu2 %vm916_vm2, %v3500_v2  ;;  %v3741_v11 = vld [vmem:[#allocation2 + $0x40] sm:$0xf0] }
 0x25d   : > { %1015 = vmatpush.bf16.msrb.mxu2 %v4240_v54 }
 0x25e   : > { %1029 = vmatpush.bf16.msrb.mxu3 %v4229_v44 }
 0x25f   : > { %1503 = vrot.lane.b32.xlu1 %v4238_v53, %s3909_s18  ;;  %3537 = vmatmul.msk.bf16.vlgmr.msrb.gmra.mxu0 %vm916_vm2, %v842_v13 }
 0x260   : > { %1003 = vmatpush.bf16.msrb.mxu1 %v4231_v47  ;;  %1501 = vrot.lane.b32.xlu0 %v4240_v54, %s3909_s18 }
 0x261   : > { %1016 = vmatpush.bf16.msrb.mxu2 %v4220_v33  ;;  %v1048_v14 = vpop.permute.xlu1 %1047 }
 0x262   : > { %v1046_v15 = vpop.permute.xlu0 %1045  ;;  %v1058_v16 = vsel %vm1053_vm3, %v1048_v14, %v4290_v1  ;;  %1581 = vrot.lane.b32.xlu2 %v4222_v36, %s3910_s20  ;;  %v1144_v18 = vpop.permute.xlu2 %1143 }
 0x263   : > { %v1057_v17 = vsel %vm1053_vm3, %v1046_v15, %v1048_v14  ;;  %v3607_v14 = vld [vmem:[#allocation2 + $0x3c] sm:$0xf0] }
 0x264   : > { %1090 = vmatpush.bf16.msra.mxu1 %v1058_v16  ;;  %1077 = vmatpush.bf16.msra.mxu0 %v1057_v17  ;;  %v4450_v16 = vor.u32 %v3741_v11, %v3613_v10 }
 0x267   : > { %1585 = vrot.lane.b32.xlu1 %v4220_v33, %s3910_s20 }
 0x268   : > { %1091 = vmatpush.bf16.msra.mxu1 %v1055_v19  ;;  %1583 = vrot.lane.b32.xlu0 %v4231_v47, %s3910_s20  ;;  %v3739_v19 = vld [vmem:[#allocation2 + $0x34] sm:$0xf] }
 0x269   : > { %1078 = vmatpush.bf16.msra.mxu0 %v1054_v20  ;;  %v1130_v21 = vpop.permute.xlu1 %1129  ;;  %3540 = vmatmul.msk.bf16.vlgmr.msrb.gmra.mxu3 %vm916_vm2, %v842_v13  ;;  %v3615_v20 = vld [vmem:[#allocation2 + $0x44] sm:$0xf0] }
 0x26a   : > { %v1052_v22 = vpop.permute.xlu0 %1051  ;;  %1587 = vrot.lane.b32.xlu2 %v4229_v44, %s3910_s20  ;;  %v4350_v24 = vpop.permute.xlu2 %1225  ;;  %v1146_v38 = vsel %vm1145_vm4, %v1130_v21, %v4306_v7  ;;  %v4460_v21 = vor.u32 %v3739_v19, %v3615_v20 }
 0x26b   : > { %1116 = vmatpush.bf16.msra.mxu3 %v1052_v22  ;;  %v1059_v23 = vsel %vm1053_vm3, %v4290_v1, %v1052_v22  ;;  %3538 = vmatmul.msk.bf16.vlgmr.msrb.gmra.mxu1 %vm916_vm2, %v842_v13  ;;  %vm2509_vm3 = vcmask 441344  }
 0x26c   : > { %1103 = vmatpush.bf16.msra.mxu2 %v1059_v23  ;;  %v3621_v23 = vld [vmem:[#allocation2 + $0x38] sm:$0xf] }
 0x26d   : > { %3539 = vmatmul.msk.bf16.vlgmr.msrb.gmra.mxu2 %vm916_vm2, %v842_v13  ;;  %v3738_v13 = vld [vmem:[#allocation2 + $0x2c] sm:$0xf] }
 0x26e   : > { %v4454_v17 = vor.u32 %v3738_v13, %v3607_v14 }
 0x26f   : > { %1117 = vmatpush.bf16.msra.mxu3 %v4284_v61  ;;  %1591 = vrot.lane.b32.xlu1 %v4233_v48, %s3910_s20  ;;  %v3595_v61 = vld [vmem:[#allocation2 + $0x1c] sm:$0xf0] }
 0x270   : > { %1589 = vrot.lane.b32.xlu0 %v4226_v41, %s3910_s20  ;;  %1104 = vmatpush.bf16.msra.mxu2 %v1056_v26  ;;  %v4435_v3 = vor.u32 %v3734_v60, %v3595_v61 }
 0x271   : > { %v1136_v27 = vpop.permute.xlu1 %1135  ;;  %3542 = vmatmul.msk.bf16.vlgmr.msra.gmra.mxu0 %vm916_vm2, %v3541_v25 }
 0x272   : > { %v1134_v28 = vpop.permute.xlu0 %1133  ;;  %1593 = vrot.lane.b32.xlu2 %v4240_v54, %s3910_s20  ;;  %v4367_v29 = vpop.permute.xlu2 %1231 }
 0x273   : > { %1208 = vmatpush.bf16.msrb.mxu3 %v1144_v18  ;;  %v1148_v37 = vsel %vm1145_vm4, %v1134_v28, %v1136_v27  ;;  %v1147_v39 = vsel %vm1145_vm4, %v4306_v7, %v1134_v28 }
 0x277   : > { %1209 = vmatpush.bf16.msrb.mxu3 %v1136_v27  ;;  %1673 = vrot.lane.b32.xlu1 %v4222_v36, %s3911_s23 }
 0x278   : > { %1595 = vrot.lane.b32.xlu0 %v4238_v53, %s3910_s20 }
 0x279   : > { %v1142_v30 = vpop.permute.xlu1 %1141  ;;  %3545 = vmatmul.msk.bf16.vlgmr.msra.gmra.mxu3 %vm916_vm2, %v3541_v25 }
 0x27a   : > { %v1140_v31 = vpop.permute.xlu0 %1139  ;;  %v1151_v32 = vsel %vm1145_vm4, %v1142_v30, %v1144_v18  ;;  %1675 = vrot.lane.b32.xlu2 %v4231_v47, %s3911_s23  ;;  %v4379_v36 = vpop.permute.xlu2 %1315  ;;  %v3585_v47 = vld [vmem:[#allocation2] sm:$0xf] }
 0x27b   : > { %v1149_v34 = vsel %vm1145_vm4, %v1138_v12, %v1140_v31  ;;  %v1150_v35 = vsel %vm1145_vm4, %v1140_v31, %v1142_v30  ;;  %1195 = vmatpush.bf16.msrb.mxu2 %v1151_v32  ;;  %3543 = vmatmul.msk.bf16.vlgmr.msra.gmra.mxu1 %vm916_vm2, %v3541_v25  ;;  %v4411_v52 = vor.u32 %v3735_v49, %v3585_v47  ;;  %vm2607_vm4 = vcmask 433152  }
 0x27c   : > { %1169 = vmatpush.bf16.msrb.mxu0 %v1149_v34  ;;  %1182 = vmatpush.bf16.msrb.mxu1 %v1150_v35  ;;  %v3557_v35 = vld [vmem:[%s5198_s5 + $0xc] sm:$0x3] }
 0x27d   : > { %3544 = vmatmul.msk.bf16.vlgmr.msra.gmra.mxu2 %vm916_vm2, %v3541_v25 }
 0x27f   : > { %1679 = vrot.lane.b32.xlu1 %v4229_v44, %s3911_s23  ;;  %1196 = vmatpush.bf16.msrb.mxu2 %v1148_v37 }
 0x280   : > { %1677 = vrot.lane.b32.xlu0 %v4220_v33, %s3911_s23  ;;  %1170 = vmatpush.bf16.msrb.mxu0 %v1146_v38  ;;  %v3733_v33 = vld [vmem:[#allocation2 + $0x4] sm:$0xf] }
 0x281   : > { %1183 = vmatpush.bf16.msrb.mxu1 %v1147_v39  ;;  %v1224_v40 = vpop.permute.xlu1 %1223  ;;  %v4407_v51 = vor.u32 %v3733_v33, %v3587_v45 }
 0x282   : > { %v1222_v42 = vpop.permute.xlu0 %1221  ;;  %1681 = vrot.lane.b32.xlu2 %v4226_v41, %s3911_s23  ;;  %v4398_v44 = vpop.permute.xlu2 %1321  ;;  %v1239_v7 = vsel %vm1237_vm5, %v1224_v40, %v4350_v24 }
 0x283   : > { %3547 = vmatmul.msk.bf16.vlgmr.msrb.gmra.mxu0 %vm916_vm2, %v3546_v43  ;;  %v1238_v56 = vsel %vm1237_vm5, %v1222_v42, %v1224_v40 }
 0x287   : > { %1685 = vrot.lane.b32.xlu1 %v4240_v54, %s3911_s23  ;;  %v3593_v54 = vld [vmem:[#allocation2 + $0x8] sm:$0xf] }
 0x288   : > { %1683 = vrot.lane.b32.xlu0 %v4233_v48, %s3911_s23  ;;  %v4420_v57 = vor.u32 %v3736_v55, %v3593_v54  ;;  %v3556_v54 = vld [vmem:[%s5198_s5 + $0xa] sm:$0x3] }
 0x289   : > { %v1230_v46 = vpop.permute.xlu1 %1229  ;;  %3550 = vmatmul.msk.bf16.vlgmr.msrb.gmra.mxu3 %vm916_vm2, %v3546_v43 }
 0x28a   : > { %v1241_v50 = vsel %vm1237_vm5, %v1230_v46, %v4367_v29  ;;  %v1228_v41 = vpop.permute.xlu0 %1227  ;;  %1687 = vrot.lane.b32.xlu2 %v4238_v53, %s3911_s23  ;;  %v4413_v48 = vpop.permute.xlu2 %1327  ;;  %v3601_v53 = vld [vmem:[#allocation2 + $0x10] sm:$0xf] }
 0x28b   : > { %1261 = vmatpush.bf16.msra.mxu0 %v1241_v50  ;;  %3548 = vmatmul.msk.bf16.vlgmr.msrb.gmra.mxu1 %vm916_vm2, %v3546_v43  ;;  %v4430_v2 = vor.u32 %v3737_v58, %v3601_v53  ;;  %v1240_v9 = vsel %vm1237_vm5, %v4350_v24, %v1228_v41  ;;  %v3742_v24 = vld [vmem:[#allocation2 + $0x48] sm:$0xf0] }
 0x28c   : > { %v4469_v28 = vor.u32 %v3742_v24, %v3621_v23 }
 0x28d   : > { %3549 = vmatmul.msk.bf16.vlgmr.msrb.gmra.mxu2 %vm916_vm2, %v3546_v43 }
 0x28f   : > { %1823 = vrot.lane.b32.xlu1 %v4407_v51, %s3912_s11  ;;  %1262 = vmatpush.bf16.msra.mxu0 %v1238_v56 }
 0x290   : > { %1821 = vrot.lane.b32.xlu0 %v4411_v52, %s3912_s11 }
 0x291   : > { %v1236_v59 = vpop.permute.xlu1 %1235 }
 0x292   : > { %v1234_v62 = vpop.permute.xlu0 %1233  ;;  %1300 = vmatpush.bf16.msra.mxu3 %v1236_v59  ;;  %1825 = vrot.lane.b32.xlu2 %v4420_v57, %s3912_s11  ;;  %v4437_v4 = vpop.permute.xlu2 %1403 }
 0x293   : > { %v1242_v0 = vsel %vm1237_vm5, %v4367_v29, %v1234_v62  ;;  %v1243_v1 = vsel %vm1237_vm5, %v1234_v62, %v1236_v59  ;;  %3552 = vmatmul.msk.bf16.vlgmr.msra.gmra.mxu0 %vm916_vm2, %v3551_v63  ;;  %vm2705_vm5 = vcmask 424960  }
 0x294   : > { %1274 = vmatpush.bf16.msra.mxu1 %v1242_v0  ;;  %1287 = vmatpush.bf16.msra.mxu2 %v1243_v1  ;;  %v3566_v0 = vld [vmem:[%s5198_s5 + $0xe] sm:$0x3] }
 0x296   : > { %1301 = vmatpush.bf16.msra.mxu3 %v1228_v41 }
 0x297   : > { %1829 = vrot.lane.b32.xlu1 %v4430_v2, %s3912_s11 }
 0x298   : > { %1827 = vrot.lane.b32.xlu0 %v4435_v3, %s3912_s11  ;;  %1275 = vmatpush.bf16.msra.mxu1 %v1239_v7 }
 0x299   : > { %1288 = vmatpush.bf16.msra.mxu2 %v1240_v9  ;;  %v1320_v12 = vpop.permute.xlu1 %1319  ;;  %3555 = vmatmul.msk.bf16.vlgmr.msra.gmra.mxu3 %vm916_vm2, %v3551_v63 }
 0x29a   : > { %v1318_v15 = vpop.permute.xlu0 %1317  ;;  %1831 = vrot.lane.b32.xlu2 %v4443_v8, %s3912_s11  ;;  %v1410_v18 = vpop.permute.xlu2 %1409  ;;  %v1334_v38 = vsel %vm1331_vm6, %v1320_v12, %v4398_v44 }
 0x29b   : > { %3553 = vmatmul.msk.bf16.vlgmr.msra.gmra.mxu1 %vm916_vm2, %v3551_v63  ;;  %v1333_v30 = vsel %vm1331_vm6, %v1318_v15, %v1320_v12  ;;  %v1332_v31 = vsel %vm1331_vm6, %v4379_v36, %v1318_v15 }
 0x29d   : > { %3554 = vmatmul.msk.bf16.vlgmr.msra.gmra.mxu2 %vm916_vm2, %v3551_v63 }
 0x29f   : > { %1835 = vrot.lane.b32.xlu1 %v4450_v16, %s3912_s11 }
 0x2a0   : > { %1833 = vrot.lane.b32.xlu0 %v4454_v17, %s3912_s11 }
 0x2a1   : > { %v1326_v22 = vpop.permute.xlu1 %1325 }
 0x2a2   : > { %v1324_v25 = vpop.permute.xlu0 %1323  ;;  %v1336_v26 = vsel %vm1331_vm6, %v1326_v22, %v4413_v48  ;;  %1837 = vrot.lane.b32.xlu2 %v4460_v21, %s3912_s11  ;;  %v1416_v29 = vpop.permute.xlu2 %1415 }
 0x2a3   : > { %v1335_v27 = vsel %vm1331_vm6, %v1324_v25, %v1326_v22  ;;  %1368 = vmatpush.bf16.msrb.mxu1 %v1336_v26 }
 0x2a4   : > { %1355 = vmatpush.bf16.msrb.mxu0 %v1335_v27 }
 0x2a7   : > { %1913 = vrot.lane.b32.xlu1 %v4411_v52, %s3913_s15  ;;  %1369 = vmatpush.bf16.msrb.mxu1 %v1333_v30  ;;  %v3571_v30 = vld [vmem:[%s5198_s5 + $0x10] sm:$0x3] }
 0x2a8   : > { %1839 = vrot.lane.b32.xlu0 %v4469_v28, %s3912_s11  ;;  %1356 = vmatpush.bf16.msrb.mxu0 %v1332_v31 }
 0x2a9   : > { %v1402_v32 = vpop.permute.xlu1 %1401 }
 0x2aa   : > { %v1330_v34 = vpop.permute.xlu0 %1329  ;;  %1915 = vrot.lane.b32.xlu2 %v4407_v51, %s3913_s15  ;;  %v1418_v50 = vsel %vm1417_vm7, %v1402_v32, %v4437_v4 }
 0x2ab   : > { %1394 = vmatpush.bf16.msrb.mxu3 %v1330_v34  ;;  %v1337_v37 = vsel %vm1331_vm6, %v4413_v48, %v1330_v34  ;;  %v4485_v36 = vpop.permute.xlu2 %1493  ;;  %3558 = vmatmul.msk.bf16.vlgmr.msrb.gmra.mxu0 %vm916_vm2, %v3557_v35  ;;  %vm2805_vm6 = vcmask 252928  }
 0x2ac   : > { %1381 = vmatpush.bf16.msrb.mxu2 %v1337_v37  ;;  %3559 = vmatmul.msk.bf16.vlgmr.msrb.gmra.mxu1 %vm916_vm2, %v3557_v35 }
 0x2af   : > { %1395 = vmatpush.bf16.msrb.mxu3 %v4398_v44  ;;  %1919 = vrot.lane.b32.xlu1 %v4435_v3, %s3913_s15 }
 0x2b0   : > { %1917 = vrot.lane.b32.xlu0 %v4420_v57, %s3913_s15  ;;  %1382 = vmatpush.bf16.msrb.mxu2 %v1334_v38 }
 0x2b1   : > { %v1408_v39 = vpop.permute.xlu1 %1407 }
 0x2b2   : > { %v1406_v40 = vpop.permute.xlu0 %1405  ;;  %3561 = vmatmul.msk.bf16.vlgmr.msrb.gmra.mxu3 %vm916_vm2, %v3557_v35  ;;  %1921 = vrot.lane.b32.xlu2 %v4430_v2, %s3913_s15 }
 0x2b3   : > { %1480 = vmatpush.bf16.msra.mxu3 %v1416_v29  ;;  %3560 = vmatmul.msk.bf16.vlgmr.msrb.gmra.mxu2 %vm916_vm2, %v3557_v35  ;;  %v1420_v49 = vsel %vm1417_vm7, %v1406_v40, %v1408_v39  ;;  %v1419_v41 = vsel %vm1417_vm7, %v4437_v4, %v1406_v40 }
 0x2b4   : > { %v1500_v42 = vpop.permute.xlu2 %1499 }
 0x2b7   : > { %1481 = vmatpush.bf16.msra.mxu3 %v1408_v39  ;;  %1925 = vrot.lane.b32.xlu1 %v4454_v17, %s3913_s15 }
 0x2b8   : > { %1923 = vrot.lane.b32.xlu0 %v4443_v8, %s3913_s15 }
 0x2b9   : > { %v1414_v43 = vpop.permute.xlu1 %1413 }
 0x2ba   : > { %v1412_v44 = vpop.permute.xlu0 %1411  ;;  %v1423_v33 = vsel %vm1417_vm7, %v1414_v43, %v1416_v29  ;;  %1927 = vrot.lane.b32.xlu2 %v4450_v16, %s3913_s15 }
 0x2bb   : > { %v1421_v45 = vsel %vm1417_vm7, %v1410_v18, %v1412_v44  ;;  %v1422_v46 = vsel %vm1417_vm7, %v1412_v44, %v1414_v43  ;;  %1467 = vmatpush.bf16.msra.mxu2 %v1423_v33  ;;  %vm2991_vm7 = vcmask 244736  }
 0x2bc   : > { %1441 = vmatpush.bf16.msra.mxu0 %v1421_v45  ;;  %1454 = vmatpush.bf16.msra.mxu1 %v1422_v46  ;;  %v4509_v47 = vpop.permute.xlu2 %1581 }
 0x2bf   : > { %1931 = vrot.lane.b32.xlu1 %v4469_v28, %s3913_s15  ;;  %1468 = vmatpush.bf16.msra.mxu2 %v1420_v49 }
 0x2c0   : > { %1929 = vrot.lane.b32.xlu0 %v4460_v21, %s3913_s15  ;;  %1442 = vmatpush.bf16.msra.mxu0 %v1418_v50 }
 0x2c1   : > { %1455 = vmatpush.bf16.msra.mxu1 %v1419_v41  ;;  %v1492_v48 = vpop.permute.xlu1 %1491 }
 0x2c2   : > { %v1490_v55 = vpop.permute.xlu0 %1489  ;;  %3565 = vmatmul.msk.bf16.vlgmr.msra.gmra.mxu3 %vm916_vm2, %v3556_v54  ;;  %2007 = vrot.lane.b32.xlu2 %v4411_v52, %s3914_s19  ;;  %v1507_v6 = vsel %vm1505_vm8, %v1492_v48, %v4485_v36 }
 0x2c3   : > { %3562 = vmatmul.msk.bf16.vlgmr.msra.gmra.mxu0 %vm916_vm2, %v3556_v54  ;;  %3564 = vmatmul.msk.bf16.vlgmr.msra.gmra.mxu2 %vm916_vm2, %v3556_v54  ;;  %v1506_v61 = vsel %vm1505_vm8, %v1490_v55, %v1492_v48 }
 0x2c4   : > { %3563 = vmatmul.msk.bf16.vlgmr.msra.gmra.mxu1 %vm916_vm2, %v3556_v54  ;;  %v4529_v56 = vpop.permute.xlu2 %1587 }
 0x2c7   : > { %2011 = vrot.lane.b32.xlu1 %v4420_v57, %s3914_s19 }
 0x2c8   : > { %2009 = vrot.lane.b32.xlu0 %v4407_v51, %s3914_s19 }
 0x2c9   : > { %v1498_v53 = vpop.permute.xlu1 %1497 }
 0x2ca   : > { %v1509_v58 = vsel %vm1505_vm8, %v1498_v53, %v1500_v42  ;;  %v1496_v59 = vpop.permute.xlu0 %1495  ;;  %2013 = vrot.lane.b32.xlu2 %v4435_v3, %s3914_s19 }
 0x2cb   : > { %1529 = vmatpush.bf16.msrb.mxu0 %v1509_v58  ;;  %v1508_v7 = vsel %vm1505_vm8, %v4485_v36, %v1496_v59 }
 0x2cc   : > { %v1594_v60 = vpop.permute.xlu2 %1593  ;;  %v929_v24 = vpop.f32.mrf.mxu0 }
 0x2cf   : > { %2017 = vrot.lane.b32.xlu1 %v4443_v8, %s3914_s19  ;;  %1530 = vmatpush.bf16.msrb.mxu0 %v1506_v61  ;;  %v3576_v61 = vld [vmem:[%s5198_s5 + $0x12] sm:$0x3] }
 0x2d0   : > { %2015 = vrot.lane.b32.xlu0 %v4430_v2, %s3914_s19 }
 0x2d1   : > { %v1504_v62 = vpop.permute.xlu1 %1503 }
 0x2d2   : > { %v1502_v63 = vpop.permute.xlu0 %1501  ;;  %1568 = vmatpush.bf16.msrb.mxu3 %v1504_v62  ;;  %2023 = vrot.lane.b32.xlu2 %v4460_v21, %s3914_s19 }
 0x2d3   : > { %v1510_v1 = vsel %vm1505_vm8, %v1500_v42, %v1502_v63  ;;  %v1511_v4 = vsel %vm1505_vm8, %v1502_v63, %v1504_v62  ;;  %3567 = vmatmul.msk.bf16.vlgmr.msrb.gmra.mxu0 %vm916_vm2, %v3566_v0  ;;  %vm3089_vm8 = vcmask 236544  }
 0x2d4   : > { %1542 = vmatpush.bf16.msrb.mxu1 %v1510_v1  ;;  %1555 = vmatpush.bf16.msrb.mxu2 %v1511_v4  ;;  %v4551_v5 = vpop.permute.xlu2 %1675  ;;  %v931_v37 = vpop.f32.mrf.mxu0 }
 0x2d6   : > { %1569 = vmatpush.bf16.msrb.mxu3 %v1496_v59 }
 0x2d7   : > { %2021 = vrot.lane.b32.xlu1 %v4450_v16, %s3914_s19 }
 0x2d8   : > { %2025 = vrot.lane.b32.xlu0 %v4469_v28, %s3914_s19  ;;  %1543 = vmatpush.bf16.msrb.mxu1 %v1507_v6  ;;  %v942_v19 = vpop.f32.mrf.mxu1 }
 0x2d9   : > { %1556 = vmatpush.bf16.msrb.mxu2 %v1508_v7  ;;  %v1586_v9 = vpop.permute.xlu1 %1585  ;;  %3570 = vmatmul.msk.bf16.vlgmr.msrb.gmra.mxu3 %vm916_vm2, %v3566_v0 }
 0x2da   : > { %v1584_v10 = vpop.permute.xlu0 %1583  ;;  %2019 = vrot.lane.b32.xlu2 %v4454_v17, %s3914_s19  ;;  %v1600_v35 = vsel %vm1597_vm9, %v1586_v9, %v4529_v56  ;;  %s3919_s19 = smov 54  }
 0x2db   : > { %3568 = vmatmul.msk.bf16.vlgmr.msrb.gmra.mxu1 %vm916_vm2, %v3566_v0  ;;  %v1599_v20 = vsel %vm1597_vm9, %v1584_v10, %v1586_v9  ;;  %v1598_v23 = vsel %vm1597_vm9, %v4509_v47, %v1584_v10 }
 0x2dc   : > { %3569 = vmatmul.msk.bf16.vlgmr.msrb.gmra.mxu2 %vm916_vm2, %v3566_v0  ;;  %v1682_v11 = vpop.permute.xlu2 %1681  ;;  %v968_v22 = vpop.f32.mrf.mxu3 }
 0x2dd   : > { %v992_v44 = vpop.f32.mrf.mxu0 }
 0x2de   : > { %v993_v54 = vadd.f32 %v992_v44, %v929_v24 }
 0x2df   : > { %2121 = vrot.lane.b32.xlu1 %v4460_v21, %s3915_s22  ;;  %v955_v25 = vpop.f32.mrf.mxu2 }
 0x2e0   : > { %2105 = vrot.lane.b32.xlu0 %v4411_v52, %s3915_s22  ;;  %v944_v32 = vpop.f32.mrf.mxu1 }
 0x2e1   : > { %v1592_v12 = vpop.permute.xlu1 %1591 }
 0x2e2   : > { %v1590_v13 = vpop.permute.xlu0 %1589  ;;  %v1602_v14 = vsel %vm1597_vm9, %v1592_v12, %v1594_v60  ;;  %2123 = vrot.lane.b32.xlu2 %v4469_v28, %s3915_s22 }
 0x2e3   : > { %v1601_v15 = vsel %vm1597_vm9, %v1590_v13, %v1592_v12  ;;  %1634 = vmatpush.bf16.msra.mxu1 %v1602_v14 }
 0x2e4   : > { %1621 = vmatpush.bf16.msra.mxu0 %v1601_v15  ;;  %v1688_v18 = vpop.permute.xlu2 %1687  ;;  %v970_v34 = vpop.f32.mrf.mxu3 }
 0x2e5   : > { %v994_v62 = vpop.f32.mrf.mxu0 }
 0x2e7   : > { %2111 = vrot.lane.b32.xlu1 %v4435_v3, %s3915_s22  ;;  %1635 = vmatpush.bf16.msra.mxu1 %v1599_v20  ;;  %v957_v36 = vpop.f32.mrf.mxu2 }
 0x2e8   : > { %2119 = vrot.lane.b32.xlu0 %v4450_v16, %s3915_s22  ;;  %1622 = vmatpush.bf16.msra.mxu0 %v1598_v23  ;;  %v1005_v42 = vpop.f32.mrf.mxu1 }
 0x2e9   : > { %v1674_v26 = vpop.permute.xlu1 %1673  ;;  %v1006_v41 = vadd.f32 %v1005_v42, %v942_v19 }
 0x2ea   : > { %v1596_v27 = vpop.permute.xlu0 %1595  ;;  %2113 = vrot.lane.b32.xlu2 %v4430_v2, %s3915_s22 }
 0x2eb   : > { %1660 = vmatpush.bf16.msra.mxu3 %v1596_v27  ;;  %v1603_v29 = vsel %vm1597_vm9, %v1594_v60, %v1596_v27  ;;  %3573 = vmatmul.msk.bf16.vlgmr.msra.gmra.mxu1 %vm916_vm2, %v3571_v30  ;;  %v1690_v60 = vsel %vm1689_vm10, %v1674_v26, %v4551_v5  ;;  %vm3187_vm9 = vcmask 228352  }
 0x2ec   : > { %1647 = vmatpush.bf16.msra.mxu2 %v1603_v29  ;;  %v4588_v31 = vpop.permute.xlu2 %1825  ;;  %3572 = vmatmul.msk.bf16.vlgmr.msra.gmra.mxu0 %vm916_vm2, %v3571_v30  ;;  %v1031_v43 = vpop.f32.mrf.mxu3 }
 0x2ed   : > { %v1032_v48 = vadd.f32 %v1031_v43, %v968_v22 }
 0x2ef   : > { %1661 = vmatpush.bf16.msra.mxu3 %v4529_v56  ;;  %2117 = vrot.lane.b32.xlu1 %v4454_v17, %s3915_s22 }
 0x2f0   : > { %2109 = vrot.lane.b32.xlu0 %v4420_v57, %s3915_s22  ;;  %1648 = vmatpush.bf16.msra.mxu2 %v1600_v35  ;;  %v1018_v33 = vpop.f32.mrf.mxu2  ;;  %v1007_v53 = vpop.f32.mrf.mxu1 }
 0x2f1   : > { %v1680_v38 = vpop.permute.xlu1 %1679  ;;  %v1019_v56 = vadd.f32 %v1018_v33, %v955_v25  ;;  %v3582_v53 = vld [vmem:[%s5198_s5 + $0x16] sm:$0x3] }
 0x2f2   : > { %v1678_v39 = vpop.permute.xlu0 %1677  ;;  %3575 = vmatmul.msk.bf16.vlgmr.msra.gmra.mxu3 %vm916_vm2, %v3571_v30  ;;  %2115 = vrot.lane.b32.xlu2 %v4443_v8, %s3915_s22 }
 0x2f3   : > { %1752 = vmatpush.bf16.msrb.mxu3 %v1688_v18  ;;  %3574 = vmatmul.msk.bf16.vlgmr.msra.gmra.mxu2 %vm916_vm2, %v3571_v30  ;;  %v1692_v58 = vsel %vm1689_vm10, %v1678_v39, %v1680_v38  ;;  %v1691_v0 = vsel %vm1689_vm10, %v4551_v5, %v1678_v39  ;;  %v1080_v5 = vpop.f32.mrf.mxu0 }
 0x2f4   : > { %v4602_v40 = vpop.permute.xlu2 %1831  ;;  %v1033_v59 = vpop.f32.mrf.mxu3  ;;  %v1123_v15 = vadd.f32 %v1080_v5, %v993_v54 }
 0x2f7   : > { %1753 = vmatpush.bf16.msrb.mxu3 %v1680_v38  ;;  %2219 = vrot.lane.b32.xlu1 %v4460_v21, %s3916_s26 }
 0x2f8   : > { %2107 = vrot.lane.b32.xlu0 %v4407_v51, %s3915_s22  ;;  %v1020_v63 = vpop.f32.mrf.mxu2  ;;  %v1093_v7 = vpop.f32.mrf.mxu1  ;;  %s3920_s22 = smov 53  }
 0x2f9   : > { %v1686_v45 = vpop.permute.xlu1 %1685  ;;  %v1124_v13 = vadd.f32 %v1093_v7, %v1006_v41 }
 0x2fa   : > { %v1684_v46 = vpop.permute.xlu0 %1683  ;;  %v1695_v47 = vsel %vm1689_vm10, %v1686_v45, %v1688_v18  ;;  %2221 = vrot.lane.b32.xlu2 %v4469_v28, %s3916_s26 }
 0x2fb   : > { %v1693_v49 = vsel %vm1689_vm10, %v1682_v11, %v1684_v46  ;;  %v1694_v50 = vsel %vm1689_vm10, %v1684_v46, %v1686_v45  ;;  %1739 = vmatpush.bf16.msrb.mxu2 %v1695_v47  ;;  %v1082_v23 = vpop.f32.mrf.mxu0  ;;  %vm3302_vm10 = vcmask 784388  }
 0x2fc   : > { %1713 = vmatpush.bf16.msrb.mxu0 %v1693_v49  ;;  %1726 = vmatpush.bf16.msrb.mxu1 %v1694_v50  ;;  %v4613_v55 = vpop.permute.xlu2 %1837  ;;  %v1119_v9 = vpop.f32.mrf.mxu3 }
 0x2fd   : > { %v1126_v14 = vadd.f32 %v1119_v9, %v1032_v48 }
 0x2ff   : > { %2209 = vrot.lane.b32.xlu1 %v4435_v3, %s3916_s26  ;;  %1740 = vmatpush.bf16.msrb.mxu2 %v1692_v58 }
 0x300   : > { %2217 = vrot.lane.b32.xlu0 %v4450_v16, %s3916_s26  ;;  %1714 = vmatpush.bf16.msrb.mxu0 %v1690_v60  ;;  %v1106_v10 = vpop.f32.mrf.mxu2  ;;  %v1095_v20 = vpop.f32.mrf.mxu1 }
 0x301   : > { %1727 = vmatpush.bf16.msrb.mxu1 %v1691_v0  ;;  %v1824_v1 = vpop.permute.xlu1 %1823  ;;  %v1125_v18 = vadd.f32 %v1106_v10, %v1019_v56 }
 0x302   : > { %v1822_v4 = vpop.permute.xlu0 %1821  ;;  %3580 = vmatmul.msk.bf16.vlgmr.msrb.gmra.mxu3 %vm916_vm2, %v3576_v61  ;;  %2211 = vrot.lane.b32.xlu2 %v4430_v2, %s3916_s26 }
 0x303   : > { %3579 = vmatmul.msk.bf16.vlgmr.msrb.gmra.mxu2 %vm916_vm2, %v3576_v61  ;;  %3577 = vmatmul.msk.bf16.vlgmr.msrb.gmra.mxu0 %vm916_vm2, %v3576_v61  ;;  %v1842_v36 = vsel %vm1841_vm11, %v1822_v4, %v1824_v1  ;;  %v1172_v38 = vpop.f32.mrf.mxu0 }
 0x304   : > { %3578 = vmatmul.msk.bf16.vlgmr.msrb.gmra.mxu1 %vm916_vm2, %v3576_v61  ;;  %v4633_v6 = vpop.permute.xlu2 %1915  ;;  %v1121_v22 = vpop.f32.mrf.mxu3  ;;  %v1215_v45 = vadd.f32 %v1172_v38, %v1123_v15 }
 0x307   : > { %2215 = vrot.lane.b32.xlu1 %v4454_v17, %s3916_s26 }
 0x308   : > { %2207 = vrot.lane.b32.xlu0 %v4420_v57, %s3916_s26  ;;  %v1108_v24 = vpop.f32.mrf.mxu2  ;;  %v1185_v34 = vpop.f32.mrf.mxu1 }
 0x309   : > { %v1830_v11 = vpop.permute.xlu1 %1829  ;;  %v1216_v44 = vadd.f32 %v1185_v34, %v1124_v13 }
 0x30a   : > { %v1828_v12 = vpop.permute.xlu0 %1827  ;;  %2213 = vrot.lane.b32.xlu2 %v4443_v8, %s3916_s26 }
 0x30b   : > { %v1844_v35 = vsel %vm1841_vm11, %v4588_v31, %v1828_v12  ;;  %v1174_v48 = vpop.f32.mrf.mxu0 }
 0x30c   : > { %v4641_v19 = vpop.permute.xlu2 %1921  ;;  %v1211_v37 = vpop.f32.mrf.mxu3 }
 0x30d   : > { %v1218_v33 = vadd.f32 %v1211_v37, %v1126_v14 }
 0x30f   : > { %2203 = vrot.lane.b32.xlu1 %v4411_v52, %s3916_s26 }
 0x310   : > { %2205 = vrot.lane.b32.xlu0 %v4407_v51, %s3916_s26  ;;  %v1198_v39 = vpop.f32.mrf.mxu2  ;;  %v1187_v50 = vpop.f32.mrf.mxu1  ;;  %s3921_s26 = smov 52  }
 0x311   : > { %v1836_v25 = vpop.permute.xlu1 %1835  ;;  %v1217_v47 = vadd.f32 %v1198_v39, %v1125_v18 }
 0x312   : > { %v1848_v26 = vsel %vm1841_vm11, %v1836_v25, %v4613_v55  ;;  %v1834_v27 = vpop.permute.xlu0 %1833  ;;  %2319 = vrot.lane.b32.xlu2 %v4460_v21, %s3917_s24 }
 0x313   : > { %v1846_v29 = vsel %vm1841_vm11, %v4602_v40, %v1834_v27  ;;  %v1847_v30 = vsel %vm1841_vm11, %v1834_v27, %v1836_v25  ;;  %1893 = vmatpush.bf16.msra.mxu2 %v1848_v26  ;;  %v1843_v40 = vsel %vm1841_vm11, %v1824_v1, %v4588_v31  ;;  %v1845_v31 = vsel %vm1841_vm11, %v1828_v12, %v1830_v11  ;;  %v1264_v61 = vpop.f32.mrf.mxu0  ;;  %v3581_v27 = vld [vmem:[%s5198_s5 + $0x14] sm:$0x3] }
 0x314   : > { %1867 = vmatpush.bf16.msra.mxu0 %v1846_v29  ;;  %1880 = vmatpush.bf16.msra.mxu1 %v1847_v30  ;;  %v4654_v32 = vpop.permute.xlu2 %1927  ;;  %v1213_v41 = vpop.f32.mrf.mxu3  ;;  %v4700_v5 = vadd.f32 %v1264_v61, %v1215_v45 }
 0x317   : > { %2317 = vrot.lane.b32.xlu1 %v4450_v16, %s3917_s24  ;;  %1894 = vmatpush.bf16.msra.mxu2 %v1844_v35 }
 0x318   : > { %2321 = vrot.lane.b32.xlu0 %v4469_v28, %s3917_s24  ;;  %1868 = vmatpush.bf16.msra.mxu0 %v1842_v36  ;;  %v1200_v54 = vpop.f32.mrf.mxu2  ;;  %v1277_v59 = vpop.f32.mrf.mxu1 }
 0x319   : > { %1881 = vmatpush.bf16.msra.mxu1 %v1843_v40  ;;  %v1914_v42 = vpop.permute.xlu1 %1913  ;;  %v4696_v7 = vadd.f32 %v1277_v59, %v1216_v44 }
 0x31a   : > { %v1840_v43 = vpop.permute.xlu0 %1839  ;;  %2309 = vrot.lane.b32.xlu2 %v4435_v3, %s3917_s24  ;;  %3625 = vmatmul.msk.bf16.vlgmr.msra.gmra.mxu2 %vm916_vm2, %v3582_v53  ;;  %v1934_v15 = vsel %vm1933_vm12, %v1914_v42, %v4633_v6 }
 0x31b   : > { %v1849_v46 = vsel %vm1841_vm11, %v4613_v55, %v1840_v43  ;;  %3623 = vmatmul.msk.bf16.vlgmr.msra.gmra.mxu0 %vm916_vm2, %v3582_v53  ;;  %v1266_v18 = vpop.f32.mrf.mxu0  ;;  %vm3295_vm11 = vcmask 1043456  }
 0x31c   : > { %1906 = vmatpush.bf16.msra.mxu3 %v1849_v46  ;;  %v4669_v49 = vpop.permute.xlu2 %2007  ;;  %3624 = vmatmul.msk.bf16.vlgmr.msra.gmra.mxu1 %vm916_vm2, %v3582_v53  ;;  %v1303_v60 = vpop.f32.mrf.mxu3 }
 0x31d   : > { %v4698_v9 = vadd.f32 %v1303_v60, %v1218_v33 }
 0x31f   : > { %2307 = vrot.lane.b32.xlu1 %v4420_v57, %s3917_s24 }
 0x320   : > { %2311 = vrot.lane.b32.xlu0 %v4430_v2, %s3917_s24  ;;  %1907 = vmatpush.bf16.msra.mxu3 %v1845_v31  ;;  %v1290_v62 = vpop.f32.mrf.mxu2  ;;  %v1279_v12 = vpop.f32.mrf.mxu1 }
 0x321   : > { %v1920_v55 = vpop.permute.xlu1 %1919  ;;  %v4702_v10 = vadd.f32 %v1290_v62, %v1217_v47 }
 0x322   : > { %v1918_v56 = vpop.permute.xlu0 %1917  ;;  %2315 = vrot.lane.b32.xlu2 %v4454_v17, %s3917_s24  ;;  %v1937_v35 = vsel %vm1933_vm12, %v1920_v55, %v4641_v19 }
 0x323   : > { %3626 = vmatmul.msk.bf16.vlgmr.msra.gmra.mxu3 %vm916_vm2, %v3582_v53  ;;  %v1935_v13 = vsel %vm1933_vm12, %v4633_v6, %v1918_v56  ;;  %v1936_v30 = vsel %vm1933_vm12, %v1918_v56, %v1920_v55 }
 0x324   : > { %v4684_v58 = vpop.permute.xlu2 %2013  ;;  %v1305_v14 = vpop.f32.mrf.mxu3 }
 0x325   : > { %v3631_v14 = vld [vmem:[%s5198_s5 + $0x18] sm:$0x3] }
 0x327   : > { %2305 = vrot.lane.b32.xlu1 %v4407_v51, %s3917_s24 }
 0x328   : > { %2313 = vrot.lane.b32.xlu0 %v4443_v8, %s3917_s24  ;;  %v1292_v20 = vpop.f32.mrf.mxu2 }
 0x329   : > { %v1926_v63 = vpop.permute.xlu1 %1925  ;;  %v1371_v26 = vpop.f32.mrf.mxu1 }
 0x32a   : > { %v1939_v0 = vsel %vm1933_vm12, %v1926_v63, %v4654_v32  ;;  %v1924_v1 = vpop.permute.xlu0 %1923  ;;  %2303 = vrot.lane.b32.xlu2 %v4411_v52, %s3917_s24  ;;  %s3922_s24 = smov 31  }
 0x32b   : > { %v1938_v4 = vsel %vm1933_vm12, %v1924_v1, %v1926_v63  ;;  %1972 = vmatpush.bf16.msrb.mxu1 %v1939_v0 }
 0x32c   : > { %1959 = vmatpush.bf16.msrb.mxu0 %v1938_v4  ;;  %v4704_v11 = vpop.permute.xlu2 %2023 }
 0x32f   : > { %2413 = vrot.lane.b32.xlu1 %v4469_v28, %s3918_s17  ;;  %1973 = vmatpush.bf16.msrb.mxu1 %v1935_v13 }
 0x330   : > { %2411 = vrot.lane.b32.xlu0 %v4460_v21, %s3918_s17  ;;  %1960 = vmatpush.bf16.msrb.mxu0 %v1934_v15 }
 0x331   : > { %v1932_v22 = vpop.permute.xlu1 %1931  ;;  %v1373_v39 = vpop.f32.mrf.mxu1 }
 0x332   : > { %v1930_v23 = vpop.permute.xlu0 %1929  ;;  %2409 = vrot.lane.b32.xlu2 %v4450_v16, %s3918_s17  ;;  %3628 = vmatmul.msk.bf16.vlgmr.msrb.gmra.mxu1 %vm916_vm2, %v3581_v27 }
 0x333   : > { %v1940_v24 = vsel %vm1933_vm12, %v4654_v32, %v1930_v23  ;;  %v1941_v25 = vsel %vm1933_vm12, %v1930_v23, %v1932_v22  ;;  %v1358_v32 = vpop.f32.mrf.mxu0  ;;  %3627 = vmatmul.msk.bf16.vlgmr.msrb.gmra.mxu0 %vm916_vm2, %v3581_v27 }
 0x334   : > { %1985 = vmatpush.bf16.msrb.mxu2 %v1940_v24  ;;  %1998 = vmatpush.bf16.msrb.mxu3 %v1941_v25  ;;  %v2020_v6 = vpop.permute.xlu2 %2019 }
 0x335   : > { %v1397_v29 = vpop.f32.mrf.mxu3 }
 0x336   : > { %v1384_v34 = vpop.f32.mrf.mxu2 }
 0x337   : > { %2403 = vrot.lane.b32.xlu1 %v4430_v2, %s3918_s17 }
 0x338   : > { %2401 = vrot.lane.b32.xlu0 %v4435_v3, %s3918_s17  ;;  %1986 = vmatpush.bf16.msrb.mxu2 %v1936_v30 }
 0x339   : > { %1999 = vmatpush.bf16.msrb.mxu3 %v1937_v35  ;;  %v2012_v37 = vpop.permute.xlu1 %2011 }
 0x33a   : > { %v2010_v36 = vpop.permute.xlu0 %2009  ;;  %2399 = vrot.lane.b32.xlu2 %v4420_v57, %s3918_s17  ;;  %v2030_v4 = vsel %vm2027_vm13, %v2012_v37, %v4684_v58 }
 0x33b   : > { %3629 = vmatmul.msk.bf16.vlgmr.msrb.gmra.mxu2 %vm916_vm2, %v3581_v27  ;;  %v1360_v42 = vpop.f32.mrf.mxu0  ;;  %v2028_v47 = vsel %vm2027_vm13, %v4669_v49, %v2010_v36  ;;  %v2029_v0 = vsel %vm2027_vm13, %v2010_v36, %v2012_v37 }
 0x33c   : > { %3630 = vmatmul.msk.bf16.vlgmr.msrb.gmra.mxu3 %vm916_vm2, %v3581_v27  ;;  %v2124_v38 = vpop.permute.xlu2 %2123 }
 0x33d   : > { %v1399_v40 = vpop.f32.mrf.mxu3 }
 0x33e   : > { %v1386_v19 = vpop.f32.mrf.mxu2 }
 0x33f   : > { %2405 = vrot.lane.b32.xlu1 %v4443_v8, %s3918_s17 }
 0x340   : > { %2407 = vrot.lane.b32.xlu0 %v4454_v17, %s3918_s17 }
 0x341   : > { %v2018_v43 = vpop.permute.xlu1 %2017  ;;  %v1457_v46 = vpop.f32.mrf.mxu1 }
 0x342   : > { %v2032_v44 = vsel %vm2027_vm13, %v2018_v43, %v2020_v6  ;;  %v2016_v33 = vpop.permute.xlu0 %2015  ;;  %2397 = vrot.lane.b32.xlu2 %v4407_v51, %s3918_s17  ;;  %v1458_v53 = vadd.f32 %v1457_v46, %v1371_v26 }
 0x343   : > { %2053 = vmatpush.bf16.msra.mxu0 %v2032_v44  ;;  %v1444_v41 = vpop.f32.mrf.mxu0  ;;  %v2031_v13 = vsel %vm2027_vm13, %v4684_v58, %v2016_v33 }
 0x344   : > { %v2114_v45 = vpop.permute.xlu2 %2113  ;;  %v1445_v60 = vadd.f32 %v1444_v41, %v1358_v32 }
 0x345   : > { %v1483_v50 = vpop.f32.mrf.mxu3 }
 0x346   : > { %v1470_v31 = vpop.f32.mrf.mxu2  ;;  %v1484_v59 = vadd.f32 %v1483_v50, %v1397_v29 }
 0x347   : > { %2505 = vrot.lane.b32.xlu1 %v4460_v21, %s3919_s19  ;;  %2054 = vmatpush.bf16.msra.mxu0 %v2028_v47  ;;  %v1471_v62 = vadd.f32 %v1470_v31, %v1384_v34 }
 0x348   : > { %2395 = vrot.lane.b32.xlu0 %v4411_v52, %s3918_s17 }
 0x349   : > { %v2022_v48 = vpop.permute.xlu1 %2021  ;;  %v1459_v63 = vpop.f32.mrf.mxu1 }
 0x34a   : > { %v2033_v54 = vsel %vm2027_vm13, %v2020_v6, %v2022_v48  ;;  %v2034_v55 = vsel %vm2027_vm13, %v2022_v48, %v4704_v11  ;;  %v2026_v56 = vpop.permute.xlu0 %2025  ;;  %2507 = vrot.lane.b32.xlu2 %v4469_v28, %s3919_s19  ;;  %3632 = vmatmul.msk.bf16.vlgmr.msra.gmra.mxu0 %vm916_vm2, %v3631_v14 }
 0x34b   : > { %v2035_v49 = vsel %vm2027_vm13, %v4704_v11, %v2026_v56  ;;  %2066 = vmatpush.bf16.msra.mxu1 %v2033_v54  ;;  %2079 = vmatpush.bf16.msra.mxu2 %v2034_v55  ;;  %v1446_v11 = vpop.f32.mrf.mxu0  ;;  %v3636_v55 = vld [vmem:[%s5198_s5 + $0x1a] sm:$0x3] }
 0x34c   : > { %2092 = vmatpush.bf16.msra.mxu3 %v2035_v49  ;;  %v2116_v61 = vpop.permute.xlu2 %2115 }
 0x34d   : > { %v1485_v1 = vpop.f32.mrf.mxu3 }
 0x34e   : > { %v1472_v12 = vpop.f32.mrf.mxu2 }
 0x34f   : > { %2495 = vrot.lane.b32.xlu1 %v4435_v3, %s3919_s19  ;;  %2067 = vmatpush.bf16.msra.mxu1 %v2029_v0 }
 0x350   : > { %2503 = vrot.lane.b32.xlu0 %v4450_v16, %s3919_s19  ;;  %2080 = vmatpush.bf16.msra.mxu2 %v2030_v4 }
 0x351   : > { %2093 = vmatpush.bf16.msra.mxu3 %v2031_v13  ;;  %v2122_v15 = vpop.permute.xlu1 %2121 }
 0x352   : > { %v2133_v18 = vsel %vm2125_vm14, %v2122_v15, %v2124_v38  ;;  %v2106_v20 = vpop.permute.xlu0 %2105  ;;  %3633 = vmatmul.msk.bf16.vlgmr.msra.gmra.mxu1 %vm916_vm2, %v3631_v14  ;;  %2497 = vrot.lane.b32.xlu2 %v4430_v2, %s3919_s19 }
 0x353   : > { %3634 = vmatmul.msk.bf16.vlgmr.msra.gmra.mxu2 %vm916_vm2, %v3631_v14  ;;  %v1532_v22 = vpop.f32.mrf.mxu0 }
 0x354   : > { %3635 = vmatmul.msk.bf16.vlgmr.msra.gmra.mxu3 %vm916_vm2, %v3631_v14  ;;  %v2222_v58 = vpop.permute.xlu2 %2221  ;;  %v1575_v30 = vadd.f32 %v1532_v22, %v1445_v60 }
 0x355   : > { %2190 = vmatpush.bf16.msrb.mxu3 %v2133_v18 }
 0x357   : > { %2501 = vrot.lane.b32.xlu1 %v4454_v17, %s3919_s19 }
 0x358   : > { %2493 = vrot.lane.b32.xlu0 %v4420_v57, %s3919_s19  ;;  %v1545_v23 = vpop.f32.mrf.mxu1 }
 0x359   : > { %v2112_v24 = vpop.permute.xlu1 %2111  ;;  %v1576_v27 = vadd.f32 %v1545_v23, %v1458_v53 }
 0x35a   : > { %v2120_v25 = vpop.permute.xlu0 %2119  ;;  %v2129_v6 = vsel %vm2125_vm14, %v2112_v24, %v2114_v45  ;;  %2499 = vrot.lane.b32.xlu2 %v4443_v8, %s3919_s19 }
 0x35b   : > { %v2132_v26 = vsel %vm2125_vm14, %v2120_v25, %v2122_v15  ;;  %2191 = vmatpush.bf16.msrb.mxu3 %v2129_v6  ;;  %v1534_v37 = vpop.f32.mrf.mxu0 }
 0x35c   : > { %2177 = vmatpush.bf16.msrb.mxu2 %v2132_v26  ;;  %v1571_v29 = vpop.f32.mrf.mxu3  ;;  %v2212_v32 = vpop.permute.xlu2 %2211 }
 0x35d   : > { %v1578_v34 = vadd.f32 %v1571_v29, %v1484_v59 }
 0x35f   : > { %2489 = vrot.lane.b32.xlu1 %v4411_v52, %s3919_s19  ;;  %v1558_v35 = vpop.f32.mrf.mxu2 }
 0x360   : > { %2491 = vrot.lane.b32.xlu0 %v4407_v51, %s3919_s19  ;;  %v1577_v36 = vadd.f32 %v1558_v35, %v1471_v62  ;;  %v1547_v38 = vpop.f32.mrf.mxu1  ;;  %v3641_v35 = vld [vmem:[%s5198_s5 + $0x1c] sm:$0x3] }
 0x361   : > { %v2118_v39 = vpop.permute.xlu1 %2117 }
 0x362   : > { %v2130_v40 = vsel %vm2125_vm14, %v2116_v61, %v2118_v39  ;;  %v2131_v42 = vsel %vm2125_vm14, %v2118_v39, %v2120_v25  ;;  %v2110_v19 = vpop.permute.xlu0 %2109  ;;  %2603 = vrot.lane.b32.xlu2 %v4460_v21, %s3920_s22 }
 0x363   : > { %2164 = vmatpush.bf16.msrb.mxu1 %v2131_v42  ;;  %v2128_v43 = vsel %vm2125_vm14, %v2110_v19, %v2112_v24  ;;  %2151 = vmatpush.bf16.msrb.mxu0 %v2130_v40 }
 0x364   : > { %2178 = vmatpush.bf16.msrb.mxu2 %v2128_v43  ;;  %v1573_v44 = vpop.f32.mrf.mxu3  ;;  %v2214_v33 = vpop.permute.xlu2 %2213  ;;  %3640 = vmatmul.msk.bf16.vlgmr.msrb.gmra.mxu3 %vm916_vm2, %v3636_v55 }
 0x367   : > { %2601 = vrot.lane.b32.xlu1 %v4450_v16, %s3920_s22  ;;  %v1560_v45 = vpop.f32.mrf.mxu2  ;;  %3639 = vmatmul.msk.bf16.vlgmr.msrb.gmra.mxu2 %vm916_vm2, %v3636_v55 }
 0x368   : > { %2605 = vrot.lane.b32.xlu0 %v4469_v28, %s3920_s22  ;;  %v1637_v47 = vpop.f32.mrf.mxu1 }
 0x369   : > { %v2220_v46 = vpop.permute.xlu1 %2219  ;;  %v1624_v31 = vpop.f32.mrf.mxu0  ;;  %v1668_v56 = vadd.f32 %v1637_v47, %v1576_v27 }
 0x36a   : > { %v2231_v50 = vsel %vm2223_vm15, %v2220_v46, %v2222_v58  ;;  %v2108_v41 = vpop.permute.xlu0 %2107  ;;  %v1667_v49 = vadd.f32 %v1624_v31, %v1575_v30  ;;  %2593 = vrot.lane.b32.xlu2 %v4435_v3, %s3920_s22 }
 0x36b   : > { %v2126_v48 = vsel %vm2125_vm14, %v2106_v20, %v2108_v41  ;;  %v2127_v54 = vsel %vm2125_vm14, %v2108_v41, %v2110_v19  ;;  %2288 = vmatpush.bf16.msra.mxu3 %v2231_v50 }
 0x36c   : > { %2152 = vmatpush.bf16.msrb.mxu0 %v2126_v48  ;;  %2165 = vmatpush.bf16.msrb.mxu1 %v2127_v54  ;;  %v4803_v53 = vpop.permute.xlu2 %2319 }
 0x36f   : > { %2591 = vrot.lane.b32.xlu1 %v4420_v57, %s3920_s22  ;;  %3638 = vmatmul.msk.bf16.vlgmr.msrb.gmra.mxu1 %vm916_vm2, %v3636_v55 }
 0x370   : > { %2595 = vrot.lane.b32.xlu0 %v4430_v2, %s3920_s22  ;;  %3637 = vmatmul.msk.bf16.vlgmr.msrb.gmra.mxu0 %vm916_vm2, %v3636_v55  ;;  %v1639_v60 = vpop.f32.mrf.mxu1 }
 0x371   : > { %v2210_v59 = vpop.permute.xlu1 %2209  ;;  %v1626_v63 = vpop.f32.mrf.mxu0 }
 0x372   : > { %v2218_v61 = vpop.permute.xlu0 %2217  ;;  %v2227_v62 = vsel %vm2223_vm15, %v2210_v59, %v2212_v32  ;;  %2599 = vrot.lane.b32.xlu2 %v4454_v17, %s3920_s22 }
 0x373   : > { %v2230_v0 = vsel %vm2223_vm15, %v2218_v61, %v2220_v46  ;;  %2289 = vmatpush.bf16.msra.mxu3 %v2227_v62 }
 0x374   : > { %2275 = vmatpush.bf16.msra.mxu2 %v2230_v0  ;;  %v4817_v1 = vpop.permute.xlu2 %2309 }
 0x375   : > { %v1663_v4 = vpop.f32.mrf.mxu3 }
 0x376   : > { %v1670_v11 = vadd.f32 %v1663_v4, %v1578_v34  ;;  %v1650_v12 = vpop.f32.mrf.mxu2  ;;  %3645 = vmatmul.msk.bf16.vlgmr.msra.gmra.mxu3 %vm916_vm2, %v3641_v35 }
 0x377   : > { %2589 = vrot.lane.b32.xlu1 %v4407_v51, %s3920_s22  ;;  %v1669_v13 = vadd.f32 %v1650_v12, %v1577_v36 }
 0x378   : > { %2597 = vrot.lane.b32.xlu0 %v4443_v8, %s3920_s22 }
 0x379   : > { %v2216_v14 = vpop.permute.xlu1 %2215 }
 0x37a   : > { %v2228_v15 = vsel %vm2223_vm15, %v2214_v33, %v2216_v14  ;;  %v2229_v18 = vsel %vm2223_vm15, %v2216_v14, %v2218_v61  ;;  %v2208_v20 = vpop.permute.xlu0 %2207  ;;  %2587 = vrot.lane.b32.xlu2 %v4411_v52, %s3920_s22  ;;  %v3647_v61 = vld [vmem:[%s5198_s5 + $0x20] sm:$0x3] }
 0x37b   : > { %2262 = vmatpush.bf16.msra.mxu1 %v2229_v18  ;;  %v2226_v58 = vsel %vm2223_vm15, %v2208_v20, %v2210_v59  ;;  %2249 = vmatpush.bf16.msra.mxu0 %v2228_v15 }
 0x37c   : > { %2276 = vmatpush.bf16.msra.mxu2 %v2226_v58  ;;  %v4828_v22 = vpop.permute.xlu2 %2315 }
 0x37d   : > { %v1665_v23 = vpop.f32.mrf.mxu3 }
 0x37e   : > { %v1652_v24 = vpop.f32.mrf.mxu2 }
 0x37f   : > { %2703 = vrot.lane.b32.xlu1 %v4469_v28, %s3921_s26  ;;  %3644 = vmatmul.msk.bf16.vlgmr.msra.gmra.mxu2 %vm916_vm2, %v3641_v35 }
 0x380   : > { %2701 = vrot.lane.b32.xlu0 %v4460_v21, %s3921_s26  ;;  %v1716_v29 = vpop.f32.mrf.mxu0 }
 0x381   : > { %v2204_v25 = vpop.permute.xlu1 %2203  ;;  %v1729_v6 = vpop.f32.mrf.mxu1  ;;  %v1759_v34 = vadd.f32 %v1716_v29, %v1667_v49 }
 0x382   : > { %v2206_v26 = vpop.permute.xlu0 %2205  ;;  %v1760_v27 = vadd.f32 %v1729_v6, %v1668_v56  ;;  %2699 = vrot.lane.b32.xlu2 %v4450_v16, %s3921_s26 }
 0x383   : > { %v2224_v30 = vsel %vm2223_vm15, %v2204_v25, %v2206_v26  ;;  %v2225_v32 = vsel %vm2223_vm15, %v2206_v26, %v2208_v20  ;;  %v4845_v39 = vadd.f32 %v1759_v34, %v4700_v5  ;;  %v3646_v20 = vld [vmem:[%s5198_s5 + $0x1e] sm:$0x3] }
 0x384   : > { %2250 = vmatpush.bf16.msra.mxu0 %v2224_v30  ;;  %2263 = vmatpush.bf16.msra.mxu1 %v2225_v32  ;;  %v4840_v37 = vadd.f32 %v1760_v27, %v4696_v7  ;;  %v2304_v36 = vpop.permute.xlu2 %2303 }
 0x385   : > { %v1755_v38 = vpop.f32.mrf.mxu3 }
 0x386   : > { %v1762_v40 = vadd.f32 %v1755_v38, %v1670_v11  ;;  %v1742_v42 = vpop.f32.mrf.mxu2 }
 0x387   : > { %2693 = vrot.lane.b32.xlu1 %v4430_v2, %s3921_s26  ;;  %v1761_v7 = vadd.f32 %v1742_v42, %v1669_v13  ;;  %3642 = vmatmul.msk.bf16.vlgmr.msra.gmra.mxu0 %vm916_vm2, %v3641_v35  ;;  %v3656_v42 = vld [vmem:[%s5198_s5 + $0x22] sm:$0x3] }
 0x388   : > { %2691 = vrot.lane.b32.xlu0 %v4435_v3, %s3921_s26  ;;  %v4855_v19 = vadd.f32 %v1762_v40, %v4698_v9  ;;  %3643 = vmatmul.msk.bf16.vlgmr.msra.gmra.mxu1 %vm916_vm2, %v3641_v35  ;;  %v1718_v47 = vpop.f32.mrf.mxu0 }
 0x389   : > { %v2318_v5 = vpop.permute.xlu1 %2317  ;;  %v4859_v43 = vadd.f32 %v1761_v7, %v4702_v10  ;;  %v1731_v44 = vpop.f32.mrf.mxu1 }
 0x38a   : > { %v2330_v33 = vsel %vm2323_vm0, %v2318_v5, %v4803_v53  ;;  %v2322_v45 = vpop.permute.xlu0 %2321  ;;  %v2329_v46 = vsel %vm2323_vm0, %v4828_v22, %v2318_v5  ;;  %2689 = vrot.lane.b32.xlu2 %v4420_v57, %s3921_s26 }
 0x38b   : > { %v2331_v50 = vsel %vm2323_vm0, %v4803_v53, %v2322_v45  ;;  %2375 = vmatpush.bf16.msrb.mxu2 %v2330_v33  ;;  %2362 = vmatpush.bf16.msrb.mxu1 %v2329_v46 }
 0x38c   : > { %2388 = vmatpush.bf16.msrb.mxu3 %v2331_v50  ;;  %v2410_v9 = vpop.permute.xlu2 %2409 }
 0x38d   : > { %v1757_v10 = vpop.f32.mrf.mxu3 }
 0x38e   : > { %v1744_v41 = vpop.f32.mrf.mxu2 }
 0x38f   : > { %2695 = vrot.lane.b32.xlu1 %v4443_v8, %s3921_s26 }
 0x390   : > { %2697 = vrot.lane.b32.xlu0 %v4454_v17, %s3921_s26 }
 0x391   : > { %v2308_v31 = vpop.permute.xlu1 %2307 }
 0x392   : > { %v2312_v48 = vpop.permute.xlu0 %2311  ;;  %v2326_v54 = vsel %vm2323_vm0, %v2308_v31, %v4817_v1  ;;  %2687 = vrot.lane.b32.xlu2 %v4407_v51, %s3921_s26 }
 0x393   : > { %2376 = vmatpush.bf16.msrb.mxu2 %v2326_v54  ;;  %v2327_v55 = vsel %vm2323_vm0, %v4817_v1, %v2312_v48 }
 0x394   : > { %2389 = vmatpush.bf16.msrb.mxu3 %v2327_v55  ;;  %v2400_v56 = vpop.permute.xlu2 %2399 }
 0x396   : > { %3650 = vmatmul.msk.bf16.vlgmr.msrb.gmra.mxu2 %vm916_vm2, %v3647_v61 }
 0x397   : > { %2801 = vrot.lane.b32.xlu1 %v4460_v21, %s3922_s24  ;;  %3651 = vmatmul.msk.bf16.vlgmr.msrb.gmra.mxu3 %vm916_vm2, %v3647_v61 }
 0x398   : > { %2685 = vrot.lane.b32.xlu0 %v4411_v52, %s3921_s26 }
 0x399   : > { %v2306_v49 = vpop.permute.xlu1 %2305  ;;  %v1883_v54 = vpop.f32.mrf.mxu1 }
 0x39a   : > { %v2314_v53 = vpop.permute.xlu0 %2313  ;;  %v2325_v59 = vsel %vm2323_vm0, %v2306_v49, %v2308_v31  ;;  %2803 = vrot.lane.b32.xlu2 %v4469_v28, %s3922_s24  ;;  %v2324_v63 = vsel %vm2323_vm0, %v2304_v36, %v2306_v49 }
 0x39b   : > { %v2328_v60 = vsel %vm2323_vm0, %v2314_v53, %v4828_v22  ;;  %2363 = vmatpush.bf16.msrb.mxu1 %v2325_v59 }
 0x39c   : > { %2349 = vmatpush.bf16.msrb.mxu0 %v2328_v60  ;;  %v2398_v62 = vpop.permute.xlu2 %2397 }
 0x39d   : > { %v2417_v26 = vsel %vm2415_vm1, %v2398_v62, %v2400_v56  ;;  %v1896_v31 = vpop.f32.mrf.mxu2 }
 0x39e   : > { %3649 = vmatmul.msk.bf16.vlgmr.msrb.gmra.mxu1 %vm916_vm2, %v3647_v61 }
 0x39f   : > { %2791 = vrot.lane.b32.xlu1 %v4435_v3, %s3922_s24 }
 0x3a0   : > { %2799 = vrot.lane.b32.xlu0 %v4450_v16, %s3922_s24  ;;  %2350 = vmatpush.bf16.msrb.mxu0 %v2324_v63 }
 0x3a1   : > { %v2414_v0 = vpop.permute.xlu1 %2413 }
 0x3a2   : > { %v2412_v1 = vpop.permute.xlu0 %2411  ;;  %2793 = vrot.lane.b32.xlu2 %v4430_v2, %s3922_s24 }
 0x3a3   : > { %v2422_v4 = vsel %vm2415_vm1, %v2410_v9, %v2412_v1  ;;  %v2423_v11 = vsel %vm2415_vm1, %v2412_v1, %v2414_v0  ;;  %3648 = vmatmul.msk.bf16.vlgmr.msrb.gmra.mxu0 %vm916_vm2, %v3647_v61  ;;  %v1885_v0 = vpop.f32.mrf.mxu1 }
 0x3a4   : > { %2467 = vmatpush.bf16.msra.mxu2 %v2422_v4  ;;  %2480 = vmatpush.bf16.msra.mxu3 %v2423_v11  ;;  %v2508_v12 = vpop.permute.xlu2 %2507 }
 0x3a6   : > { %v1909_v48 = vpop.f32.mrf.mxu3 }
 0x3a7   : > { %2797 = vrot.lane.b32.xlu1 %v4454_v17, %s3922_s24 }
 0x3a8   : > { %2789 = vrot.lane.b32.xlu0 %v4420_v57, %s3922_s24 }
 0x3a9   : > { %v2404_v13 = vpop.permute.xlu1 %2403 }
 0x3aa   : > { %v2402_v14 = vpop.permute.xlu0 %2401  ;;  %2795 = vrot.lane.b32.xlu2 %v4443_v8, %s3922_s24 }
 0x3ab   : > { %v2418_v15 = vsel %vm2415_vm1, %v2400_v56, %v2402_v14  ;;  %v2419_v18 = vsel %vm2415_vm1, %v2402_v14, %v2404_v13  ;;  %v1870_v56 = vpop.f32.mrf.mxu0 }
 0x3ac   : > { %2468 = vmatpush.bf16.msra.mxu2 %v2418_v15  ;;  %2481 = vmatpush.bf16.msra.mxu3 %v2419_v18  ;;  %v2498_v58 = vpop.permute.xlu2 %2497  ;;  %v3661_v15 = vld [vmem:[%s5198_s5 + $0x24] sm:$0x3] }
 0x3ae   : > { %v1911_v63 = vpop.f32.mrf.mxu3 }
 0x3af   : > { %2785 = vrot.lane.b32.xlu1 %v4411_v52, %s3922_s24  ;;  %3654 = vmatmul.msk.bf16.vlgmr.msra.gmra.mxu2 %vm916_vm2, %v3646_v20 }
 0x3b0   : > { %2787 = vrot.lane.b32.xlu0 %v4407_v51, %s3922_s24  ;;  %3655 = vmatmul.msk.bf16.vlgmr.msra.gmra.mxu3 %vm916_vm2, %v3646_v20 }
 0x3b1   : > { %v2406_v22 = vpop.permute.xlu1 %2405 }
 0x3b2   : > { %v2408_v23 = vpop.permute.xlu0 %2407  ;;  %2893 = vrot.lane.b32.xlu2 %v4460_v21, %s3923_s12 }
 0x3b3   : > { %v2420_v24 = vsel %vm2415_vm1, %v2406_v22, %v2408_v23  ;;  %v2421_v25 = vsel %vm2415_vm1, %v2408_v23, %v2410_v9  ;;  %v1872_v4 = vpop.f32.mrf.mxu0  ;;  %v1975_v23 = vpop.f32.mrf.mxu1 }
 0x3b4   : > { %2441 = vmatpush.bf16.msra.mxu0 %v2420_v24  ;;  %2454 = vmatpush.bf16.msra.mxu1 %v2421_v25  ;;  %v2500_v6 = vpop.permute.xlu2 %2499 }
 0x3b7   : > { %2891 = vrot.lane.b32.xlu1 %v4450_v16, %s3923_s12 }
 0x3b8   : > { %2895 = vrot.lane.b32.xlu0 %v4469_v28, %s3923_s12  ;;  %2455 = vmatpush.bf16.msra.mxu1 %v2417_v26 }
 0x3b9   : > { %v2506_v27 = vpop.permute.xlu1 %2505 }
 0x3ba   : > { %v2517_v29 = vsel %vm2509_vm3, %v2506_v27, %v2508_v12  ;;  %v2396_v30 = vpop.permute.xlu0 %2395  ;;  %2883 = vrot.lane.b32.xlu2 %v4435_v3, %s3923_s12 }
 0x3bb   : > { %v2416_v32 = vsel %vm2415_vm1, %v2396_v30, %v2398_v62  ;;  %2574 = vmatpush.bf16.msrb.mxu3 %v2517_v29  ;;  %3653 = vmatmul.msk.bf16.vlgmr.msra.gmra.mxu1 %vm916_vm2, %v3646_v20  ;;  %v1898_v62 = vpop.f32.mrf.mxu2  ;;  %v1962_v25 = vpop.f32.mrf.mxu0 }
 0x3bc   : > { %2442 = vmatpush.bf16.msra.mxu0 %v2416_v32  ;;  %v2604_v34 = vpop.permute.xlu2 %2603 }
 0x3bf   : > { %2881 = vrot.lane.b32.xlu1 %v4420_v57, %s3923_s12  ;;  %3652 = vmatmul.msk.bf16.vlgmr.msra.gmra.mxu0 %vm916_vm2, %v3646_v20  ;;  %v2001_v20 = vpop.f32.mrf.mxu3 }
 0x3c0   : > { %2885 = vrot.lane.b32.xlu0 %v4430_v2, %s3923_s12  ;;  %v2002_v22 = vadd.f32 %v2001_v20, %v1909_v48 }
 0x3c1   : > { %v2496_v35 = vpop.permute.xlu1 %2495 }
 0x3c2   : > { %v2504_v36 = vpop.permute.xlu0 %2503  ;;  %v2513_v38 = vsel %vm2509_vm3, %v2496_v35, %v2498_v58  ;;  %2889 = vrot.lane.b32.xlu2 %v4454_v17, %s3923_s12 }
 0x3c3   : > { %v2516_v40 = vsel %vm2509_vm3, %v2504_v36, %v2506_v27  ;;  %2575 = vmatpush.bf16.msrb.mxu3 %v2513_v38  ;;  %v1988_v18 = vpop.f32.mrf.mxu2 }
 0x3c4   : > { %2561 = vmatpush.bf16.msrb.mxu2 %v2516_v40  ;;  %v2594_v7 = vpop.permute.xlu2 %2593  ;;  %v1989_v58 = vadd.f32 %v1988_v18, %v1896_v31 }
 0x3c6   : > { %3660 = vmatmul.msk.bf16.vlgmr.msrb.gmra.mxu3 %vm916_vm2, %v3656_v42 }
 0x3c7   : > { %2879 = vrot.lane.b32.xlu1 %v4407_v51, %s3923_s12 }
 0x3c8   : > { %2887 = vrot.lane.b32.xlu0 %v4443_v8, %s3923_s12 }
 0x3c9   : > { %v2502_v5 = vpop.permute.xlu1 %2501 }
 0x3ca   : > { %v2514_v44 = vsel %vm2509_vm3, %v2500_v6, %v2502_v5  ;;  %v2515_v33 = vsel %vm2509_vm3, %v2502_v5, %v2504_v36  ;;  %v2494_v45 = vpop.permute.xlu0 %2493  ;;  %2877 = vrot.lane.b32.xlu2 %v4411_v52, %s3923_s12  ;;  %v1976_v6 = vadd.f32 %v1975_v23, %v1883_v54  ;;  %v1977_v36 = vpop.f32.mrf.mxu1 }
 0x3cb   : > { %2548 = vmatpush.bf16.msrb.mxu1 %v2515_v33  ;;  %v2512_v46 = vsel %vm2509_vm3, %v2494_v45, %v2496_v35  ;;  %2535 = vmatpush.bf16.msrb.mxu0 %v2514_v44  ;;  %v1990_v32 = vpop.f32.mrf.mxu2  ;;  %v1963_v35 = vadd.f32 %v1962_v25, %v1870_v56 }
 0x3cc   : > { %2562 = vmatpush.bf16.msrb.mxu2 %v2512_v46  ;;  %v2600_v47 = vpop.permute.xlu2 %2599 }
 0x3cf   : > { %2989 = vrot.lane.b32.xlu1 %v4469_v28, %s3924_s21  ;;  %3659 = vmatmul.msk.bf16.vlgmr.msrb.gmra.mxu2 %vm916_vm2, %v3656_v42 }
 0x3d0   : > { %2987 = vrot.lane.b32.xlu0 %v4460_v21, %s3924_s21 }
 0x3d1   : > { %v2490_v50 = vpop.permute.xlu1 %2489 }
 0x3d2   : > { %v2492_v9 = vpop.permute.xlu0 %2491  ;;  %2985 = vrot.lane.b32.xlu2 %v4450_v16, %s3924_s21 }
 0x3d3   : > { %v2510_v10 = vsel %vm2509_vm3, %v2490_v50, %v2492_v9  ;;  %v2511_v41 = vsel %vm2509_vm3, %v2492_v9, %v2494_v45  ;;  %v2069_v9 = vpop.f32.mrf.mxu1 }
 0x3d4   : > { %2536 = vmatpush.bf16.msrb.mxu0 %v2510_v10  ;;  %2549 = vmatpush.bf16.msrb.mxu1 %v2511_v41  ;;  %v2588_v55 = vpop.permute.xlu2 %2587  ;;  %v2100_v31 = vadd.f32 %v2069_v9, %v1976_v6 }
 0x3d6   : > { %v2082_v45 = vpop.f32.mrf.mxu2 }
 0x3d7   : > { %2979 = vrot.lane.b32.xlu1 %v4430_v2, %s3924_s21  ;;  %3658 = vmatmul.msk.bf16.vlgmr.msrb.gmra.mxu1 %vm916_vm2, %v3656_v42 }
 0x3d8   : > { %2977 = vrot.lane.b32.xlu0 %v4435_v3, %s3924_s21  ;;  %3657 = vmatmul.msk.bf16.vlgmr.msrb.gmra.mxu0 %vm916_vm2, %v3656_v42  ;;  %v1964_v42 = vpop.f32.mrf.mxu0 }
 0x3d9   : > { %v2602_v49 = vpop.permute.xlu1 %2601 }
 0x3da   : > { %v2614_v53 = vsel %vm2607_vm4, %v2602_v49, %v2604_v34  ;;  %v2606_v59 = vpop.permute.xlu0 %2605  ;;  %v2613_v60 = vsel %vm2607_vm4, %v2600_v47, %v2602_v49  ;;  %2975 = vrot.lane.b32.xlu2 %v4420_v57, %s3924_s21 }
 0x3db   : > { %v2615_v61 = vsel %vm2607_vm4, %v2604_v34, %v2606_v59  ;;  %2659 = vmatpush.bf16.msra.mxu2 %v2614_v53  ;;  %2646 = vmatpush.bf16.msra.mxu1 %v2613_v60  ;;  %v2003_v34 = vpop.f32.mrf.mxu3  ;;  %v3666_v60 = vld [vmem:[%s5198_s5 + $0x26] sm:$0x3] }
 0x3dc   : > { %2672 = vmatpush.bf16.msra.mxu3 %v2615_v61  ;;  %v4979_v1 = vpop.permute.xlu2 %2699  ;;  %v2071_v61 = vpop.f32.mrf.mxu1 }
 0x3de   : > { %v2084_v53 = vpop.f32.mrf.mxu2 }
 0x3df   : > { %2981 = vrot.lane.b32.xlu1 %v4443_v8, %s3924_s21 }
 0x3e0   : > { %2983 = vrot.lane.b32.xlu0 %v4454_v17, %s3924_s21  ;;  %v2056_v41 = vpop.f32.mrf.mxu0 }
 0x3e1   : > { %v2592_v11 = vpop.permute.xlu1 %2591 }
 0x3e2   : > { %v2596_v12 = vpop.permute.xlu0 %2595  ;;  %v2610_v13 = vsel %vm2607_vm4, %v2592_v11, %v2594_v7  ;;  %2973 = vrot.lane.b32.xlu2 %v4407_v51, %s3924_s21 }
 0x3e3   : > { %2660 = vmatpush.bf16.msra.mxu2 %v2610_v13  ;;  %v2611_v14 = vsel %vm2607_vm4, %v2594_v7, %v2596_v12  ;;  %v2095_v46 = vpop.f32.mrf.mxu3 }
 0x3e4   : > { %2673 = vmatpush.bf16.msra.mxu3 %v2611_v14  ;;  %v4994_v24 = vpop.permute.xlu2 %2689  ;;  %v2102_v50 = vadd.f32 %v2095_v46, %v2002_v22 }
 0x3e6   : > { %3664 = vmatmul.msk.bf16.vlgmr.msra.gmra.mxu2 %vm916_vm2, %v3661_v15 }
 0x3e7   : > { %3085 = vrot.lane.b32.xlu1 %v4460_v21, %s3925_s10  ;;  %3665 = vmatmul.msk.bf16.vlgmr.msra.gmra.mxu3 %vm916_vm2, %v3661_v15 }
 0x3e8   : > { %2971 = vrot.lane.b32.xlu0 %v4411_v52, %s3924_s21  ;;  %v2058_v63 = vpop.f32.mrf.mxu0 }
 0x3e9   : > { %v2590_v26 = vpop.permute.xlu1 %2589 }
 0x3ea   : > { %v2598_v27 = vpop.permute.xlu0 %2597  ;;  %v2609_v29 = vsel %vm2607_vm4, %v2590_v26, %v2592_v11  ;;  %3087 = vrot.lane.b32.xlu2 %v4469_v28, %s3925_s10  ;;  %v2608_v38 = vsel %vm2607_vm4, %v2588_v55, %v2590_v26  ;;  %v2099_v55 = vadd.f32 %v2056_v41, %v1963_v35  ;;  %v2180_v13 = vpop.f32.mrf.mxu2 }
 0x3eb   : > { %v2612_v30 = vsel %vm2607_vm4, %v2598_v27, %v2600_v47  ;;  %2647 = vmatpush.bf16.msra.mxu1 %v2609_v29  ;;  %v2101_v47 = vadd.f32 %v2082_v45, %v1989_v58  ;;  %v2097_v59 = vpop.f32.mrf.mxu3 }
 0x3ec   : > { %2633 = vmatpush.bf16.msra.mxu0 %v2612_v30  ;;  %v5006_v40 = vpop.permute.xlu2 %2687  ;;  %v2167_v20 = vpop.f32.mrf.mxu1 }
 0x3ed   : > { %v2198_v58 = vadd.f32 %v2167_v20, %v2100_v31 }
 0x3ee   : > { %3663 = vmatmul.msk.bf16.vlgmr.msra.gmra.mxu1 %vm916_vm2, %v3661_v15 }
 0x3ef   : > { %3075 = vrot.lane.b32.xlu1 %v4435_v3, %s3925_s10 }
 0x3f0   : > { %3083 = vrot.lane.b32.xlu0 %v4450_v16, %s3925_s10  ;;  %2634 = vmatpush.bf16.msra.mxu0 %v2608_v38  ;;  %v2154_v23 = vpop.f32.mrf.mxu0 }
 0x3f1   : > { %v2704_v7 = vpop.permute.xlu1 %2703  ;;  %v2197_v30 = vadd.f32 %v2154_v23, %v2099_v55 }
 0x3f2   : > { %v2702_v5 = vpop.permute.xlu0 %2701  ;;  %3077 = vrot.lane.b32.xlu2 %v4430_v2, %s3925_s10  ;;  %v2182_v27 = vpop.f32.mrf.mxu2 }
 0x3f3   : > { %v2712_v44 = vsel %vm2705_vm5, %v4979_v1, %v2702_v5  ;;  %v2713_v33 = vsel %vm2705_vm5, %v2702_v5, %v2704_v7  ;;  %3662 = vmatmul.msk.bf16.vlgmr.msra.gmra.mxu0 %vm916_vm2, %v3661_v15  ;;  %v2193_v14 = vpop.f32.mrf.mxu3  ;;  %v2199_v15 = vadd.f32 %v2180_v13, %v2101_v47 }
 0x3f4   : > { %2757 = vmatpush.bf16.msrb.mxu2 %v2712_v44  ;;  %2770 = vmatpush.bf16.msrb.mxu3 %v2713_v33  ;;  %v2804_v10 = vpop.permute.xlu2 %2803  ;;  %v2200_v18 = vadd.f32 %v2193_v14, %v2102_v50 }
 0x3f7   : > { %3081 = vrot.lane.b32.xlu1 %v4454_v17, %s3925_s10 }
 0x3f8   : > { %3073 = vrot.lane.b32.xlu0 %v4420_v57, %s3925_s10 }
 0x3f9   : > { %v2694_v48 = vpop.permute.xlu1 %2693 }
 0x3fa   : > { %v2692_v54 = vpop.permute.xlu0 %2691  ;;  %3079 = vrot.lane.b32.xlu2 %v4443_v8, %s3925_s10 }
 0x3fb   : > { %v2708_v56 = vsel %vm2705_vm5, %v4994_v24, %v2692_v54  ;;  %v2709_v49 = vsel %vm2705_vm5, %v2692_v54, %v2694_v48  ;;  %v2195_v29 = vpop.f32.mrf.mxu3 }
 0x3fc   : > { %2758 = vmatpush.bf16.msrb.mxu2 %v2708_v56  ;;  %2771 = vmatpush.bf16.msrb.mxu3 %v2709_v49  ;;  %v2794_v62 = vpop.permute.xlu2 %2793 }
 0x3ff   : > { %3669 = vmatmul.msk.bf16.vlgmr.msrb.gmra.mxu2 %vm916_vm2, %v3666_v60  ;;  %3670 = vmatmul.msk.bf16.vlgmr.msrb.gmra.mxu3 %vm916_vm2, %v3666_v60 }
 0x400   : > { %3069 = vrot.lane.b32.xlu1 %v4411_v52, %s3925_s10  ;;  %3071 = vrot.lane.b32.xlu0 %v4407_v51, %s3925_s10 }
 0x401   : > { %v2696_v0 = vpop.permute.xlu1 %2695 }
 0x402   : > { %v2698_v4 = vpop.permute.xlu0 %2697  ;;  %3183 = vrot.lane.b32.xlu2 %v4460_v21, %s3926_s13  ;;  %v2278_v38 = vpop.f32.mrf.mxu2 }
 0x403   : > { %v2710_v11 = vsel %vm2705_vm5, %v2696_v0, %v2698_v4  ;;  %v2711_v12 = vsel %vm2705_vm5, %v2698_v4, %v4979_v1  ;;  %v2707_v1 = vsel %vm2705_vm5, %v5006_v40, %v4994_v24  ;;  %v2156_v24 = vpop.f32.mrf.mxu0  ;;  %v5062_v42 = vadd.f32 %v2278_v38, %v2199_v15 }
 0x404   : > { %2731 = vmatpush.bf16.msrb.mxu0 %v2710_v11  ;;  %2744 = vmatpush.bf16.msrb.mxu1 %v2711_v12  ;;  %v2796_v22 = vpop.permute.xlu2 %2795 }
 0x408   : > { %3181 = vrot.lane.b32.xlu1 %v4450_v16, %s3926_s13  ;;  %3185 = vrot.lane.b32.xlu0 %v4469_v28, %s3926_s13  ;;  %v2169_v16 = vpop.f32.mrf.mxu1 }
 0x409   : > { %2745 = vmatpush.bf16.msrb.mxu1 %v2707_v1  ;;  %v2802_v25 = vpop.permute.xlu1 %2801 }
 0x40a   : > { %v2813_v6 = vsel %vm2805_vm6, %v2802_v25, %v2804_v10  ;;  %v2686_v21 = vpop.permute.xlu0 %2685  ;;  %3173 = vrot.lane.b32.xlu2 %v4435_v3, %s3926_s13  ;;  %v2291_v3 = vpop.f32.mrf.mxu3 }
 0x40b   : > { %v2706_v26 = vsel %vm2705_vm5, %v2686_v21, %v5006_v40  ;;  %2870 = vmatpush.bf16.msra.mxu3 %v2813_v6  ;;  %v3672_v40 = vld [vmem:[%s5198_s5 + $0x2a] sm:$0x3]  ;;  %v2252_v44 = vpop.f32.mrf.mxu0  ;;  %v2280_v9 = vpop.f32.mrf.mxu2 }
 0x40c   : > { %3668 = vmatmul.msk.bf16.vlgmr.msrb.gmra.mxu1 %vm916_vm2, %v3666_v60  ;;  %2732 = vmatpush.bf16.msrb.mxu0 %v2706_v26  ;;  %v2894_v28 = vpop.permute.xlu2 %2893  ;;  %v5075_v33 = vadd.f32 %v2252_v44, %v2197_v30 }
 0x40f   : > { %3667 = vmatmul.msk.bf16.vlgmr.msrb.gmra.mxu0 %vm916_vm2, %v3666_v60 }
 0x410   : > { %3171 = vrot.lane.b32.xlu1 %v4420_v57, %s3926_s13  ;;  %3175 = vrot.lane.b32.xlu0 %v4430_v2, %s3926_s13  ;;  %v5064_v57 = vadd.f32 %v2291_v3, %v2200_v18  ;;  %v2265_v2 = vpop.f32.mrf.mxu1 }
 0x411   : > { %v2792_v32 = vpop.permute.xlu1 %2791  ;;  %v5069_v7 = vadd.f32 %v2265_v2, %v2198_v58 }
 0x412   : > { %v2800_v34 = vpop.permute.xlu0 %2799  ;;  %v2809_v35 = vsel %vm2805_vm6, %v2792_v32, %v2794_v62  ;;  %3179 = vrot.lane.b32.xlu2 %v4454_v17, %s3926_s13  ;;  %v2293_v10 = vpop.f32.mrf.mxu3 }
 0x413   : > { %v2812_v36 = vsel %vm2805_vm6, %v2800_v34, %v2802_v25  ;;  %2871 = vmatpush.bf16.msra.mxu3 %v2809_v35  ;;  %v2254_v41 = vpop.f32.mrf.mxu0 }
 0x414   : > { %2857 = vmatpush.bf16.msra.mxu2 %v2812_v36  ;;  %v2884_v5 = vpop.permute.xlu2 %2883 }
 0x416   : > { %3676 = vmatmul.msk.bf16.vlgmr.msra.gmra.mxu3 %vm916_vm2, %v3672_v40 }
 0x418   : > { %3169 = vrot.lane.b32.xlu1 %v4407_v51, %s3926_s13  ;;  %3177 = vrot.lane.b32.xlu0 %v4443_v8, %s3926_s13  ;;  %v2267_v51 = vpop.f32.mrf.mxu1 }
 0x419   : > { %v2798_v45 = vpop.permute.xlu1 %2797  ;;  %v2378_v56 = vpop.f32.mrf.mxu2 }
 0x41a   : > { %v2810_v46 = vsel %vm2805_vm6, %v2796_v22, %v2798_v45  ;;  %v2811_v17 = vsel %vm2805_vm6, %v2798_v45, %v2800_v34  ;;  %v2790_v47 = vpop.permute.xlu0 %2789  ;;  %3167 = vrot.lane.b32.xlu2 %v4411_v52, %s3926_s13  ;;  %v2391_v49 = vpop.f32.mrf.mxu3  ;;  %v3671_v22 = vld [vmem:[%s5198_s5 + $0x28] sm:$0x3] }
 0x41b   : > { %2844 = vmatpush.bf16.msra.mxu1 %v2811_v17  ;;  %v2808_v50 = vsel %vm2805_vm6, %v2790_v47, %v2792_v32  ;;  %2831 = vmatpush.bf16.msra.mxu0 %v2810_v46 }
 0x41c   : > { %2858 = vmatpush.bf16.msra.mxu2 %v2808_v50  ;;  %v2890_v8 = vpop.permute.xlu2 %2889 }
 0x41f   : > { %3675 = vmatmul.msk.bf16.vlgmr.msra.gmra.mxu2 %vm916_vm2, %v3672_v40 }
 0x420   : > { %v2365_v53 = vpop.f32.mrf.mxu1  ;;  %v2352_v63 = vpop.f32.mrf.mxu0 }
 0x421   : > { %v2786_v31 = vpop.permute.xlu1 %2785  ;;  %v2380_v4 = vpop.f32.mrf.mxu2 }
 0x422   : > { %v2788_v48 = vpop.permute.xlu0 %2787  ;;  %v2393_v11 = vpop.f32.mrf.mxu3 }
 0x423   : > { %v2806_v54 = vsel %vm2805_vm6, %v2786_v31, %v2788_v48  ;;  %v2807_v55 = vsel %vm2805_vm6, %v2788_v48, %v2790_v47 }
 0x424   : > { %2832 = vmatpush.bf16.msra.mxu0 %v2806_v54  ;;  %2845 = vmatpush.bf16.msra.mxu1 %v2807_v55  ;;  %v2878_v59 = vpop.permute.xlu2 %2877 }
 0x427   : > { %3674 = vmatmul.msk.bf16.vlgmr.msra.gmra.mxu1 %vm916_vm2, %v3672_v40  ;;  %3673 = vmatmul.msk.bf16.vlgmr.msra.gmra.mxu0 %vm916_vm2, %v3672_v40 }
 0x428   : > { %v2367_v12 = vpop.f32.mrf.mxu1  ;;  %v2354_v20 = vpop.f32.mrf.mxu0 }
 0x429   : > { %v2892_v52 = vpop.permute.xlu1 %2891 }
 0x42a   : > { %v2904_v60 = vsel %vm916_vm2, %v2892_v52, %v2894_v28  ;;  %v2896_v61 = vpop.permute.xlu0 %2895  ;;  %v2903_v62 = vsel %vm916_vm2, %v2890_v8, %v2892_v52 }
 0x42b   : > { %v2905_v0 = vsel %vm916_vm2, %v2894_v28, %v2896_v61  ;;  %2949 = vmatpush.bf16.msrb.mxu2 %v2904_v60  ;;  %2936 = vmatpush.bf16.msrb.mxu1 %v2903_v62 }
 0x42c   : > { %2962 = vmatpush.bf16.msrb.mxu3 %v2905_v0  ;;  %v2986_v13 = vpop.permute.xlu2 %2985 }
 0x431   : > { %v2882_v14 = vpop.permute.xlu1 %2881 }
 0x432   : > { %v2886_v15 = vpop.permute.xlu0 %2885  ;;  %v2900_v18 = vsel %vm916_vm2, %v2882_v14, %v2884_v5  ;;  %v2470_v23 = vpop.f32.mrf.mxu2 }
 0x433   : > { %2950 = vmatpush.bf16.msrb.mxu2 %v2900_v18  ;;  %v2901_v58 = vsel %vm916_vm2, %v2884_v5, %v2886_v15  ;;  %v2483_v1 = vpop.f32.mrf.mxu3  ;;  %v2471_v25 = vadd.f32 %v2470_v23, %v2378_v56  ;;  %v3686_v23 = vld [vmem:[%s5198_s5 + $0x2e] sm:$0x3] }
 0x434   : > { %2963 = vmatpush.bf16.msrb.mxu3 %v2901_v58  ;;  %v2484_v6 = vadd.f32 %v2483_v1, %v2391_v49  ;;  %v2976_v21 = vpop.permute.xlu2 %2975 }
 0x436   : > { %3679 = vmatmul.msk.bf16.vlgmr.msrb.gmra.mxu2 %vm916_vm2, %v3671_v22 }
 0x437   : > { %3680 = vmatmul.msk.bf16.vlgmr.msrb.gmra.mxu3 %vm916_vm2, %v3671_v22 }
 0x438   : > { %v2457_v26 = vpop.f32.mrf.mxu1 }
 0x439   : > { %v2880_v27 = vpop.permute.xlu1 %2879  ;;  %v2458_v29 = vadd.f32 %v2457_v26, %v2365_v53 }
 0x43a   : > { %v2888_v30 = vpop.permute.xlu0 %2887  ;;  %v2899_v16 = vsel %vm916_vm2, %v2880_v27, %v2882_v14  ;;  %v2472_v24 = vpop.f32.mrf.mxu2  ;;  %v2898_v36 = vsel %vm916_vm2, %v2878_v59, %v2880_v27 }
 0x43b   : > { %v2902_v28 = vsel %vm916_vm2, %v2888_v30, %v2890_v8  ;;  %2937 = vmatpush.bf16.msrb.mxu1 %v2899_v16  ;;  %v2485_v32 = vpop.f32.mrf.mxu3  ;;  %v3681_v8 = vld [vmem:[%s5198_s5 + $0x2c] sm:$0x3] }
 0x43c   : > { %2923 = vmatpush.bf16.msrb.mxu0 %v2902_v28  ;;  %v2444_v34 = vpop.f32.mrf.mxu0  ;;  %v2974_v38 = vpop.permute.xlu2 %2973 }
 0x43d   : > { %v2445_v35 = vadd.f32 %v2444_v34, %v2352_v63  ;;  %v2993_v62 = vsel %vm2991_vm7, %v2974_v38, %v2976_v21 }
 0x43e   : > { %3678 = vmatmul.msk.bf16.vlgmr.msrb.gmra.mxu1 %vm916_vm2, %v3671_v22 }
 0x440   : > { %2924 = vmatpush.bf16.msrb.mxu0 %v2898_v36  ;;  %v2459_v3 = vpop.f32.mrf.mxu1 }
 0x441   : > { %v2990_v40 = vpop.permute.xlu1 %2989 }
 0x442   : > { %v2988_v2 = vpop.permute.xlu0 %2987 }
 0x443   : > { %v2998_v5 = vsel %vm2991_vm7, %v2986_v13, %v2988_v2  ;;  %v2999_v44 = vsel %vm2991_vm7, %v2988_v2, %v2990_v40  ;;  %3677 = vmatmul.msk.bf16.vlgmr.msrb.gmra.mxu0 %vm916_vm2, %v3671_v22 }
 0x444   : > { %3043 = vmatpush.bf16.msra.mxu2 %v2998_v5  ;;  %3056 = vmatpush.bf16.msra.mxu3 %v2999_v44  ;;  %v2446_v45 = vpop.f32.mrf.mxu0  ;;  %v3088_v46 = vpop.permute.xlu2 %3087 }
 0x449   : > { %v2980_v17 = vpop.permute.xlu1 %2979  ;;  %v2577_v47 = vpop.f32.mrf.mxu3 }
 0x44a   : > { %v2978_v50 = vpop.permute.xlu0 %2977  ;;  %v2584_v9 = vadd.f32 %v2577_v47, %v2484_v6 }
 0x44b   : > { %v2994_v10 = vsel %vm2991_vm7, %v2976_v21, %v2978_v50  ;;  %v2995_v51 = vsel %vm2991_vm7, %v2978_v50, %v2980_v17  ;;  %v3927_v17 = vmov 0  }
 0x44c   : > { %3044 = vmatpush.bf16.msra.mxu2 %v2994_v10  ;;  %3057 = vmatpush.bf16.msra.mxu3 %v2995_v51  ;;  %v3078_v41 = vpop.permute.xlu2 %3077 }
 0x44d   : > { %3845 = vset.pattern.permute.xlu0 %v3927_v17 }
 0x44f   : > { %3685 = vmatmul.msk.bf16.vlgmr.msra.gmra.mxu3 %vm916_vm2, %v3681_v8  ;;  %3684 = vmatmul.msk.bf16.vlgmr.msra.gmra.mxu2 %vm916_vm2, %v3681_v8 }
 0x451   : > { %v2982_v31 = vpop.permute.xlu1 %2981  ;;  %v2579_v48 = vpop.f32.mrf.mxu3 }
 0x452   : > { %v2984_v54 = vpop.permute.xlu0 %2983  ;;  %v2564_v55 = vpop.f32.mrf.mxu2 }
 0x453   : > { %v2996_v56 = vsel %vm2991_vm7, %v2982_v31, %v2984_v54  ;;  %v2997_v49 = vsel %vm2991_vm7, %v2984_v54, %v2986_v13  ;;  %v2583_v53 = vadd.f32 %v2564_v55, %v2471_v25 }
 0x454   : > { %3017 = vmatpush.bf16.msra.mxu0 %v2996_v56  ;;  %3030 = vmatpush.bf16.msra.mxu1 %v2997_v49  ;;  %v2551_v59 = vpop.f32.mrf.mxu1  ;;  %v3080_v0 = vpop.permute.xlu2 %3079 }
 0x455   : > { %v2582_v52 = vadd.f32 %v2551_v59, %v2458_v29  ;;  %v2538_v60 = vpop.f32.mrf.mxu0 }
 0x456   : > { %v2581_v61 = vadd.f32 %v2538_v60, %v2445_v35 }
 0x458   : > { %3031 = vmatpush.bf16.msra.mxu1 %v2993_v62 }
 0x459   : > { %v3086_v63 = vpop.permute.xlu1 %3085 }
 0x45a   : > { %v3097_v4 = vsel %vm3089_vm8, %v3086_v63, %v3088_v46  ;;  %v2972_v11 = vpop.permute.xlu0 %2971  ;;  %v2566_v12 = vpop.f32.mrf.mxu2  ;;  %v3279_v46 = vld [vmem:[%s5199_s6] sm:$0x7] }
 0x45b   : > { %v2992_v14 = vsel %vm2991_vm7, %v2972_v11, %v2974_v38  ;;  %3683 = vmatmul.msk.bf16.vlgmr.msra.gmra.mxu1 %vm916_vm2, %v3681_v8  ;;  %3154 = vmatpush.bf16.msrb.mxu3 %v3097_v4 }
 0x45c   : > { %3018 = vmatpush.bf16.msra.mxu0 %v2992_v14  ;;  %v2553_v13 = vpop.f32.mrf.mxu1  ;;  %v3184_v1 = vpop.permute.xlu2 %3183  ;;  %3282 = vperm.xlu0 %3845, %v3279_v46  }
 0x45d   : > { %v2540_v15 = vpop.f32.mrf.mxu0 }
 0x45f   : > { %3682 = vmatmul.msk.bf16.vlgmr.msra.gmra.mxu0 %vm916_vm2, %v3681_v8 }
 0x461   : > { %v3076_v18 = vpop.permute.xlu1 %3075 }
 0x462   : > { %v3084_v20 = vpop.permute.xlu0 %3083  ;;  %v3093_v58 = vsel %vm3089_vm8, %v3076_v18, %v3078_v41 }
 0x463   : > { %v3096_v22 = vsel %vm3089_vm8, %v3084_v20, %v3086_v63  ;;  %3155 = vmatpush.bf16.msrb.mxu3 %v3093_v58 }
 0x464   : > { %3141 = vmatpush.bf16.msrb.mxu2 %v3096_v22  ;;  %v3174_v34 = vpop.permute.xlu2 %3173 }
 0x466   : > { %3690 = vmatmul.msk.bf16.vlgmr.msrb.gmra.mxu3 %vm916_vm2, %v3686_v23 }
 0x469   : > { %v3082_v25 = vpop.permute.xlu1 %3081  ;;  %v2662_v6 = vpop.f32.mrf.mxu2 }
 0x46a   : > { %v3094_v21 = vsel %vm3089_vm8, %v3080_v0, %v3082_v25  ;;  %v3095_v26 = vsel %vm3089_vm8, %v3082_v25, %v3084_v20  ;;  %v3074_v27 = vpop.permute.xlu0 %3073  ;;  %v2681_v29 = vadd.f32 %v2662_v6, %v2583_v53  ;;  %v2675_v30 = vpop.f32.mrf.mxu3 }
 0x46b   : > { %3128 = vmatpush.bf16.msrb.mxu1 %v3095_v26  ;;  %v3092_v16 = vsel %vm3089_vm8, %v3074_v27, %v3076_v18  ;;  %3115 = vmatpush.bf16.msrb.mxu0 %v3094_v21  ;;  %v2682_v28 = vadd.f32 %v2675_v30, %v2584_v9  ;;  %v2649_v24 = vpop.f32.mrf.mxu1 }
 0x46c   : > { %3142 = vmatpush.bf16.msrb.mxu2 %v3092_v16  ;;  %v2680_v32 = vadd.f32 %v2649_v24, %v2582_v52  ;;  %v3180_v47 = vpop.permute.xlu2 %3179  ;;  %v3691_v52 = vld [vmem:[%s5198_s5 + $0x30] sm:$0x3] }
 0x46f   : > { %3689 = vmatmul.msk.bf16.vlgmr.msrb.gmra.mxu2 %vm916_vm2, %v3686_v23 }
 0x470   : > { %v2636_v35 = vpop.f32.mrf.mxu0 }
 0x471   : > { %v2664_v36 = vpop.f32.mrf.mxu2  ;;  %v2679_v38 = vadd.f32 %v2636_v35, %v2581_v61 }
 0x472   : > { %v3070_v3 = vpop.permute.xlu1 %3069  ;;  %v3072_v40 = vpop.permute.xlu0 %3071 }
 0x473   : > { %v3090_v2 = vsel %vm3089_vm8, %v3070_v3, %v3072_v40  ;;  %v3091_v5 = vsel %vm3089_vm8, %v3072_v40, %v3074_v27  ;;  %v2677_v44 = vpop.f32.mrf.mxu3  ;;  %v2651_v45 = vpop.f32.mrf.mxu1 }
 0x474   : > { %3116 = vmatpush.bf16.msrb.mxu0 %v3090_v2  ;;  %3129 = vmatpush.bf16.msrb.mxu1 %v3091_v5 }
 0x477   : > { %3687 = vmatmul.msk.bf16.vlgmr.msrb.gmra.mxu0 %vm916_vm2, %v3686_v23  ;;  %3688 = vmatmul.msk.bf16.vlgmr.msrb.gmra.mxu1 %vm916_vm2, %v3686_v23 }
 0x478   : > { %v2638_v50 = vpop.f32.mrf.mxu0 }
 0x47a   : > { %v3182_v9 = vpop.permute.xlu1 %3181  ;;  %v3186_v10 = vpop.permute.xlu0 %3185 }
 0x47b   : > { %v3194_v51 = vsel %vm3187_vm9, %v3182_v9, %v3184_v1  ;;  %v3195_v8 = vsel %vm3187_vm9, %v3184_v1, %v3186_v10  ;;  %v3193_v41 = vsel %vm3187_vm9, %v3180_v47, %v3182_v9 }
 0x47c   : > { %3239 = vmatpush.bf16.msra.mxu2 %v3194_v51  ;;  %3252 = vmatpush.bf16.msra.mxu3 %v3195_v8 }
 0x47d   : > { %3226 = vmatpush.bf16.msra.mxu1 %v3193_v41 }
 0x482   : > { %v3172_v31 = vpop.permute.xlu1 %3171  ;;  %v3176_v48 = vpop.permute.xlu0 %3175 }
 0x483   : > { %v2760_v54 = vpop.f32.mrf.mxu2  ;;  %v2773_v55 = vpop.f32.mrf.mxu3  ;;  %v3190_v56 = vsel %vm3187_vm9, %v3172_v31, %v3174_v34  ;;  %v3191_v49 = vsel %vm3187_vm9, %v3174_v34, %v3176_v48 }
 0x484   : > { %v2779_v53 = vadd.f32 %v2760_v54, %v2681_v29  ;;  %v2780_v59 = vadd.f32 %v2773_v55, %v2682_v28  ;;  %3240 = vmatpush.bf16.msra.mxu2 %v3190_v56  ;;  %3253 = vmatpush.bf16.msra.mxu3 %v3191_v49 }
 0x486   : > { %v3269_v60 = vadd.f32 %v2779_v53, %v5062_v42  ;;  %v3270_v61 = vadd.f32 %v2780_v59, %v5064_v57 }
 0x487   : > { %3694 = vmatmul.msk.bf16.vlgmr.msra.gmra.mxu2 %vm916_vm2, %v3691_v52  ;;  %3695 = vmatmul.msk.bf16.vlgmr.msra.gmra.mxu3 %vm916_vm2, %v3691_v52 }
 0x488   : > { %v5148_v62 = vadd.f32 %v3269_v60, %v4859_v43  ;;  %v5151_v63 = vadd.f32 %v3270_v61, %v4855_v19  ;;  %v3168_v43 = vpop.permute.xlu2 %3167 }
 0x489   : > { %v2747_v0 = vpop.f32.mrf.mxu1 }
 0x48a   : > { %v2778_v4 = vadd.f32 %v2747_v0, %v2680_v32  ;;  %v3170_v11 = vpop.permute.xlu1 %3169  ;;  %v3178_v12 = vpop.permute.xlu0 %3177 }
 0x48b   : > { %v3192_v14 = vsel %vm3187_vm9, %v3178_v12, %v3180_v47  ;;  %v3189_v42 = vsel %vm3187_vm9, %v3170_v11, %v3172_v31  ;;  %v2775_v13 = vpop.f32.mrf.mxu3  ;;  %v2762_v57 = vpop.f32.mrf.mxu2  ;;  %v3188_v22 = vsel %vm3187_vm9, %v3168_v43, %v3170_v11 }
 0x48c   : > { %v3268_v15 = vadd.f32 %v2778_v4, %v5069_v7  ;;  %v2734_v18 = vpop.f32.mrf.mxu0  ;;  %3213 = vmatpush.bf16.msra.mxu0 %v3192_v14  ;;  %3227 = vmatpush.bf16.msra.mxu1 %v3189_v42 }
 0x48d   : > { %v2777_v20 = vadd.f32 %v2734_v18, %v2679_v38 }
 0x48e   : > { %v5157_v19 = vadd.f32 %v3268_v15, %v4840_v37 }
 0x48f   : > { %v3267_v58 = vadd.f32 %v2777_v20, %v5075_v33  ;;  %3693 = vmatmul.msk.bf16.vlgmr.msra.gmra.mxu1 %vm916_vm2, %v3691_v52 }
 0x490   : > { %3214 = vmatpush.bf16.msra.mxu0 %v3188_v22 }
 0x491   : > { %v2749_v23 = vpop.f32.mrf.mxu1  ;;  %v5163_v1 = vadd.f32 %v3267_v58, %v4845_v39 }
 0x493   : > { %3692 = vmatmul.msk.bf16.vlgmr.msra.gmra.mxu0 %vm916_vm2, %v3691_v52  ;;  %vm3301_vm2 = vcmask 1042432  }
 0x494   : > { %v2736_v7 = vpop.f32.mrf.mxu0  ;;  %vm3303_vm12 = vmor %vm3302_vm10, %vm3301_vm2 }
 0x499   : > { %v2873_v25 = vpop.f32.mrf.mxu3 }
 0x4a1   : > { %v2875_v6 = vpop.f32.mrf.mxu3 }
 0x4a2   : > { %v2860_v21 = vpop.f32.mrf.mxu2 }
 0x4a4   : > { %v2847_v26 = vpop.f32.mrf.mxu1  ;;  %v2834_v37 = vpop.f32.mrf.mxu0 }
 0x4aa   : > { %v2862_v27 = vpop.f32.mrf.mxu2 }
 0x4ac   : > { %v2849_v29 = vpop.f32.mrf.mxu1  ;;  %v2836_v33 = vpop.f32.mrf.mxu0 }
 0x4b9   : > { %v2952_v30 = vpop.f32.mrf.mxu2 }
 0x4ba   : > { %v2965_v16 = vpop.f32.mrf.mxu3  ;;  %v2953_v28 = vadd.f32 %v2952_v30, %v2860_v21 }
 0x4bb   : > { %v2939_v24 = vpop.f32.mrf.mxu1  ;;  %v2966_v32 = vadd.f32 %v2965_v16, %v2873_v25 }
 0x4bc   : > { %v2940_v34 = vadd.f32 %v2939_v24, %v2847_v26 }
 0x4c0   : > { %v2926_v35 = vpop.f32.mrf.mxu0 }
 0x4c1   : > { %v2927_v39 = vadd.f32 %v2926_v35, %v2834_v37  ;;  %v2954_v36 = vpop.f32.mrf.mxu2 }
 0x4c2   : > { %v2967_v38 = vpop.f32.mrf.mxu3 }
 0x4c3   : > { %v2941_v3 = vpop.f32.mrf.mxu1 }
 0x4c8   : > { %v2928_v40 = vpop.f32.mrf.mxu0 }
 0x4ce   : > { %v3283_v12 = vpop.permute.xlu0 %3282 }
 0x4d2   : > { %v3059_v2 = vpop.f32.mrf.mxu3  ;;  %v3046_v5 = vpop.f32.mrf.mxu2 }
 0x4d3   : > { %v3066_v55 = vadd.f32 %v3059_v2, %v2966_v32  ;;  %v3065_v56 = vadd.f32 %v3046_v5, %v2953_v28 }
 0x4d8   : > { %v3033_v44 = vpop.f32.mrf.mxu1 }
 0x4d9   : > { %v3064_v49 = vadd.f32 %v3033_v44, %v2940_v34 }
 0x4da   : > { %v3061_v45 = vpop.f32.mrf.mxu3  ;;  %v3048_v46 = vpop.f32.mrf.mxu2 }
 0x4dc   : > { %v3020_v17 = vpop.f32.mrf.mxu0 }
 0x4dd   : > { %v3063_v14 = vadd.f32 %v3020_v17, %v2927_v39 }
 0x4e0   : > { %v3035_v47 = vpop.f32.mrf.mxu1 }
 0x4e4   : > { %v3022_v50 = vpop.f32.mrf.mxu0 }
 0x4e9   : > { %v3157_v9 = vpop.f32.mrf.mxu3 }
 0x4ea   : > { %v3164_v53 = vadd.f32 %v3157_v9, %v3066_v55 }
 0x4f1   : > { %v3159_v10 = vpop.f32.mrf.mxu3 }
 0x4f2   : > { %v3144_v51 = vpop.f32.mrf.mxu2 }
 0x4f3   : > { %v3163_v59 = vadd.f32 %v3144_v51, %v3065_v56 }
 0x4f4   : > { %v3118_v8 = vpop.f32.mrf.mxu0  ;;  %v3131_v41 = vpop.f32.mrf.mxu1 }
 0x4f5   : > { %v3162_v61 = vadd.f32 %v3131_v41, %v3064_v49  ;;  %v3161_v15 = vadd.f32 %v3118_v8, %v3063_v14 }
 0x4fa   : > { %v3146_v31 = vpop.f32.mrf.mxu2 }
 0x4fc   : > { %v3133_v48 = vpop.f32.mrf.mxu1  ;;  %v3120_v54 = vpop.f32.mrf.mxu0 }
 0x50a   : > { %v3242_v52 = vpop.f32.mrf.mxu2  ;;  %v3255_v60 = vpop.f32.mrf.mxu3 }
 0x50b   : > { %v3261_v0 = vadd.f32 %v3242_v52, %v3163_v59  ;;  %v3262_v4 = vadd.f32 %v3255_v60, %v3164_v53 }
 0x50c   : > { %v3229_v11 = vpop.f32.mrf.mxu1 }
 0x50d   : > { %v3277_v42 = vadd.f32 %v5148_v62, %v3261_v0  ;;  %v3278_v13 = vadd.f32 %v5151_v63, %v3262_v4  ;;  %v3260_v57 = vadd.f32 %v3229_v11, %v3162_v61 }
 0x50f   : > { %v3276_v18 = vadd.f32 %v5157_v19, %v3260_v57  ;;  %v3288_v43 = vadd.f32 %v3283_v12, %v3278_v13  ;;  %v3287_v22 = vadd.f32 %v3283_v12, %v3277_v42 }
 0x510   : > { %v3216_v20 = vpop.f32.mrf.mxu0 }
 0x511   : > { %v3286_v58 = vadd.f32 %v3283_v12, %v3276_v18  ;;  %v3294_v23 = vrot.slane %v3288_v43, 4  ;;  %v3259_v7 = vadd.f32 %v3216_v20, %v3161_v15 }
 0x512   : > { %v3257_v25 = vpop.f32.mrf.mxu3  ;;  %v3244_v62 = vpop.f32.mrf.mxu2 }
 0x513   : > { %v3297_v6 = vsel %vm3295_vm11, %v3287_v22, %v3294_v23  ;;  %v3275_v63 = vadd.f32 %v5163_v1, %v3259_v7  ;;  %v3293_v26 = vrot.slane %v3286_v58, 4 }
 0x514   : > { %3304 = vst.msk [vmem:[%s4110_s16 + $0x8] sm:$0x77] %vm3303_vm12, %v3297_v6  ;;  %v3231_v21 = vpop.f32.mrf.mxu1 }
 0x515   : > { %v3285_v37 = vadd.f32 %v3283_v12, %v3275_v63 }
 0x517   : > { %v3296_v27 = vsel %vm3295_vm11, %v3285_v37, %v3293_v26 }
 0x518   : > { %3300 = vst [vmem:[%s4110_s16] sm:$0x77] %v3296_v27  ;;  %v3218_v19 = vpop.f32.mrf.mxu0 }
 0x519 PF: > { %s17_s30 = sadd.s32 1, %s3900_s30   ;;  %s5201_s24 = smov %s3880_s25 }
 0x51a   : > { %p14_p12 = scmp.ge.s32.totalorder %s17_s30, 12   ;;  %s5202_s25 = smov %s4019_s14 }
 0x51b   : > { %s5203_s26 = smov %s3892_s28  ;;  %s5204_s27 = smov %s3896_s29 }
 0x51c   : > { %s5205_s28 = smov %s5208_s8  ;;  %s5206_s29 = smov %s5212_s9 }
 0x51d   :  { %16 = sbr.rel (!%p14_p12) target bundleno = 4 (0x4), region = 153 }

</bundles_post_ra>
